<compile_context>
chip_gen: v7x
topology: tpu7x:2x2x1
jax: 0.10.0
libtpu: 0.0.40
codegen_flags: <defaults>
</compile_context>

<pallas_src>
import functools
from types import SimpleNamespace

import jax
import jax.numpy as jnp
from jax import lax
from jax.experimental import pallas as pl
from jax.experimental.pallas import tpu as pltpu

_EPS = 1e-5

# Order in which per-block parameters are passed to the kernel.
PARAM_ORDER = [
    "ln_ff1_g", "ln_ff1_b", "ff1_w1", "ff1_b1", "ff1_w2", "ff1_b2",
    "ln_attn_g", "ln_attn_b", "wq_h", "wk_h", "wv_h", "wo", "bo", "rel_win",
    "ln_conv_g", "ln_conv_b", "pw1a_w", "pw1a_b", "pw1b_w", "pw1b_b",
    "dw_w", "dw_b", "pw2_w", "pw2_b",
    "ln_ff2_g", "ln_ff2_b", "ff2_w1", "ff2_b1", "ff2_w2", "ff2_b2",
    "ln_post_g", "ln_post_b",
]

# Matmul (MXU) operands are stored/fed as bf16; everything else stays f32.
_BF16_PARAMS = frozenset({
    "ff1_w1", "ff1_w2", "wq_h", "wk_h", "wv_h", "wo", "rel_win",
    "pw1a_w", "pw1b_w", "pw2_w", "ff2_w1", "ff2_w2",
})


def _conformer_block_kernel(x_ref, *refs, seq_len):
    (ln1g, ln1b, f1w1, f1b1, f1w2, f1b2,
     lnag, lnab, wqh, wkh, wvh, wo, bo, relw,
     lncg, lncb, p1aw, p1ab, p1bw, p1bb, dww, dwb, p2w, p2b,
     ln2g, ln2b, f2w1, f2b1, f2w2, f2b2,
     lnpg, lnpb) = refs[:len(PARAM_ORDER)]
    o_ref = refs[len(PARAM_ORDER)]

    f32, bf16 = jnp.float32, jnp.bfloat16
    x = x_ref[...].astype(f32)                     # (M, D) = (Bt*N, D)
    M, D = x.shape
    N = seq_len
    Bt = M // N
    heads, _, dh = wqh.shape

    def ln(h, g_ref, b_ref):
        mu = jnp.mean(h, axis=-1, keepdims=True)
        var = jnp.mean(jnp.square(h - mu), axis=-1, keepdims=True)
        return (h - mu) * lax.rsqrt(var + _EPS) * g_ref[...] + b_ref[...]

    def swish(h):
        return h * jax.nn.sigmoid(h)

    def mm(a, b):        # a @ b,   bf16 MXU operands, f32 accumulate
        return jnp.dot(a.astype(bf16), b.astype(bf16),
                       preferred_element_type=f32)

    def mm_t(a, b):      # a @ b.T without materialising a transpose
        return lax.dot_general(a.astype(bf16), b.astype(bf16),
                               (((1,), (1,)), ((), ())),
                               preferred_element_type=f32)

    def ffn(h, w1, b1, w2, b2):
        a = swish(mm(h, w1[...]) + b1[...])
        return mm(a, w2[...]) + b2[...]

    # ---- FF1: x += 0.5 * FF(LN(x)) ----
    x = x + 0.5 * ffn(ln(x, ln1g, ln1b), f1w1, f1b1, f1w2, f1b2)

    # ---- MHSA with Shaw-style relative positions ----
    h = ln(x, lnag, lnab)
    h16 = h.astype(bf16)
    relw_v = relw[...]                             # (Lpad, dh) bf16
    av = [[None] * heads for _ in range(Bt)]
    for hd in range(heads):
        # head-major projections: no dh-wide lane slicing of activations.
        q = mm(h16, wqh[hd])                       # (M, dh), 1/sqrt(dh) folded
        k = mm(h16, wkh[hd])
        v = mm(h16, wvh[hd])
        qb, kb, vb = q.astype(bf16), k.astype(bf16), v.astype(bf16)
        # rel-pos matmul batched over all Bt*N rows; rel_win row r holds the
        # embedding of relative distance (N-1)-r, bias row i is the window
        # pm[i, N-1-i : 2N-1-i].
        pm = mm_t(qb, relw_v)                      # (M, Lpad) f32
        for b in range(Bt):
            r0 = b * N
            qs, ks, vs = qb[r0:r0 + N], kb[r0:r0 + N], vb[r0:r0 + N]
            dots = mm_t(qs, ks)                    # (N, N)
            # strided per-sublane lane rotation: row i rolled by +i, then a
            # static lane window [N-1 : 2N-1] yields pm[i, N-1-i+j].
            pos = pltpu.roll(pm[r0:r0 + N], 0, 1,
                             stride=1, stride_axis=0)[:, N - 1:2 * N - 1]
            logits = dots + pos
            mx = jnp.max(logits, axis=-1, keepdims=True)
            p = jnp.exp(logits - mx)
            inv = pl.reciprocal(jnp.sum(p, axis=-1, keepdims=True), approx=True)
            av[b][hd] = jnp.dot(p.astype(bf16), vs,
                                preferred_element_type=f32) * inv
    # one (M, inner) x (inner, D) output projection (K = inner, not dh)
    av_all = jnp.concatenate(
        [jnp.concatenate(a, axis=1) for a in av], axis=0)      # (M, inner)
    x = x + mm(av_all, wo[...]) + bo[...]

    # ---- Convolution module ----
    h = ln(x, lncg, lncb)
    h16 = h.astype(bf16)
    g1 = mm(h16, p1aw[...]) + p1ab[...]            # GLU via split weights
    g2 = mm(h16, p1bw[...]) + p1bb[...]
    u = g1 * jax.nn.sigmoid(g2)                    # (M, CI)

    # depthwise conv1d along the sequence, in registers: cyclic sublane rolls
    # + iota masks handle "same" padding and Bt batch boundaries.  BatchNorm
    # (eval) is pre-folded into dww/dwb.
    K, CI = dww.shape
    pad_l = K // 2
    dwk = dww[...]                                 # (K, CI) f32
    n_idx = lax.broadcasted_iota(jnp.int32, (M, 1), 0) % N
    acc = jnp.zeros((M, CI), f32)
    for t in range(K):
        d = t - pad_l
        if d == 0:
            tap = u
        else:
            shifted = pltpu.roll(u, (-d) % M, 0)   # shifted[m] = u[m + d]
            if d < 0:
                tap = jnp.where(n_idx >= -d, shifted, 0.0)
            else:
                tap = jnp.where(n_idx < N - d, shifted, 0.0)
        acc = acc + tap * dwk[t:t + 1, :]
    acc = swish(acc + dwb[...])
    x = x + mm(acc, p2w[...]) + p2b[...]

    # ---- FF2 ----
    x = x + 0.5 * ffn(ln(x, ln2g, ln2b), f2w1, f2b1, f2w2, f2b2)

    # ---- post layer norm ----
    o_ref[...] = ln(x, lnpg, lnpb).astype(o_ref.dtype)


def _prepare_block_params(params, N):
    """Fold constants / reshape weights once in the wrapper."""
    f32, bf16 = jnp.float32, jnp.bfloat16
    D, inner = params["wq"].shape
    dh = params["rel_table"].shape[1]
    heads = inner // dh
    CI = params["dw_w"].shape[1]

    # Shaw rel-pos window for this N, lane-padded to a multiple of 128 rows
    # (the padded rows are never selected by the diagonal extraction).
    table = params["rel_table"]
    max_pos = (table.shape[0] - 1) // 2
    Lpad = max(128, ((2 * N - 1 + 127) // 128) * 128)
    r = jnp.arange(2 * N - 1)
    dist = jnp.clip((N - 1) - r, -max_pos, max_pos) + max_pos
    rel_win = jnp.zeros((Lpad, dh), f32).at[:2 * N - 1].set(table[dist])

    scale = dh ** -0.5

    def head_major(w, s=1.0):
        return (w * s).reshape(D, heads, dh).transpose(1, 0, 2)   # (H, D, dh)

    bn_s = params["bn_g"] * lax.rsqrt(params["bn_var"] + _EPS)    # (1, CI)

    kp = {
        "ln_ff1_g": params["ln_ff1_g"], "ln_ff1_b": params["ln_ff1_b"],
        "ff1_w1": params["ff1_w1"], "ff1_b1": params["ff1_b1"],
        "ff1_w2": params["ff1_w2"], "ff1_b2": params["ff1_b2"],
        "ln_attn_g": params["ln_attn_g"], "ln_attn_b": params["ln_attn_b"],
        "wq_h": head_major(params["wq"], scale),   # 1/sqrt(dh) folded into wq
        "wk_h": head_major(params["wk"]),
        "wv_h": head_major(params["wv"]),
        "wo": params["wo"], "bo": params["bo"],
        "rel_win": rel_win,
        "ln_conv_g": params["ln_conv_g"], "ln_conv_b": params["ln_conv_b"],
        "pw1a_w": params["pw1_w"][:, :CI], "pw1a_b": params["pw1_b"][:, :CI],
        "pw1b_w": params["pw1_w"][:, CI:], "pw1b_b": params["pw1_b"][:, CI:],
        # BatchNorm (eval mode) folded into the linear depthwise conv
        "dw_w": params["dw_w"] * bn_s,
        "dw_b": (params["dw_b"] - params["bn_mean"]) * bn_s + params["bn_b"],
        "pw2_w": params["pw2_w"], "pw2_b": params["pw2_b"],
        "ln_ff2_g": params["ln_ff2_g"], "ln_ff2_b": params["ln_ff2_b"],
        "ff2_w1": params["ff2_w1"], "ff2_b1": params["ff2_b1"],
        "ff2_w2": params["ff2_w2"], "ff2_b2": params["ff2_b2"],
        "ln_post_g": params["ln_post_g"], "ln_post_b": params["ln_post_b"],
    }
    return [kp[n].astype(bf16 if n in _BF16_PARAMS else f32)
            for n in PARAM_ORDER]


def conformer_block_pallas(x, params, *, batch_block=None):
    B, N, D = x.shape
    if batch_block is None:
        cap = max(1, 256 // N)        # keep the per-step slab a sane size
        batch_block = 1
        for c in range(1, B + 1):
            if B % c == 0 and c <= cap:
                batch_block = c
    assert B % batch_block == 0
    M = batch_block * N

    ordered = _prepare_block_params(params, N)
    x2 = x.reshape(B * N, D)

    # x / out are pipelined over the (blocked) batch grid; weights and tables
    # are whole-array VMEM residents (single-buffered constants).
    const_spec = pl.BlockSpec(memory_space=pltpu.MemorySpace.VMEM)
    in_specs = [pl.BlockSpec((M, D), lambda b: (b, 0))]
    in_specs += [const_spec] * len(ordered)

    out = pl.pallas_call(
        functools.partial(_conformer_block_kernel, seq_len=N),
        out_shape=jax.ShapeDtypeStruct((B * N, D), x.dtype),
        grid_spec=pltpu.PrefetchScalarGridSpec(
            num_scalar_prefetch=0,
            grid=(B // batch_block,),
            in_specs=in_specs,
            out_specs=pl.BlockSpec((M, D), lambda b: (b, 0)),
        ),
        compiler_params=pltpu.CompilerParams(
            dimension_semantics=("parallel",),
        ),
    )(x2, *ordered)
    return out.reshape(B, N, D)


def init_block_params(key, args):
    D = args.dim
    dh = args.dim_head
    H = args.heads
    inner = H * dh
    FF = D * args.ff_mult
    CI = D * args.conv_expansion_factor
    K = args.conv_kernel_size
    max_pos = 512

    keys = jax.random.split(key, 20)

    def w(k, shape, scale=0.05):
        return (scale * jax.random.normal(k, shape)).astype(jnp.float32)

    ones = lambda *s: jnp.ones(s, jnp.float32)
    zeros = lambda *s: jnp.zeros(s, jnp.float32)

    p = {}
    # FF1 (PreNorm + Linear/Swish/Linear)
    p["ln_ff1_g"], p["ln_ff1_b"] = ones(1, D), zeros(1, D)
    p["ff1_w1"], p["ff1_b1"] = w(keys[0], (D, FF)), w(keys[1], (1, FF))
    p["ff1_w2"], p["ff1_b2"] = w(keys[2], (FF, D)), w(keys[3], (1, D))
    # Attention (PreNorm) with Shaw relative-position table (shared over heads)
    p["ln_attn_g"], p["ln_attn_b"] = ones(1, D), zeros(1, D)
    p["wq"] = w(keys[4], (D, inner))
    p["wk"] = w(keys[5], (D, inner))
    p["wv"] = w(keys[6], (D, inner))
    p["wo"], p["bo"] = w(keys[7], (inner, D)), w(keys[8], (1, D))
    p["rel_table"] = w(keys[9], (2 * max_pos + 1, dh))
    # Conv module
    p["ln_conv_g"], p["ln_conv_b"] = ones(1, D), zeros(1, D)
    p["pw1_w"], p["pw1_b"] = w(keys[10], (D, 2 * CI)), w(keys[11], (1, 2 * CI))
    p["dw_w"], p["dw_b"] = w(keys[12], (K, CI)), w(keys[13], (1, CI))
    p["bn_g"], p["bn_b"] = ones(1, CI), zeros(1, CI)
    p["bn_mean"], p["bn_var"] = zeros(1, CI), ones(1, CI)
    p["pw2_w"], p["pw2_b"] = w(keys[14], (CI, D)), w(keys[15], (1, D))
    # FF2
    p["ln_ff2_g"], p["ln_ff2_b"] = ones(1, D), zeros(1, D)
    p["ff2_w1"], p["ff2_b1"] = w(keys[16], (D, FF)), w(keys[17], (1, FF))
    p["ff2_w2"], p["ff2_b2"] = w(keys[18], (FF, D)), w(keys[19], (1, D))
    # post norm
    p["ln_post_g"], p["ln_post_b"] = ones(1, D), zeros(1, D)
    return p


def conformer_block_ref(x, p):
    """Pure-JAX f32 reference of one ConformerBlock (eval mode)."""
    def ln(h, g, b):
        mu = h.mean(-1, keepdims=True)
        var = ((h - mu) ** 2).mean(-1, keepdims=True)
        return (h - mu) / jnp.sqrt(var + _EPS) * g + b

    def swish(h):
        return h * jax.nn.sigmoid(h)

    def ff(h, w1, b1, w2, b2):
        return swish(h @ w1 + b1) @ w2 + b2

    B, N, D = x.shape
    x = x + 0.5 * ff(ln(x, p["ln_ff1_g"], p["ln_ff1_b"]),
                     p["ff1_w1"], p["ff1_b1"], p["ff1_w2"], p["ff1_b2"])

    table = p["rel_table"]
    max_pos = (table.shape[0] - 1) // 2
    dh = table.shape[1]
    inner = p["wq"].shape[1]
    H = inner // dh
    scale = dh ** -0.5
    seq = jnp.arange(N)
    dist = jnp.clip(seq[:, None] - seq[None, :], -max_pos, max_pos) + max_pos
    rel = table[dist]                                      # (N, N, dh)

    h = ln(x, p["ln_attn_g"], p["ln_attn_b"])
    q = (h @ p["wq"]).reshape(B, N, H, dh).transpose(0, 2, 1, 3)
    k = (h @ p["wk"]).reshape(B, N, H, dh).transpose(0, 2, 1, 3)
    v = (h @ p["wv"]).reshape(B, N, H, dh).transpose(0, 2, 1, 3)
    dots = jnp.einsum('bhid,bhjd->bhij', q, k) * scale
    pos = jnp.einsum('bhnd,nrd->bhnr', q, rel) * scale
    attn = jax.nn.softmax(dots + pos, axis=-1)
    o = jnp.einsum('bhij,bhjd->bhid', attn, v).transpose(0, 2, 1, 3).reshape(B, N, inner)
    x = x + o @ p["wo"] + p["bo"]

    h = ln(x, p["ln_conv_g"], p["ln_conv_b"])
    g = h @ p["pw1_w"] + p["pw1_b"]
    CI = p["dw_w"].shape[1]
    u = g[..., :CI] * jax.nn.sigmoid(g[..., CI:])
    K = p["dw_w"].shape[0]
    pad_l, pad_r = K // 2, K // 2 - (K + 1) % 2
    up = jnp.pad(u, ((0, 0), (pad_l, pad_r), (0, 0)))
    acc = sum(up[:, t:t + N, :] * p["dw_w"][t] for t in range(K)) + p["dw_b"]
    acc = (acc - p["bn_mean"]) / jnp.sqrt(p["bn_var"] + _EPS) * p["bn_g"] + p["bn_b"]
    acc = swish(acc)
    x = x + acc @ p["pw2_w"] + p["pw2_b"]

    x = x + 0.5 * ff(ln(x, p["ln_ff2_g"], p["ln_ff2_b"]),
                     p["ff2_w1"], p["ff2_b1"], p["ff2_w2"], p["ff2_b2"])
    return ln(x, p["ln_post_g"], p["ln_post_b"])


if __name__ == "__main__":
    # args implied by Enc_body.__init__
    args = SimpleNamespace(
        n_enc_layers=2, dim=32, dim_head=8, heads=4, ff_mult=4,
        conv_expansion_factor=2, conv_kernel_size=7,
        attn_dropout=0.0, ff_dropout=0.0, conv_dropout=0.0,
    )
    B, N = 2, 8

    key = jax.random.PRNGKey(0)
    kx, *klayers = jax.random.split(key, args.n_enc_layers + 1)
    x = jax.random.normal(kx, (B, N, args.dim), jnp.float32)

    layer_params = [init_block_params(klayers[i], args)
                    for i in range(args.n_enc_layers)]

    # Enc_body.forward: sequential stack of conformer blocks
    out = x
    for p in layer_params:
        out = conformer_block_pallas(out, p)
    out = jax.block_until_ready(out)

    # sanity check against the f32 pure-JAX reference (kernel uses bf16 MXU
    # operands and an approximate softmax reciprocal, hence the tolerance)
    ref = x
    for p in layer_params:
        ref = conformer_block_ref(ref, p)
    ref = jax.block_until_ready(ref)

    assert out.shape == x.shape and out.dtype == x.dtype
    max_err = float(jnp.max(jnp.abs(out - ref)))
    if max_err > 5e-2:
        raise AssertionError(f"Pallas/reference mismatch, max_err={max_err}")

    # TODO(synk): dropout (train mode) and BatchNorm batch-statistics mode are
    # training-only / stochastic; eval-mode semantics are implemented.
    print("KERNEL_OK")
</pallas_src>

<mosaic_0001>
module attributes {stable_mosaic.version = 11 : i64} {
  func.func @_conformer_block_kernel(%arg0: i32, %arg1: memref<16x32xf32, #tpu.memory_space<vmem>>, %arg2: memref<1x32xf32, #tpu.memory_space<vmem>>, %arg3: memref<1x32xf32, #tpu.memory_space<vmem>>, %arg4: memref<32x128xbf16, #tpu.memory_space<vmem>>, %arg5: memref<1x128xf32, #tpu.memory_space<vmem>>, %arg6: memref<128x32xbf16, #tpu.memory_space<vmem>>, %arg7: memref<1x32xf32, #tpu.memory_space<vmem>>, %arg8: memref<1x32xf32, #tpu.memory_space<vmem>>, %arg9: memref<1x32xf32, #tpu.memory_space<vmem>>, %arg10: memref<4x32x8xbf16, #tpu.memory_space<vmem>>, %arg11: memref<4x32x8xbf16, #tpu.memory_space<vmem>>, %arg12: memref<4x32x8xbf16, #tpu.memory_space<vmem>>, %arg13: memref<32x32xbf16, #tpu.memory_space<vmem>>, %arg14: memref<1x32xf32, #tpu.memory_space<vmem>>, %arg15: memref<128x8xbf16, #tpu.memory_space<vmem>>, %arg16: memref<1x32xf32, #tpu.memory_space<vmem>>, %arg17: memref<1x32xf32, #tpu.memory_space<vmem>>, %arg18: memref<32x64xbf16, #tpu.memory_space<vmem>>, %arg19: memref<1x64xf32, #tpu.memory_space<vmem>>, %arg20: memref<32x64xbf16, #tpu.memory_space<vmem>>, %arg21: memref<1x64xf32, #tpu.memory_space<vmem>>, %arg22: memref<7x64xf32, #tpu.memory_space<vmem>>, %arg23: memref<1x64xf32, #tpu.memory_space<vmem>>, %arg24: memref<64x32xbf16, #tpu.memory_space<vmem>>, %arg25: memref<1x32xf32, #tpu.memory_space<vmem>>, %arg26: memref<1x32xf32, #tpu.memory_space<vmem>>, %arg27: memref<1x32xf32, #tpu.memory_space<vmem>>, %arg28: memref<32x128xbf16, #tpu.memory_space<vmem>>, %arg29: memref<1x128xf32, #tpu.memory_space<vmem>>, %arg30: memref<128x32xbf16, #tpu.memory_space<vmem>>, %arg31: memref<1x32xf32, #tpu.memory_space<vmem>>, %arg32: memref<1x32xf32, #tpu.memory_space<vmem>>, %arg33: memref<1x32xf32, #tpu.memory_space<vmem>>, %arg34: memref<16x32xf32, #tpu.memory_space<vmem>>) attributes {dimension_semantics = [#tpu.dimension_semantics<parallel>], iteration_bounds = array<i64: 1>, scalar_prefetch = 0 : i64, scratch_operands = 0 : i64, tpu.core_type = #tpu.core_type<tc>, window_params = [{transform_indices = @transform_0, window_bounds = array<i64: 16, 32>}, {pipeline_mode = #tpu.pipeline_mode<synchronous>, transform_indices = @transform_1, window_bounds = array<i64: 1, 32>}, {pipeline_mode = #tpu.pipeline_mode<synchronous>, transform_indices = @transform_2, window_bounds = array<i64: 1, 32>}, {pipeline_mode = #tpu.pipeline_mode<synchronous>, transform_indices = @transform_3, window_bounds = array<i64: 32, 128>}, {pipeline_mode = #tpu.pipeline_mode<synchronous>, transform_indices = @transform_4, window_bounds = array<i64: 1, 128>}, {pipeline_mode = #tpu.pipeline_mode<synchronous>, transform_indices = @transform_5, window_bounds = array<i64: 128, 32>}, {pipeline_mode = #tpu.pipeline_mode<synchronous>, transform_indices = @transform_6, window_bounds = array<i64: 1, 32>}, {pipeline_mode = #tpu.pipeline_mode<synchronous>, transform_indices = @transform_7, window_bounds = array<i64: 1, 32>}, {pipeline_mode = #tpu.pipeline_mode<synchronous>, transform_indices = @transform_8, window_bounds = array<i64: 1, 32>}, {pipeline_mode = #tpu.pipeline_mode<synchronous>, transform_indices = @transform_9, window_bounds = array<i64: 4, 32, 8>}, {pipeline_mode = #tpu.pipeline_mode<synchronous>, transform_indices = @transform_10, window_bounds = array<i64: 4, 32, 8>}, {pipeline_mode = #tpu.pipeline_mode<synchronous>, transform_indices = @transform_11, window_bounds = array<i64: 4, 32, 8>}, {pipeline_mode = #tpu.pipeline_mode<synchronous>, transform_indices = @transform_12, window_bounds = array<i64: 32, 32>}, {pipeline_mode = #tpu.pipeline_mode<synchronous>, transform_indices = @transform_13, window_bounds = array<i64: 1, 32>}, {pipeline_mode = #tpu.pipeline_mode<synchronous>, transform_indices = @transform_14, window_bounds = array<i64: 128, 8>}, {pipeline_mode = #tpu.pipeline_mode<synchronous>, transform_indices = @transform_15, window_bounds = array<i64: 1, 32>}, {pipeline_mode = #tpu.pipeline_mode<synchronous>, transform_indices = @transform_16, window_bounds = array<i64: 1, 32>}, {pipeline_mode = #tpu.pipeline_mode<synchronous>, transform_indices = @transform_17, window_bounds = array<i64: 32, 64>}, {pipeline_mode = #tpu.pipeline_mode<synchronous>, transform_indices = @transform_18, window_bounds = array<i64: 1, 64>}, {pipeline_mode = #tpu.pipeline_mode<synchronous>, transform_indices = @transform_19, window_bounds = array<i64: 32, 64>}, {pipeline_mode = #tpu.pipeline_mode<synchronous>, transform_indices = @transform_20, window_bounds = array<i64: 1, 64>}, {pipeline_mode = #tpu.pipeline_mode<synchronous>, transform_indices = @transform_21, window_bounds = array<i64: 7, 64>}, {pipeline_mode = #tpu.pipeline_mode<synchronous>, transform_indices = @transform_22, window_bounds = array<i64: 1, 64>}, {pipeline_mode = #tpu.pipeline_mode<synchronous>, transform_indices = @transform_23, window_bounds = array<i64: 64, 32>}, {pipeline_mode = #tpu.pipeline_mode<synchronous>, transform_indices = @transform_24, window_bounds = array<i64: 1, 32>}, {pipeline_mode = #tpu.pipeline_mode<synchronous>, transform_indices = @transform_25, window_bounds = array<i64: 1, 32>}, {pipeline_mode = #tpu.pipeline_mode<synchronous>, transform_indices = @transform_26, window_bounds = array<i64: 1, 32>}, {pipeline_mode = #tpu.pipeline_mode<synchronous>, transform_indices = @transform_27, window_bounds = array<i64: 32, 128>}, {pipeline_mode = #tpu.pipeline_mode<synchronous>, transform_indices = @transform_28, window_bounds = array<i64: 1, 128>}, {pipeline_mode = #tpu.pipeline_mode<synchronous>, transform_indices = @transform_29, window_bounds = array<i64: 128, 32>}, {pipeline_mode = #tpu.pipeline_mode<synchronous>, transform_indices = @transform_30, window_bounds = array<i64: 1, 32>}, {pipeline_mode = #tpu.pipeline_mode<synchronous>, transform_indices = @transform_31, window_bounds = array<i64: 1, 32>}, {pipeline_mode = #tpu.pipeline_mode<synchronous>, transform_indices = @transform_32, window_bounds = array<i64: 1, 32>}, {transform_indices = @transform_33, window_bounds = array<i64: 16, 32>}]} {
    %c0 = arith.constant 0 : index
    %c0_0 = arith.constant 0 : index
    %0 = vector.load %arg1[%c0, %c0_0] : memref<16x32xf32, #tpu.memory_space<vmem>>, vector<16x32xf32>
    %cst = arith.constant dense<0.000000e+00> : vector<16xf32>
    %1 = vector.multi_reduction <add>, %0, %cst [1] : vector<16x32xf32> to vector<16xf32>
    %2 = vector.shape_cast %1 : vector<16xf32> to vector<16x1xf32>
    %cst_1 = arith.constant 3.200000e+01 : f32
    %3 = vector.broadcast %cst_1 : f32 to vector<16x1xf32>
    %4 = arith.divf %2, %3 : vector<16x1xf32>
    %5 = vector.broadcast %4 : vector<16x1xf32> to vector<16x32xf32>
    %6 = arith.subf %0, %5 : vector<16x32xf32>
    %7 = arith.mulf %6, %6 : vector<16x32xf32>
    %cst_2 = arith.constant dense<0.000000e+00> : vector<16xf32>
    %8 = vector.multi_reduction <add>, %7, %cst_2 [1] : vector<16x32xf32> to vector<16xf32>
    %9 = vector.shape_cast %8 : vector<16xf32> to vector<16x1xf32>
    %cst_3 = arith.constant 3.200000e+01 : f32
    %10 = vector.broadcast %cst_3 : f32 to vector<16x1xf32>
    %11 = arith.divf %9, %10 : vector<16x1xf32>
    %12 = vector.broadcast %4 : vector<16x1xf32> to vector<16x32xf32>
    %13 = arith.subf %0, %12 : vector<16x32xf32>
    %cst_4 = arith.constant 9.99999974E-6 : f32
    %14 = vector.broadcast %cst_4 : f32 to vector<16x1xf32>
    %15 = arith.addf %11, %14 : vector<16x1xf32>
    %16 = math.rsqrt %15 : vector<16x1xf32>
    %17 = vector.broadcast %16 : vector<16x1xf32> to vector<16x32xf32>
    %18 = arith.mulf %13, %17 : vector<16x32xf32>
    %c0_5 = arith.constant 0 : index
    %c0_6 = arith.constant 0 : index
    %19 = vector.load %arg2[%c0_5, %c0_6] : memref<1x32xf32, #tpu.memory_space<vmem>>, vector<1x32xf32>
    %20 = vector.broadcast %19 : vector<1x32xf32> to vector<16x32xf32>
    %21 = arith.mulf %18, %20 : vector<16x32xf32>
    %c0_7 = arith.constant 0 : index
    %c0_8 = arith.constant 0 : index
    %22 = vector.load %arg3[%c0_7, %c0_8] : memref<1x32xf32, #tpu.memory_space<vmem>>, vector<1x32xf32>
    %23 = vector.broadcast %22 : vector<1x32xf32> to vector<16x32xf32>
    %24 = arith.addf %21, %23 : vector<16x32xf32>
    %c0_9 = arith.constant 0 : index
    %c0_10 = arith.constant 0 : index
    %25 = vector.load %arg4[%c0_9, %c0_10] : memref<32x128xbf16, #tpu.memory_space<vmem>>, vector<32x128xbf16>
    %26 = arith.truncf %24 : vector<16x32xf32> to vector<16x32xbf16>
    %cst_11 = arith.constant dense<0.000000e+00> : vector<16x128xf32>
    %27 = tpu.matmul %26, %25, %cst_11 {dimension_numbers = #tpu.dot_dimension_numbers<[1], [0], [0], [1], [0, 0, 1, 1], [], []>} : vector<16x32xbf16>, vector<32x128xbf16>, vector<16x128xf32> -> vector<16x128xf32>
    %c0_12 = arith.constant 0 : index
    %c0_13 = arith.constant 0 : index
    %28 = vector.load %arg5[%c0_12, %c0_13] : memref<1x128xf32, #tpu.memory_space<vmem>>, vector<1x128xf32>
    %29 = vector.broadcast %28 : vector<1x128xf32> to vector<16x128xf32>
    %30 = arith.addf %27, %29 : vector<16x128xf32>
    %31 = arith.negf %30 : vector<16x128xf32>
    %32 = math.exp %31 : vector<16x128xf32>
    %cst_14 = arith.constant 1.000000e+00 : f32
    %33 = vector.broadcast %cst_14 : f32 to vector<16x128xf32>
    %34 = arith.addf %33, %32 : vector<16x128xf32>
    %35 = arith.divf %33, %34 : vector<16x128xf32>
    %36 = arith.mulf %30, %35 : vector<16x128xf32>
    %c0_15 = arith.constant 0 : index
    %c0_16 = arith.constant 0 : index
    %37 = vector.load %arg6[%c0_15, %c0_16] : memref<128x32xbf16, #tpu.memory_space<vmem>>, vector<128x32xbf16>
    %38 = arith.truncf %36 : vector<16x128xf32> to vector<16x128xbf16>
    %cst_17 = arith.constant dense<0.000000e+00> : vector<16x32xf32>
    %39 = tpu.matmul %38, %37, %cst_17 {dimension_numbers = #tpu.dot_dimension_numbers<[1], [0], [0], [1], [0, 0, 1, 1], [], []>} : vector<16x128xbf16>, vector<128x32xbf16>, vector<16x32xf32> -> vector<16x32xf32>
    %c0_18 = arith.constant 0 : index
    %c0_19 = arith.constant 0 : index
    %40 = vector.load %arg7[%c0_18, %c0_19] : memref<1x32xf32, #tpu.memory_space<vmem>>, vector<1x32xf32>
    %41 = vector.broadcast %40 : vector<1x32xf32> to vector<16x32xf32>
    %42 = arith.addf %39, %41 : vector<16x32xf32>
    %cst_20 = arith.constant 5.000000e-01 : f32
    %43 = vector.broadcast %cst_20 : f32 to vector<16x32xf32>
    %44 = arith.mulf %43, %42 : vector<16x32xf32>
    %45 = arith.addf %0, %44 : vector<16x32xf32>
    %cst_21 = arith.constant dense<0.000000e+00> : vector<16xf32>
    %46 = vector.multi_reduction <add>, %45, %cst_21 [1] : vector<16x32xf32> to vector<16xf32>
    %47 = vector.shape_cast %46 : vector<16xf32> to vector<16x1xf32>
    %cst_22 = arith.constant 3.200000e+01 : f32
    %48 = vector.broadcast %cst_22 : f32 to vector<16x1xf32>
    %49 = arith.divf %47, %48 : vector<16x1xf32>
    %50 = vector.broadcast %49 : vector<16x1xf32> to vector<16x32xf32>
    %51 = arith.subf %45, %50 : vector<16x32xf32>
    %52 = arith.mulf %51, %51 : vector<16x32xf32>
    %cst_23 = arith.constant dense<0.000000e+00> : vector<16xf32>
    %53 = vector.multi_reduction <add>, %52, %cst_23 [1] : vector<16x32xf32> to vector<16xf32>
    %54 = vector.shape_cast %53 : vector<16xf32> to vector<16x1xf32>
    %cst_24 = arith.constant 3.200000e+01 : f32
    %55 = vector.broadcast %cst_24 : f32 to vector<16x1xf32>
    %56 = arith.divf %54, %55 : vector<16x1xf32>
    %57 = vector.broadcast %49 : vector<16x1xf32> to vector<16x32xf32>
    %58 = arith.subf %45, %57 : vector<16x32xf32>
    %cst_25 = arith.constant 9.99999974E-6 : f32
    %59 = vector.broadcast %cst_25 : f32 to vector<16x1xf32>
    %60 = arith.addf %56, %59 : vector<16x1xf32>
    %61 = math.rsqrt %60 : vector<16x1xf32>
    %62 = vector.broadcast %61 : vector<16x1xf32> to vector<16x32xf32>
    %63 = arith.mulf %58, %62 : vector<16x32xf32>
    %c0_26 = arith.constant 0 : index
    %c0_27 = arith.constant 0 : index
    %64 = vector.load %arg8[%c0_26, %c0_27] : memref<1x32xf32, #tpu.memory_space<vmem>>, vector<1x32xf32>
    %65 = vector.broadcast %64 : vector<1x32xf32> to vector<16x32xf32>
    %66 = arith.mulf %63, %65 : vector<16x32xf32>
    %c0_28 = arith.constant 0 : index
    %c0_29 = arith.constant 0 : index
    %67 = vector.load %arg9[%c0_28, %c0_29] : memref<1x32xf32, #tpu.memory_space<vmem>>, vector<1x32xf32>
    %68 = vector.broadcast %67 : vector<1x32xf32> to vector<16x32xf32>
    %69 = arith.addf %66, %68 : vector<16x32xf32>
    %70 = arith.truncf %69 : vector<16x32xf32> to vector<16x32xbf16>
    %c0_30 = arith.constant 0 : index
    %c0_31 = arith.constant 0 : index
    %71 = vector.load %arg15[%c0_30, %c0_31] : memref<128x8xbf16, #tpu.memory_space<vmem>>, vector<128x8xbf16>
    %c0_32 = arith.constant 0 : index
    %c0_33 = arith.constant 0 : index
    %c0_34 = arith.constant 0 : index
    %72 = vector.load %arg10[%c0_32, %c0_33, %c0_34] : memref<4x32x8xbf16, #tpu.memory_space<vmem>>, vector<1x32x8xbf16>
    %73 = vector.shape_cast %72 : vector<1x32x8xbf16> to vector<32x8xbf16>
    %cst_35 = arith.constant dense<0.000000e+00> : vector<16x8xf32>
    %74 = tpu.matmul %70, %73, %cst_35 {dimension_numbers = #tpu.dot_dimension_numbers<[1], [0], [0], [1], [0, 0, 1, 1], [], []>} : vector<16x32xbf16>, vector<32x8xbf16>, vector<16x8xf32> -> vector<16x8xf32>
    %c0_36 = arith.constant 0 : index
    %c0_37 = arith.constant 0 : index
    %c0_38 = arith.constant 0 : index
    %75 = vector.load %arg11[%c0_36, %c0_37, %c0_38] : memref<4x32x8xbf16, #tpu.memory_space<vmem>>, vector<1x32x8xbf16>
    %76 = vector.shape_cast %75 : vector<1x32x8xbf16> to vector<32x8xbf16>
    %cst_39 = arith.constant dense<0.000000e+00> : vector<16x8xf32>
    %77 = tpu.matmul %70, %76, %cst_39 {dimension_numbers = #tpu.dot_dimension_numbers<[1], [0], [0], [1], [0, 0, 1, 1], [], []>} : vector<16x32xbf16>, vector<32x8xbf16>, vector<16x8xf32> -> vector<16x8xf32>
    %c0_40 = arith.constant 0 : index
    %c0_41 = arith.constant 0 : index
    %c0_42 = arith.constant 0 : index
    %78 = vector.load %arg12[%c0_40, %c0_41, %c0_42] : memref<4x32x8xbf16, #tpu.memory_space<vmem>>, vector<1x32x8xbf16>
    %79 = vector.shape_cast %78 : vector<1x32x8xbf16> to vector<32x8xbf16>
    %cst_43 = arith.constant dense<0.000000e+00> : vector<16x8xf32>
    %80 = tpu.matmul %70, %79, %cst_43 {dimension_numbers = #tpu.dot_dimension_numbers<[1], [0], [0], [1], [0, 0, 1, 1], [], []>} : vector<16x32xbf16>, vector<32x8xbf16>, vector<16x8xf32> -> vector<16x8xf32>
    %81 = arith.truncf %74 : vector<16x8xf32> to vector<16x8xbf16>
    %82 = arith.truncf %77 : vector<16x8xf32> to vector<16x8xbf16>
    %83 = arith.truncf %80 : vector<16x8xf32> to vector<16x8xbf16>
    %cst_44 = arith.constant dense<0.000000e+00> : vector<16x128xf32>
    %84 = tpu.matmul %81, %71, %cst_44 {dimension_numbers = #tpu.dot_dimension_numbers<[1], [1], [0], [0], [0, 0, 1, 0], [], []>} : vector<16x8xbf16>, vector<128x8xbf16>, vector<16x128xf32> -> vector<16x128xf32>
    %85 = vector.extract_strided_slice %81 {offsets = [0, 0], sizes = [8, 8], strides = [1, 1]} : vector<16x8xbf16> to vector<8x8xbf16>
    %86 = vector.extract_strided_slice %82 {offsets = [0, 0], sizes = [8, 8], strides = [1, 1]} : vector<16x8xbf16> to vector<8x8xbf16>
    %87 = vector.extract_strided_slice %83 {offsets = [0, 0], sizes = [8, 8], strides = [1, 1]} : vector<16x8xbf16> to vector<8x8xbf16>
    %cst_45 = arith.constant dense<0.000000e+00> : vector<8x8xf32>
    %88 = tpu.matmul %85, %86, %cst_45 {dimension_numbers = #tpu.dot_dimension_numbers<[1], [1], [0], [0], [0, 0, 1, 0], [], []>} : vector<8x8xbf16>, vector<8x8xbf16>, vector<8x8xf32> -> vector<8x8xf32>
    %89 = vector.extract_strided_slice %84 {offsets = [0, 0], sizes = [8, 128], strides = [1, 1]} : vector<16x128xf32> to vector<8x128xf32>
    %c0_i32 = arith.constant 0 : i32
    %90 = tpu.dynamic_rotate %89 by %c0_i32 dim 1 {stride = 1 : si32, stride_dimension = 0 : si32} : vector<8x128xf32>, i32 -> vector<8x128xf32>
    %91 = vector.extract_strided_slice %90 {offsets = [0, 7], sizes = [8, 8], strides = [1, 1]} : vector<8x128xf32> to vector<8x8xf32>
    %92 = arith.addf %88, %91 : vector<8x8xf32>
    %cst_46 = arith.constant dense<0xFF800000> : vector<8xf32>
    %93 = vector.multi_reduction <maximumf>, %92, %cst_46 [1] : vector<8x8xf32> to vector<8xf32>
    %94 = vector.shape_cast %93 : vector<8xf32> to vector<8x1xf32>
    %95 = vector.broadcast %94 : vector<8x1xf32> to vector<8x8xf32>
    %96 = arith.subf %92, %95 : vector<8x8xf32>
    %97 = math.exp %96 : vector<8x8xf32>
    %cst_47 = arith.constant dense<0.000000e+00> : vector<8xf32>
    %98 = vector.multi_reduction <add>, %97, %cst_47 [1] : vector<8x8xf32> to vector<8xf32>
    %99 = vector.shape_cast %98 : vector<8xf32> to vector<8x1xf32>
    %100 = tpu.reciprocal %99 {approx = true} : vector<8x1xf32> -> vector<8x1xf32>
    %101 = arith.truncf %97 : vector<8x8xf32> to vector<8x8xbf16>
    %cst_48 = arith.constant dense<0.000000e+00> : vector<8x8xf32>
    %102 = tpu.matmul %101, %87, %cst_48 {dimension_numbers = #tpu.dot_dimension_numbers<[1], [0], [0], [1], [0, 0, 1, 1], [], []>} : vector<8x8xbf16>, vector<8x8xbf16>, vector<8x8xf32> -> vector<8x8xf32>
    %103 = vector.broadcast %100 : vector<8x1xf32> to vector<8x8xf32>
    %104 = arith.mulf %102, %103 : vector<8x8xf32>
    %105 = vector.extract_strided_slice %81 {offsets = [8, 0], sizes = [8, 8], strides = [1, 1]} : vector<16x8xbf16> to vector<8x8xbf16>
    %106 = vector.extract_strided_slice %82 {offsets = [8, 0], sizes = [8, 8], strides = [1, 1]} : vector<16x8xbf16> to vector<8x8xbf16>
    %107 = vector.extract_strided_slice %83 {offsets = [8, 0], sizes = [8, 8], strides = [1, 1]} : vector<16x8xbf16> to vector<8x8xbf16>
    %cst_49 = arith.constant dense<0.000000e+00> : vector<8x8xf32>
    %108 = tpu.matmul %105, %106, %cst_49 {dimension_numbers = #tpu.dot_dimension_numbers<[1], [1], [0], [0], [0, 0, 1, 0], [], []>} : vector<8x8xbf16>, vector<8x8xbf16>, vector<8x8xf32> -> vector<8x8xf32>
    %109 = vector.extract_strided_slice %84 {offsets = [8, 0], sizes = [8, 128], strides = [1, 1]} : vector<16x128xf32> to vector<8x128xf32>
    %c0_i32_50 = arith.constant 0 : i32
    %110 = tpu.dynamic_rotate %109 by %c0_i32_50 dim 1 {stride = 1 : si32, stride_dimension = 0 : si32} : vector<8x128xf32>, i32 -> vector<8x128xf32>
    %111 = vector.extract_strided_slice %110 {offsets = [0, 7], sizes = [8, 8], strides = [1, 1]} : vector<8x128xf32> to vector<8x8xf32>
    %112 = arith.addf %108, %111 : vector<8x8xf32>
    %cst_51 = arith.constant dense<0xFF800000> : vector<8xf32>
    %113 = vector.multi_reduction <maximumf>, %112, %cst_51 [1] : vector<8x8xf32> to vector<8xf32>
    %114 = vector.shape_cast %113 : vector<8xf32> to vector<8x1xf32>
    %115 = vector.broadcast %114 : vector<8x1xf32> to vector<8x8xf32>
    %116 = arith.subf %112, %115 : vector<8x8xf32>
    %117 = math.exp %116 : vector<8x8xf32>
    %cst_52 = arith.constant dense<0.000000e+00> : vector<8xf32>
    %118 = vector.multi_reduction <add>, %117, %cst_52 [1] : vector<8x8xf32> to vector<8xf32>
    %119 = vector.shape_cast %118 : vector<8xf32> to vector<8x1xf32>
    %120 = tpu.reciprocal %119 {approx = true} : vector<8x1xf32> -> vector<8x1xf32>
    %121 = arith.truncf %117 : vector<8x8xf32> to vector<8x8xbf16>
    %cst_53 = arith.constant dense<0.000000e+00> : vector<8x8xf32>
    %122 = tpu.matmul %121, %107, %cst_53 {dimension_numbers = #tpu.dot_dimension_numbers<[1], [0], [0], [1], [0, 0, 1, 1], [], []>} : vector<8x8xbf16>, vector<8x8xbf16>, vector<8x8xf32> -> vector<8x8xf32>
    %123 = vector.broadcast %120 : vector<8x1xf32> to vector<8x8xf32>
    %124 = arith.mulf %122, %123 : vector<8x8xf32>
    %c1 = arith.constant 1 : index
    %c0_54 = arith.constant 0 : index
    %c0_55 = arith.constant 0 : index
    %125 = vector.load %arg10[%c1, %c0_54, %c0_55] : memref<4x32x8xbf16, #tpu.memory_space<vmem>>, vector<1x32x8xbf16>
    %126 = vector.shape_cast %125 : vector<1x32x8xbf16> to vector<32x8xbf16>
    %cst_56 = arith.constant dense<0.000000e+00> : vector<16x8xf32>
    %127 = tpu.matmul %70, %126, %cst_56 {dimension_numbers = #tpu.dot_dimension_numbers<[1], [0], [0], [1], [0, 0, 1, 1], [], []>} : vector<16x32xbf16>, vector<32x8xbf16>, vector<16x8xf32> -> vector<16x8xf32>
    %c1_57 = arith.constant 1 : index
    %c0_58 = arith.constant 0 : index
    %c0_59 = arith.constant 0 : index
    %128 = vector.load %arg11[%c1_57, %c0_58, %c0_59] : memref<4x32x8xbf16, #tpu.memory_space<vmem>>, vector<1x32x8xbf16>
    %129 = vector.shape_cast %128 : vector<1x32x8xbf16> to vector<32x8xbf16>
    %cst_60 = arith.constant dense<0.000000e+00> : vector<16x8xf32>
    %130 = tpu.matmul %70, %129, %cst_60 {dimension_numbers = #tpu.dot_dimension_numbers<[1], [0], [0], [1], [0, 0, 1, 1], [], []>} : vector<16x32xbf16>, vector<32x8xbf16>, vector<16x8xf32> -> vector<16x8xf32>
    %c1_61 = arith.constant 1 : index
    %c0_62 = arith.constant 0 : index
    %c0_63 = arith.constant 0 : index
    %131 = vector.load %arg12[%c1_61, %c0_62, %c0_63] : memref<4x32x8xbf16, #tpu.memory_space<vmem>>, vector<1x32x8xbf16>
    %132 = vector.shape_cast %131 : vector<1x32x8xbf16> to vector<32x8xbf16>
    %cst_64 = arith.constant dense<0.000000e+00> : vector<16x8xf32>
    %133 = tpu.matmul %70, %132, %cst_64 {dimension_numbers = #tpu.dot_dimension_numbers<[1], [0], [0], [1], [0, 0, 1, 1], [], []>} : vector<16x32xbf16>, vector<32x8xbf16>, vector<16x8xf32> -> vector<16x8xf32>
    %134 = arith.truncf %127 : vector<16x8xf32> to vector<16x8xbf16>
    %135 = arith.truncf %130 : vector<16x8xf32> to vector<16x8xbf16>
    %136 = arith.truncf %133 : vector<16x8xf32> to vector<16x8xbf16>
    %cst_65 = arith.constant dense<0.000000e+00> : vector<16x128xf32>
    %137 = tpu.matmul %134, %71, %cst_65 {dimension_numbers = #tpu.dot_dimension_numbers<[1], [1], [0], [0], [0, 0, 1, 0], [], []>} : vector<16x8xbf16>, vector<128x8xbf16>, vector<16x128xf32> -> vector<16x128xf32>
    %138 = vector.extract_strided_slice %134 {offsets = [0, 0], sizes = [8, 8], strides = [1, 1]} : vector<16x8xbf16> to vector<8x8xbf16>
    %139 = vector.extract_strided_slice %135 {offsets = [0, 0], sizes = [8, 8], strides = [1, 1]} : vector<16x8xbf16> to vector<8x8xbf16>
    %140 = vector.extract_strided_slice %136 {offsets = [0, 0], sizes = [8, 8], strides = [1, 1]} : vector<16x8xbf16> to vector<8x8xbf16>
    %cst_66 = arith.constant dense<0.000000e+00> : vector<8x8xf32>
    %141 = tpu.matmul %138, %139, %cst_66 {dimension_numbers = #tpu.dot_dimension_numbers<[1], [1], [0], [0], [0, 0, 1, 0], [], []>} : vector<8x8xbf16>, vector<8x8xbf16>, vector<8x8xf32> -> vector<8x8xf32>
    %142 = vector.extract_strided_slice %137 {offsets = [0, 0], sizes = [8, 128], strides = [1, 1]} : vector<16x128xf32> to vector<8x128xf32>
    %c0_i32_67 = arith.constant 0 : i32
    %143 = tpu.dynamic_rotate %142 by %c0_i32_67 dim 1 {stride = 1 : si32, stride_dimension = 0 : si32} : vector<8x128xf32>, i32 -> vector<8x128xf32>
    %144 = vector.extract_strided_slice %143 {offsets = [0, 7], sizes = [8, 8], strides = [1, 1]} : vector<8x128xf32> to vector<8x8xf32>
    %145 = arith.addf %141, %144 : vector<8x8xf32>
    %cst_68 = arith.constant dense<0xFF800000> : vector<8xf32>
    %146 = vector.multi_reduction <maximumf>, %145, %cst_68 [1] : vector<8x8xf32> to vector<8xf32>
    %147 = vector.shape_cast %146 : vector<8xf32> to vector<8x1xf32>
    %148 = vector.broadcast %147 : vector<8x1xf32> to vector<8x8xf32>
    %149 = arith.subf %145, %148 : vector<8x8xf32>
    %150 = math.exp %149 : vector<8x8xf32>
    %cst_69 = arith.constant dense<0.000000e+00> : vector<8xf32>
    %151 = vector.multi_reduction <add>, %150, %cst_69 [1] : vector<8x8xf32> to vector<8xf32>
    %152 = vector.shape_cast %151 : vector<8xf32> to vector<8x1xf32>
    %153 = tpu.reciprocal %152 {approx = true} : vector<8x1xf32> -> vector<8x1xf32>
    %154 = arith.truncf %150 : vector<8x8xf32> to vector<8x8xbf16>
    %cst_70 = arith.constant dense<0.000000e+00> : vector<8x8xf32>
    %155 = tpu.matmul %154, %140, %cst_70 {dimension_numbers = #tpu.dot_dimension_numbers<[1], [0], [0], [1], [0, 0, 1, 1], [], []>} : vector<8x8xbf16>, vector<8x8xbf16>, vector<8x8xf32> -> vector<8x8xf32>
    %156 = vector.broadcast %153 : vector<8x1xf32> to vector<8x8xf32>
    %157 = arith.mulf %155, %156 : vector<8x8xf32>
    %158 = vector.extract_strided_slice %134 {offsets = [8, 0], sizes = [8, 8], strides = [1, 1]} : vector<16x8xbf16> to vector<8x8xbf16>
    %159 = vector.extract_strided_slice %135 {offsets = [8, 0], sizes = [8, 8], strides = [1, 1]} : vector<16x8xbf16> to vector<8x8xbf16>
    %160 = vector.extract_strided_slice %136 {offsets = [8, 0], sizes = [8, 8], strides = [1, 1]} : vector<16x8xbf16> to vector<8x8xbf16>
    %cst_71 = arith.constant dense<0.000000e+00> : vector<8x8xf32>
    %161 = tpu.matmul %158, %159, %cst_71 {dimension_numbers = #tpu.dot_dimension_numbers<[1], [1], [0], [0], [0, 0, 1, 0], [], []>} : vector<8x8xbf16>, vector<8x8xbf16>, vector<8x8xf32> -> vector<8x8xf32>
    %162 = vector.extract_strided_slice %137 {offsets = [8, 0], sizes = [8, 128], strides = [1, 1]} : vector<16x128xf32> to vector<8x128xf32>
    %c0_i32_72 = arith.constant 0 : i32
    %163 = tpu.dynamic_rotate %162 by %c0_i32_72 dim 1 {stride = 1 : si32, stride_dimension = 0 : si32} : vector<8x128xf32>, i32 -> vector<8x128xf32>
    %164 = vector.extract_strided_slice %163 {offsets = [0, 7], sizes = [8, 8], strides = [1, 1]} : vector<8x128xf32> to vector<8x8xf32>
    %165 = arith.addf %161, %164 : vector<8x8xf32>
    %cst_73 = arith.constant dense<0xFF800000> : vector<8xf32>
    %166 = vector.multi_reduction <maximumf>, %165, %cst_73 [1] : vector<8x8xf32> to vector<8xf32>
    %167 = vector.shape_cast %166 : vector<8xf32> to vector<8x1xf32>
    %168 = vector.broadcast %167 : vector<8x1xf32> to vector<8x8xf32>
    %169 = arith.subf %165, %168 : vector<8x8xf32>
    %170 = math.exp %169 : vector<8x8xf32>
    %cst_74 = arith.constant dense<0.000000e+00> : vector<8xf32>
    %171 = vector.multi_reduction <add>, %170, %cst_74 [1] : vector<8x8xf32> to vector<8xf32>
    %172 = vector.shape_cast %171 : vector<8xf32> to vector<8x1xf32>
    %173 = tpu.reciprocal %172 {approx = true} : vector<8x1xf32> -> vector<8x1xf32>
    %174 = arith.truncf %170 : vector<8x8xf32> to vector<8x8xbf16>
    %cst_75 = arith.constant dense<0.000000e+00> : vector<8x8xf32>
    %175 = tpu.matmul %174, %160, %cst_75 {dimension_numbers = #tpu.dot_dimension_numbers<[1], [0], [0], [1], [0, 0, 1, 1], [], []>} : vector<8x8xbf16>, vector<8x8xbf16>, vector<8x8xf32> -> vector<8x8xf32>
    %176 = vector.broadcast %173 : vector<8x1xf32> to vector<8x8xf32>
    %177 = arith.mulf %175, %176 : vector<8x8xf32>
    %c2 = arith.constant 2 : index
    %c0_76 = arith.constant 0 : index
    %c0_77 = arith.constant 0 : index
    %178 = vector.load %arg10[%c2, %c0_76, %c0_77] : memref<4x32x8xbf16, #tpu.memory_space<vmem>>, vector<1x32x8xbf16>
    %179 = vector.shape_cast %178 : vector<1x32x8xbf16> to vector<32x8xbf16>
    %cst_78 = arith.constant dense<0.000000e+00> : vector<16x8xf32>
    %180 = tpu.matmul %70, %179, %cst_78 {dimension_numbers = #tpu.dot_dimension_numbers<[1], [0], [0], [1], [0, 0, 1, 1], [], []>} : vector<16x32xbf16>, vector<32x8xbf16>, vector<16x8xf32> -> vector<16x8xf32>
    %c2_79 = arith.constant 2 : index
    %c0_80 = arith.constant 0 : index
    %c0_81 = arith.constant 0 : index
    %181 = vector.load %arg11[%c2_79, %c0_80, %c0_81] : memref<4x32x8xbf16, #tpu.memory_space<vmem>>, vector<1x32x8xbf16>
    %182 = vector.shape_cast %181 : vector<1x32x8xbf16> to vector<32x8xbf16>
    %cst_82 = arith.constant dense<0.000000e+00> : vector<16x8xf32>
    %183 = tpu.matmul %70, %182, %cst_82 {dimension_numbers = #tpu.dot_dimension_numbers<[1], [0], [0], [1], [0, 0, 1, 1], [], []>} : vector<16x32xbf16>, vector<32x8xbf16>, vector<16x8xf32> -> vector<16x8xf32>
    %c2_83 = arith.constant 2 : index
    %c0_84 = arith.constant 0 : index
    %c0_85 = arith.constant 0 : index
    %184 = vector.load %arg12[%c2_83, %c0_84, %c0_85] : memref<4x32x8xbf16, #tpu.memory_space<vmem>>, vector<1x32x8xbf16>
    %185 = vector.shape_cast %184 : vector<1x32x8xbf16> to vector<32x8xbf16>
    %cst_86 = arith.constant dense<0.000000e+00> : vector<16x8xf32>
    %186 = tpu.matmul %70, %185, %cst_86 {dimension_numbers = #tpu.dot_dimension_numbers<[1], [0], [0], [1], [0, 0, 1, 1], [], []>} : vector<16x32xbf16>, vector<32x8xbf16>, vector<16x8xf32> -> vector<16x8xf32>
    %187 = arith.truncf %180 : vector<16x8xf32> to vector<16x8xbf16>
    %188 = arith.truncf %183 : vector<16x8xf32> to vector<16x8xbf16>
    %189 = arith.truncf %186 : vector<16x8xf32> to vector<16x8xbf16>
    %cst_87 = arith.constant dense<0.000000e+00> : vector<16x128xf32>
    %190 = tpu.matmul %187, %71, %cst_87 {dimension_numbers = #tpu.dot_dimension_numbers<[1], [1], [0], [0], [0, 0, 1, 0], [], []>} : vector<16x8xbf16>, vector<128x8xbf16>, vector<16x128xf32> -> vector<16x128xf32>
    %191 = vector.extract_strided_slice %187 {offsets = [0, 0], sizes = [8, 8], strides = [1, 1]} : vector<16x8xbf16> to vector<8x8xbf16>
    %192 = vector.extract_strided_slice %188 {offsets = [0, 0], sizes = [8, 8], strides = [1, 1]} : vector<16x8xbf16> to vector<8x8xbf16>
    %193 = vector.extract_strided_slice %189 {offsets = [0, 0], sizes = [8, 8], strides = [1, 1]} : vector<16x8xbf16> to vector<8x8xbf16>
    %cst_88 = arith.constant dense<0.000000e+00> : vector<8x8xf32>
    %194 = tpu.matmul %191, %192, %cst_88 {dimension_numbers = #tpu.dot_dimension_numbers<[1], [1], [0], [0], [0, 0, 1, 0], [], []>} : vector<8x8xbf16>, vector<8x8xbf16>, vector<8x8xf32> -> vector<8x8xf32>
    %195 = vector.extract_strided_slice %190 {offsets = [0, 0], sizes = [8, 128], strides = [1, 1]} : vector<16x128xf32> to vector<8x128xf32>
    %c0_i32_89 = arith.constant 0 : i32
    %196 = tpu.dynamic_rotate %195 by %c0_i32_89 dim 1 {stride = 1 : si32, stride_dimension = 0 : si32} : vector<8x128xf32>, i32 -> vector<8x128xf32>
    %197 = vector.extract_strided_slice %196 {offsets = [0, 7], sizes = [8, 8], strides = [1, 1]} : vector<8x128xf32> to vector<8x8xf32>
    %198 = arith.addf %194, %197 : vector<8x8xf32>
    %cst_90 = arith.constant dense<0xFF800000> : vector<8xf32>
    %199 = vector.multi_reduction <maximumf>, %198, %cst_90 [1] : vector<8x8xf32> to vector<8xf32>
    %200 = vector.shape_cast %199 : vector<8xf32> to vector<8x1xf32>
    %201 = vector.broadcast %200 : vector<8x1xf32> to vector<8x8xf32>
    %202 = arith.subf %198, %201 : vector<8x8xf32>
    %203 = math.exp %202 : vector<8x8xf32>
    %cst_91 = arith.constant dense<0.000000e+00> : vector<8xf32>
    %204 = vector.multi_reduction <add>, %203, %cst_91 [1] : vector<8x8xf32> to vector<8xf32>
    %205 = vector.shape_cast %204 : vector<8xf32> to vector<8x1xf32>
    %206 = tpu.reciprocal %205 {approx = true} : vector<8x1xf32> -> vector<8x1xf32>
    %207 = arith.truncf %203 : vector<8x8xf32> to vector<8x8xbf16>
    %cst_92 = arith.constant dense<0.000000e+00> : vector<8x8xf32>
    %208 = tpu.matmul %207, %193, %cst_92 {dimension_numbers = #tpu.dot_dimension_numbers<[1], [0], [0], [1], [0, 0, 1, 1], [], []>} : vector<8x8xbf16>, vector<8x8xbf16>, vector<8x8xf32> -> vector<8x8xf32>
    %209 = vector.broadcast %206 : vector<8x1xf32> to vector<8x8xf32>
    %210 = arith.mulf %208, %209 : vector<8x8xf32>
    %211 = vector.extract_strided_slice %187 {offsets = [8, 0], sizes = [8, 8], strides = [1, 1]} : vector<16x8xbf16> to vector<8x8xbf16>
    %212 = vector.extract_strided_slice %188 {offsets = [8, 0], sizes = [8, 8], strides = [1, 1]} : vector<16x8xbf16> to vector<8x8xbf16>
    %213 = vector.extract_strided_slice %189 {offsets = [8, 0], sizes = [8, 8], strides = [1, 1]} : vector<16x8xbf16> to vector<8x8xbf16>
    %cst_93 = arith.constant dense<0.000000e+00> : vector<8x8xf32>
    %214 = tpu.matmul %211, %212, %cst_93 {dimension_numbers = #tpu.dot_dimension_numbers<[1], [1], [0], [0], [0, 0, 1, 0], [], []>} : vector<8x8xbf16>, vector<8x8xbf16>, vector<8x8xf32> -> vector<8x8xf32>
    %215 = vector.extract_strided_slice %190 {offsets = [8, 0], sizes = [8, 128], strides = [1, 1]} : vector<16x128xf32> to vector<8x128xf32>
    %c0_i32_94 = arith.constant 0 : i32
    %216 = tpu.dynamic_rotate %215 by %c0_i32_94 dim 1 {stride = 1 : si32, stride_dimension = 0 : si32} : vector<8x128xf32>, i32 -> vector<8x128xf32>
    %217 = vector.extract_strided_slice %216 {offsets = [0, 7], sizes = [8, 8], strides = [1, 1]} : vector<8x128xf32> to vector<8x8xf32>
    %218 = arith.addf %214, %217 : vector<8x8xf32>
    %cst_95 = arith.constant dense<0xFF800000> : vector<8xf32>
    %219 = vector.multi_reduction <maximumf>, %218, %cst_95 [1] : vector<8x8xf32> to vector<8xf32>
    %220 = vector.shape_cast %219 : vector<8xf32> to vector<8x1xf32>
    %221 = vector.broadcast %220 : vector<8x1xf32> to vector<8x8xf32>
    %222 = arith.subf %218, %221 : vector<8x8xf32>
    %223 = math.exp %222 : vector<8x8xf32>
    %cst_96 = arith.constant dense<0.000000e+00> : vector<8xf32>
    %224 = vector.multi_reduction <add>, %223, %cst_96 [1] : vector<8x8xf32> to vector<8xf32>
    %225 = vector.shape_cast %224 : vector<8xf32> to vector<8x1xf32>
    %226 = tpu.reciprocal %225 {approx = true} : vector<8x1xf32> -> vector<8x1xf32>
    %227 = arith.truncf %223 : vector<8x8xf32> to vector<8x8xbf16>
    %cst_97 = arith.constant dense<0.000000e+00> : vector<8x8xf32>
    %228 = tpu.matmul %227, %213, %cst_97 {dimension_numbers = #tpu.dot_dimension_numbers<[1], [0], [0], [1], [0, 0, 1, 1], [], []>} : vector<8x8xbf16>, vector<8x8xbf16>, vector<8x8xf32> -> vector<8x8xf32>
    %229 = vector.broadcast %226 : vector<8x1xf32> to vector<8x8xf32>
    %230 = arith.mulf %228, %229 : vector<8x8xf32>
    %c3 = arith.constant 3 : index
    %c0_98 = arith.constant 0 : index
    %c0_99 = arith.constant 0 : index
    %231 = vector.load %arg10[%c3, %c0_98, %c0_99] : memref<4x32x8xbf16, #tpu.memory_space<vmem>>, vector<1x32x8xbf16>
    %232 = vector.shape_cast %231 : vector<1x32x8xbf16> to vector<32x8xbf16>
    %cst_100 = arith.constant dense<0.000000e+00> : vector<16x8xf32>
    %233 = tpu.matmul %70, %232, %cst_100 {dimension_numbers = #tpu.dot_dimension_numbers<[1], [0], [0], [1], [0, 0, 1, 1], [], []>} : vector<16x32xbf16>, vector<32x8xbf16>, vector<16x8xf32> -> vector<16x8xf32>
    %c3_101 = arith.constant 3 : index
    %c0_102 = arith.constant 0 : index
    %c0_103 = arith.constant 0 : index
    %234 = vector.load %arg11[%c3_101, %c0_102, %c0_103] : memref<4x32x8xbf16, #tpu.memory_space<vmem>>, vector<1x32x8xbf16>
    %235 = vector.shape_cast %234 : vector<1x32x8xbf16> to vector<32x8xbf16>
    %cst_104 = arith.constant dense<0.000000e+00> : vector<16x8xf32>
    %236 = tpu.matmul %70, %235, %cst_104 {dimension_numbers = #tpu.dot_dimension_numbers<[1], [0], [0], [1], [0, 0, 1, 1], [], []>} : vector<16x32xbf16>, vector<32x8xbf16>, vector<16x8xf32> -> vector<16x8xf32>
    %c3_105 = arith.constant 3 : index
    %c0_106 = arith.constant 0 : index
    %c0_107 = arith.constant 0 : index
    %237 = vector.load %arg12[%c3_105, %c0_106, %c0_107] : memref<4x32x8xbf16, #tpu.memory_space<vmem>>, vector<1x32x8xbf16>
    %238 = vector.shape_cast %237 : vector<1x32x8xbf16> to vector<32x8xbf16>
    %cst_108 = arith.constant dense<0.000000e+00> : vector<16x8xf32>
    %239 = tpu.matmul %70, %238, %cst_108 {dimension_numbers = #tpu.dot_dimension_numbers<[1], [0], [0], [1], [0, 0, 1, 1], [], []>} : vector<16x32xbf16>, vector<32x8xbf16>, vector<16x8xf32> -> vector<16x8xf32>
    %240 = arith.truncf %233 : vector<16x8xf32> to vector<16x8xbf16>
    %241 = arith.truncf %236 : vector<16x8xf32> to vector<16x8xbf16>
    %242 = arith.truncf %239 : vector<16x8xf32> to vector<16x8xbf16>
    %cst_109 = arith.constant dense<0.000000e+00> : vector<16x128xf32>
    %243 = tpu.matmul %240, %71, %cst_109 {dimension_numbers = #tpu.dot_dimension_numbers<[1], [1], [0], [0], [0, 0, 1, 0], [], []>} : vector<16x8xbf16>, vector<128x8xbf16>, vector<16x128xf32> -> vector<16x128xf32>
    %244 = vector.extract_strided_slice %240 {offsets = [0, 0], sizes = [8, 8], strides = [1, 1]} : vector<16x8xbf16> to vector<8x8xbf16>
    %245 = vector.extract_strided_slice %241 {offsets = [0, 0], sizes = [8, 8], strides = [1, 1]} : vector<16x8xbf16> to vector<8x8xbf16>
    %246 = vector.extract_strided_slice %242 {offsets = [0, 0], sizes = [8, 8], strides = [1, 1]} : vector<16x8xbf16> to vector<8x8xbf16>
    %cst_110 = arith.constant dense<0.000000e+00> : vector<8x8xf32>
    %247 = tpu.matmul %244, %245, %cst_110 {dimension_numbers = #tpu.dot_dimension_numbers<[1], [1], [0], [0], [0, 0, 1, 0], [], []>} : vector<8x8xbf16>, vector<8x8xbf16>, vector<8x8xf32> -> vector<8x8xf32>
    %248 = vector.extract_strided_slice %243 {offsets = [0, 0], sizes = [8, 128], strides = [1, 1]} : vector<16x128xf32> to vector<8x128xf32>
    %c0_i32_111 = arith.constant 0 : i32
    %249 = tpu.dynamic_rotate %248 by %c0_i32_111 dim 1 {stride = 1 : si32, stride_dimension = 0 : si32} : vector<8x128xf32>, i32 -> vector<8x128xf32>
    %250 = vector.extract_strided_slice %249 {offsets = [0, 7], sizes = [8, 8], strides = [1, 1]} : vector<8x128xf32> to vector<8x8xf32>
    %251 = arith.addf %247, %250 : vector<8x8xf32>
    %cst_112 = arith.constant dense<0xFF800000> : vector<8xf32>
    %252 = vector.multi_reduction <maximumf>, %251, %cst_112 [1] : vector<8x8xf32> to vector<8xf32>
    %253 = vector.shape_cast %252 : vector<8xf32> to vector<8x1xf32>
    %254 = vector.broadcast %253 : vector<8x1xf32> to vector<8x8xf32>
    %255 = arith.subf %251, %254 : vector<8x8xf32>
    %256 = math.exp %255 : vector<8x8xf32>
    %cst_113 = arith.constant dense<0.000000e+00> : vector<8xf32>
    %257 = vector.multi_reduction <add>, %256, %cst_113 [1] : vector<8x8xf32> to vector<8xf32>
    %258 = vector.shape_cast %257 : vector<8xf32> to vector<8x1xf32>
    %259 = tpu.reciprocal %258 {approx = true} : vector<8x1xf32> -> vector<8x1xf32>
    %260 = arith.truncf %256 : vector<8x8xf32> to vector<8x8xbf16>
    %cst_114 = arith.constant dense<0.000000e+00> : vector<8x8xf32>
    %261 = tpu.matmul %260, %246, %cst_114 {dimension_numbers = #tpu.dot_dimension_numbers<[1], [0], [0], [1], [0, 0, 1, 1], [], []>} : vector<8x8xbf16>, vector<8x8xbf16>, vector<8x8xf32> -> vector<8x8xf32>
    %262 = vector.broadcast %259 : vector<8x1xf32> to vector<8x8xf32>
    %263 = arith.mulf %261, %262 : vector<8x8xf32>
    %264 = vector.extract_strided_slice %240 {offsets = [8, 0], sizes = [8, 8], strides = [1, 1]} : vector<16x8xbf16> to vector<8x8xbf16>
    %265 = vector.extract_strided_slice %241 {offsets = [8, 0], sizes = [8, 8], strides = [1, 1]} : vector<16x8xbf16> to vector<8x8xbf16>
    %266 = vector.extract_strided_slice %242 {offsets = [8, 0], sizes = [8, 8], strides = [1, 1]} : vector<16x8xbf16> to vector<8x8xbf16>
    %cst_115 = arith.constant dense<0.000000e+00> : vector<8x8xf32>
    %267 = tpu.matmul %264, %265, %cst_115 {dimension_numbers = #tpu.dot_dimension_numbers<[1], [1], [0], [0], [0, 0, 1, 0], [], []>} : vector<8x8xbf16>, vector<8x8xbf16>, vector<8x8xf32> -> vector<8x8xf32>
    %268 = vector.extract_strided_slice %243 {offsets = [8, 0], sizes = [8, 128], strides = [1, 1]} : vector<16x128xf32> to vector<8x128xf32>
    %c0_i32_116 = arith.constant 0 : i32
    %269 = tpu.dynamic_rotate %268 by %c0_i32_116 dim 1 {stride = 1 : si32, stride_dimension = 0 : si32} : vector<8x128xf32>, i32 -> vector<8x128xf32>
    %270 = vector.extract_strided_slice %269 {offsets = [0, 7], sizes = [8, 8], strides = [1, 1]} : vector<8x128xf32> to vector<8x8xf32>
    %271 = arith.addf %267, %270 : vector<8x8xf32>
    %cst_117 = arith.constant dense<0xFF800000> : vector<8xf32>
    %272 = vector.multi_reduction <maximumf>, %271, %cst_117 [1] : vector<8x8xf32> to vector<8xf32>
    %273 = vector.shape_cast %272 : vector<8xf32> to vector<8x1xf32>
    %274 = vector.broadcast %273 : vector<8x1xf32> to vector<8x8xf32>
    %275 = arith.subf %271, %274 : vector<8x8xf32>
    %276 = math.exp %275 : vector<8x8xf32>
    %cst_118 = arith.constant dense<0.000000e+00> : vector<8xf32>
    %277 = vector.multi_reduction <add>, %276, %cst_118 [1] : vector<8x8xf32> to vector<8xf32>
    %278 = vector.shape_cast %277 : vector<8xf32> to vector<8x1xf32>
    %279 = tpu.reciprocal %278 {approx = true} : vector<8x1xf32> -> vector<8x1xf32>
    %280 = arith.truncf %276 : vector<8x8xf32> to vector<8x8xbf16>
    %cst_119 = arith.constant dense<0.000000e+00> : vector<8x8xf32>
    %281 = tpu.matmul %280, %266, %cst_119 {dimension_numbers = #tpu.dot_dimension_numbers<[1], [0], [0], [1], [0, 0, 1, 1], [], []>} : vector<8x8xbf16>, vector<8x8xbf16>, vector<8x8xf32> -> vector<8x8xf32>
    %282 = vector.broadcast %279 : vector<8x1xf32> to vector<8x8xf32>
    %283 = arith.mulf %281, %282 : vector<8x8xf32>
    %284 = tpu.concatenate %104, %157, %210, %263 in 1 : vector<8x8xf32>, vector<8x8xf32>, vector<8x8xf32>, vector<8x8xf32> -> vector<8x32xf32>
    %285 = tpu.concatenate %124, %177, %230, %283 in 1 : vector<8x8xf32>, vector<8x8xf32>, vector<8x8xf32>, vector<8x8xf32> -> vector<8x32xf32>
    %286 = tpu.concatenate %284, %285 in 0 : vector<8x32xf32>, vector<8x32xf32> -> vector<16x32xf32>
    %c0_120 = arith.constant 0 : index
    %c0_121 = arith.constant 0 : index
    %287 = vector.load %arg13[%c0_120, %c0_121] : memref<32x32xbf16, #tpu.memory_space<vmem>>, vector<32x32xbf16>
    %288 = arith.truncf %286 : vector<16x32xf32> to vector<16x32xbf16>
    %cst_122 = arith.constant dense<0.000000e+00> : vector<16x32xf32>
    %289 = tpu.matmul %288, %287, %cst_122 {dimension_numbers = #tpu.dot_dimension_numbers<[1], [0], [0], [1], [0, 0, 1, 1], [], []>} : vector<16x32xbf16>, vector<32x32xbf16>, vector<16x32xf32> -> vector<16x32xf32>
    %290 = arith.addf %45, %289 : vector<16x32xf32>
    %c0_123 = arith.constant 0 : index
    %c0_124 = arith.constant 0 : index
    %291 = vector.load %arg14[%c0_123, %c0_124] : memref<1x32xf32, #tpu.memory_space<vmem>>, vector<1x32xf32>
    %292 = vector.broadcast %291 : vector<1x32xf32> to vector<16x32xf32>
    %293 = arith.addf %290, %292 : vector<16x32xf32>
    %cst_125 = arith.constant dense<0.000000e+00> : vector<16xf32>
    %294 = vector.multi_reduction <add>, %293, %cst_125 [1] : vector<16x32xf32> to vector<16xf32>
    %295 = vector.shape_cast %294 : vector<16xf32> to vector<16x1xf32>
    %cst_126 = arith.constant 3.200000e+01 : f32
    %296 = vector.broadcast %cst_126 : f32 to vector<16x1xf32>
    %297 = arith.divf %295, %296 : vector<16x1xf32>
    %298 = vector.broadcast %297 : vector<16x1xf32> to vector<16x32xf32>
    %299 = arith.subf %293, %298 : vector<16x32xf32>
    %300 = arith.mulf %299, %299 : vector<16x32xf32>
    %cst_127 = arith.constant dense<0.000000e+00> : vector<16xf32>
    %301 = vector.multi_reduction <add>, %300, %cst_127 [1] : vector<16x32xf32> to vector<16xf32>
    %302 = vector.shape_cast %301 : vector<16xf32> to vector<16x1xf32>
    %cst_128 = arith.constant 3.200000e+01 : f32
    %303 = vector.broadcast %cst_128 : f32 to vector<16x1xf32>
    %304 = arith.divf %302, %303 : vector<16x1xf32>
    %305 = vector.broadcast %297 : vector<16x1xf32> to vector<16x32xf32>
    %306 = arith.subf %293, %305 : vector<16x32xf32>
    %cst_129 = arith.constant 9.99999974E-6 : f32
    %307 = vector.broadcast %cst_129 : f32 to vector<16x1xf32>
    %308 = arith.addf %304, %307 : vector<16x1xf32>
    %309 = math.rsqrt %308 : vector<16x1xf32>
    %310 = vector.broadcast %309 : vector<16x1xf32> to vector<16x32xf32>
    %311 = arith.mulf %306, %310 : vector<16x32xf32>
    %c0_130 = arith.constant 0 : index
    %c0_131 = arith.constant 0 : index
    %312 = vector.load %arg16[%c0_130, %c0_131] : memref<1x32xf32, #tpu.memory_space<vmem>>, vector<1x32xf32>
    %313 = vector.broadcast %312 : vector<1x32xf32> to vector<16x32xf32>
    %314 = arith.mulf %311, %313 : vector<16x32xf32>
    %c0_132 = arith.constant 0 : index
    %c0_133 = arith.constant 0 : index
    %315 = vector.load %arg17[%c0_132, %c0_133] : memref<1x32xf32, #tpu.memory_space<vmem>>, vector<1x32xf32>
    %316 = vector.broadcast %315 : vector<1x32xf32> to vector<16x32xf32>
    %317 = arith.addf %314, %316 : vector<16x32xf32>
    %318 = arith.truncf %317 : vector<16x32xf32> to vector<16x32xbf16>
    %c0_134 = arith.constant 0 : index
    %c0_135 = arith.constant 0 : index
    %319 = vector.load %arg18[%c0_134, %c0_135] : memref<32x64xbf16, #tpu.memory_space<vmem>>, vector<32x64xbf16>
    %cst_136 = arith.constant dense<0.000000e+00> : vector<16x64xf32>
    %320 = tpu.matmul %318, %319, %cst_136 {dimension_numbers = #tpu.dot_dimension_numbers<[1], [0], [0], [1], [0, 0, 1, 1], [], []>} : vector<16x32xbf16>, vector<32x64xbf16>, vector<16x64xf32> -> vector<16x64xf32>
    %c0_137 = arith.constant 0 : index
    %c0_138 = arith.constant 0 : index
    %321 = vector.load %arg19[%c0_137, %c0_138] : memref<1x64xf32, #tpu.memory_space<vmem>>, vector<1x64xf32>
    %322 = vector.broadcast %321 : vector<1x64xf32> to vector<16x64xf32>
    %323 = arith.addf %320, %322 : vector<16x64xf32>
    %c0_139 = arith.constant 0 : index
    %c0_140 = arith.constant 0 : index
    %324 = vector.load %arg20[%c0_139, %c0_140] : memref<32x64xbf16, #tpu.memory_space<vmem>>, vector<32x64xbf16>
    %cst_141 = arith.constant dense<0.000000e+00> : vector<16x64xf32>
    %325 = tpu.matmul %318, %324, %cst_141 {dimension_numbers = #tpu.dot_dimension_numbers<[1], [0], [0], [1], [0, 0, 1, 1], [], []>} : vector<16x32xbf16>, vector<32x64xbf16>, vector<16x64xf32> -> vector<16x64xf32>
    %c0_142 = arith.constant 0 : index
    %c0_143 = arith.constant 0 : index
    %326 = vector.load %arg21[%c0_142, %c0_143] : memref<1x64xf32, #tpu.memory_space<vmem>>, vector<1x64xf32>
    %327 = vector.broadcast %326 : vector<1x64xf32> to vector<16x64xf32>
    %328 = arith.addf %325, %327 : vector<16x64xf32>
    %329 = arith.negf %328 : vector<16x64xf32>
    %330 = math.exp %329 : vector<16x64xf32>
    %cst_144 = arith.constant 1.000000e+00 : f32
    %331 = vector.broadcast %cst_144 : f32 to vector<16x64xf32>
    %332 = arith.addf %331, %330 : vector<16x64xf32>
    %333 = arith.divf %331, %332 : vector<16x64xf32>
    %334 = arith.mulf %323, %333 : vector<16x64xf32>
    %c0_145 = arith.constant 0 : index
    %c0_146 = arith.constant 0 : index
    %335 = vector.load %arg22[%c0_145, %c0_146] : memref<7x64xf32, #tpu.memory_space<vmem>>, vector<7x64xf32>
    %336 = tpu.iota {dimensions = array<i32: 0>} : vector<16x1xi32>
    %c8_i32 = arith.constant 8 : i32
    %c0_i32_147 = arith.constant 0 : i32
    %337 = arith.cmpi eq, %c8_i32, %c0_i32_147 : i32
    %c1_i32 = arith.constant 1 : i32
    %338 = arith.select %337, %c1_i32, %c8_i32 : i32
    %339 = vector.broadcast %338 : i32 to vector<16x1xi32>
    %340 = arith.remsi %336, %339 : vector<16x1xi32>
    %c0_i32_148 = arith.constant 0 : i32
    %341 = vector.broadcast %c0_i32_148 : i32 to vector<16x1xi32>
    %342 = arith.cmpi ne, %340, %341 : vector<16x1xi32>
    %c0_i32_149 = arith.constant 0 : i32
    %343 = vector.broadcast %c0_i32_149 : i32 to vector<16x1xi32>
    %344 = arith.cmpi slt, %340, %343 : vector<16x1xi32>
    %c0_i32_150 = arith.constant 0 : i32
    %345 = arith.cmpi slt, %338, %c0_i32_150 : i32
    %346 = vector.broadcast %345 : i1 to vector<16x1xi1>
    %347 = vector.broadcast %346 : vector<16x1xi1> to vector<16x1xi1>
    %348 = arith.xori %344, %347 : vector<16x1xi1>
    %349 = arith.andi %348, %342 : vector<16x1xi1>
    %350 = vector.broadcast %338 : i32 to vector<16x1xi32>
    %351 = arith.addi %340, %350 : vector<16x1xi32>
    %352 = arith.select %349, %351, %340 : vector<16x1xi1>, vector<16x1xi32>
    %cst_151 = arith.constant 0.000000e+00 : f32
    %353 = vector.broadcast %cst_151 : f32 to vector<16x64xf32>
    %c3_i32 = arith.constant 3 : i32
    %354 = tpu.dynamic_rotate %334 by %c3_i32 dim 0 : vector<16x64xf32>, i32 -> vector<16x64xf32>
    %c3_i32_152 = arith.constant 3 : i32
    %355 = vector.broadcast %c3_i32_152 : i32 to vector<16x1xi32>
    %356 = arith.cmpi sge, %352, %355 : vector<16x1xi32>
    %cst_153 = arith.constant 0.000000e+00 : f32
    %357 = vector.shape_cast %356 : vector<16x1xi1> to vector<16x1xi1>
    %358 = vector.broadcast %357 : vector<16x1xi1> to vector<16x64xi1>
    %359 = vector.broadcast %cst_153 : f32 to vector<16x64xf32>
    %360 = arith.select %358, %354, %359 : vector<16x64xi1>, vector<16x64xf32>
    %361 = vector.extract_strided_slice %335 {offsets = [0, 0], sizes = [1, 64], strides = [1, 1]} : vector<7x64xf32> to vector<1x64xf32>
    %362 = vector.broadcast %361 : vector<1x64xf32> to vector<16x64xf32>
    %363 = arith.mulf %360, %362 : vector<16x64xf32>
    %364 = arith.addf %353, %363 : vector<16x64xf32>
    %c2_i32 = arith.constant 2 : i32
    %365 = tpu.dynamic_rotate %334 by %c2_i32 dim 0 : vector<16x64xf32>, i32 -> vector<16x64xf32>
    %c2_i32_154 = arith.constant 2 : i32
    %366 = vector.broadcast %c2_i32_154 : i32 to vector<16x1xi32>
    %367 = arith.cmpi sge, %352, %366 : vector<16x1xi32>
    %cst_155 = arith.constant 0.000000e+00 : f32
    %368 = vector.shape_cast %367 : vector<16x1xi1> to vector<16x1xi1>
    %369 = vector.broadcast %368 : vector<16x1xi1> to vector<16x64xi1>
    %370 = vector.broadcast %cst_155 : f32 to vector<16x64xf32>
    %371 = arith.select %369, %365, %370 : vector<16x64xi1>, vector<16x64xf32>
    %372 = vector.extract_strided_slice %335 {offsets = [1, 0], sizes = [1, 64], strides = [1, 1]} : vector<7x64xf32> to vector<1x64xf32>
    %373 = vector.broadcast %372 : vector<1x64xf32> to vector<16x64xf32>
    %374 = arith.mulf %371, %373 : vector<16x64xf32>
    %375 = arith.addf %364, %374 : vector<16x64xf32>
    %c1_i32_156 = arith.constant 1 : i32
    %376 = tpu.dynamic_rotate %334 by %c1_i32_156 dim 0 : vector<16x64xf32>, i32 -> vector<16x64xf32>
    %c1_i32_157 = arith.constant 1 : i32
    %377 = vector.broadcast %c1_i32_157 : i32 to vector<16x1xi32>
    %378 = arith.cmpi sge, %352, %377 : vector<16x1xi32>
    %cst_158 = arith.constant 0.000000e+00 : f32
    %379 = vector.shape_cast %378 : vector<16x1xi1> to vector<16x1xi1>
    %380 = vector.broadcast %379 : vector<16x1xi1> to vector<16x64xi1>
    %381 = vector.broadcast %cst_158 : f32 to vector<16x64xf32>
    %382 = arith.select %380, %376, %381 : vector<16x64xi1>, vector<16x64xf32>
    %383 = vector.extract_strided_slice %335 {offsets = [2, 0], sizes = [1, 64], strides = [1, 1]} : vector<7x64xf32> to vector<1x64xf32>
    %384 = vector.broadcast %383 : vector<1x64xf32> to vector<16x64xf32>
    %385 = arith.mulf %382, %384 : vector<16x64xf32>
    %386 = arith.addf %375, %385 : vector<16x64xf32>
    %387 = vector.extract_strided_slice %335 {offsets = [3, 0], sizes = [1, 64], strides = [1, 1]} : vector<7x64xf32> to vector<1x64xf32>
    %388 = vector.broadcast %387 : vector<1x64xf32> to vector<16x64xf32>
    %389 = arith.mulf %334, %388 : vector<16x64xf32>
    %390 = arith.addf %386, %389 : vector<16x64xf32>
    %c15_i32 = arith.constant 15 : i32
    %391 = tpu.dynamic_rotate %334 by %c15_i32 dim 0 : vector<16x64xf32>, i32 -> vector<16x64xf32>
    %c7_i32 = arith.constant 7 : i32
    %392 = vector.broadcast %c7_i32 : i32 to vector<16x1xi32>
    %393 = arith.cmpi slt, %352, %392 : vector<16x1xi32>
    %cst_159 = arith.constant 0.000000e+00 : f32
    %394 = vector.shape_cast %393 : vector<16x1xi1> to vector<16x1xi1>
    %395 = vector.broadcast %394 : vector<16x1xi1> to vector<16x64xi1>
    %396 = vector.broadcast %cst_159 : f32 to vector<16x64xf32>
    %397 = arith.select %395, %391, %396 : vector<16x64xi1>, vector<16x64xf32>
    %398 = vector.extract_strided_slice %335 {offsets = [4, 0], sizes = [1, 64], strides = [1, 1]} : vector<7x64xf32> to vector<1x64xf32>
    %399 = vector.broadcast %398 : vector<1x64xf32> to vector<16x64xf32>
    %400 = arith.mulf %397, %399 : vector<16x64xf32>
    %401 = arith.addf %390, %400 : vector<16x64xf32>
    %c14_i32 = arith.constant 14 : i32
    %402 = tpu.dynamic_rotate %334 by %c14_i32 dim 0 : vector<16x64xf32>, i32 -> vector<16x64xf32>
    %c6_i32 = arith.constant 6 : i32
    %403 = vector.broadcast %c6_i32 : i32 to vector<16x1xi32>
    %404 = arith.cmpi slt, %352, %403 : vector<16x1xi32>
    %cst_160 = arith.constant 0.000000e+00 : f32
    %405 = vector.shape_cast %404 : vector<16x1xi1> to vector<16x1xi1>
    %406 = vector.broadcast %405 : vector<16x1xi1> to vector<16x64xi1>
    %407 = vector.broadcast %cst_160 : f32 to vector<16x64xf32>
    %408 = arith.select %406, %402, %407 : vector<16x64xi1>, vector<16x64xf32>
    %409 = vector.extract_strided_slice %335 {offsets = [5, 0], sizes = [1, 64], strides = [1, 1]} : vector<7x64xf32> to vector<1x64xf32>
    %410 = vector.broadcast %409 : vector<1x64xf32> to vector<16x64xf32>
    %411 = arith.mulf %408, %410 : vector<16x64xf32>
    %412 = arith.addf %401, %411 : vector<16x64xf32>
    %c13_i32 = arith.constant 13 : i32
    %413 = tpu.dynamic_rotate %334 by %c13_i32 dim 0 : vector<16x64xf32>, i32 -> vector<16x64xf32>
    %c5_i32 = arith.constant 5 : i32
    %414 = vector.broadcast %c5_i32 : i32 to vector<16x1xi32>
    %415 = arith.cmpi slt, %352, %414 : vector<16x1xi32>
    %cst_161 = arith.constant 0.000000e+00 : f32
    %416 = vector.shape_cast %415 : vector<16x1xi1> to vector<16x1xi1>
    %417 = vector.broadcast %416 : vector<16x1xi1> to vector<16x64xi1>
    %418 = vector.broadcast %cst_161 : f32 to vector<16x64xf32>
    %419 = arith.select %417, %413, %418 : vector<16x64xi1>, vector<16x64xf32>
    %420 = vector.extract_strided_slice %335 {offsets = [6, 0], sizes = [1, 64], strides = [1, 1]} : vector<7x64xf32> to vector<1x64xf32>
    %421 = vector.broadcast %420 : vector<1x64xf32> to vector<16x64xf32>
    %422 = arith.mulf %419, %421 : vector<16x64xf32>
    %423 = arith.addf %412, %422 : vector<16x64xf32>
    %c0_162 = arith.constant 0 : index
    %c0_163 = arith.constant 0 : index
    %424 = vector.load %arg23[%c0_162, %c0_163] : memref<1x64xf32, #tpu.memory_space<vmem>>, vector<1x64xf32>
    %425 = vector.broadcast %424 : vector<1x64xf32> to vector<16x64xf32>
    %426 = arith.addf %423, %425 : vector<16x64xf32>
    %427 = arith.negf %426 : vector<16x64xf32>
    %428 = math.exp %427 : vector<16x64xf32>
    %cst_164 = arith.constant 1.000000e+00 : f32
    %429 = vector.broadcast %cst_164 : f32 to vector<16x64xf32>
    %430 = arith.addf %429, %428 : vector<16x64xf32>
    %431 = arith.divf %429, %430 : vector<16x64xf32>
    %432 = arith.mulf %426, %431 : vector<16x64xf32>
    %c0_165 = arith.constant 0 : index
    %c0_166 = arith.constant 0 : index
    %433 = vector.load %arg24[%c0_165, %c0_166] : memref<64x32xbf16, #tpu.memory_space<vmem>>, vector<64x32xbf16>
    %434 = arith.truncf %432 : vector<16x64xf32> to vector<16x64xbf16>
    %cst_167 = arith.constant dense<0.000000e+00> : vector<16x32xf32>
    %435 = tpu.matmul %434, %433, %cst_167 {dimension_numbers = #tpu.dot_dimension_numbers<[1], [0], [0], [1], [0, 0, 1, 1], [], []>} : vector<16x64xbf16>, vector<64x32xbf16>, vector<16x32xf32> -> vector<16x32xf32>
    %436 = arith.addf %293, %435 : vector<16x32xf32>
    %c0_168 = arith.constant 0 : index
    %c0_169 = arith.constant 0 : index
    %437 = vector.load %arg25[%c0_168, %c0_169] : memref<1x32xf32, #tpu.memory_space<vmem>>, vector<1x32xf32>
    %438 = vector.broadcast %437 : vector<1x32xf32> to vector<16x32xf32>
    %439 = arith.addf %436, %438 : vector<16x32xf32>
    %cst_170 = arith.constant dense<0.000000e+00> : vector<16xf32>
    %440 = vector.multi_reduction <add>, %439, %cst_170 [1] : vector<16x32xf32> to vector<16xf32>
    %441 = vector.shape_cast %440 : vector<16xf32> to vector<16x1xf32>
    %cst_171 = arith.constant 3.200000e+01 : f32
    %442 = vector.broadcast %cst_171 : f32 to vector<16x1xf32>
    %443 = arith.divf %441, %442 : vector<16x1xf32>
    %444 = vector.broadcast %443 : vector<16x1xf32> to vector<16x32xf32>
    %445 = arith.subf %439, %444 : vector<16x32xf32>
    %446 = arith.mulf %445, %445 : vector<16x32xf32>
    %cst_172 = arith.constant dense<0.000000e+00> : vector<16xf32>
    %447 = vector.multi_reduction <add>, %446, %cst_172 [1] : vector<16x32xf32> to vector<16xf32>
    %448 = vector.shape_cast %447 : vector<16xf32> to vector<16x1xf32>
    %cst_173 = arith.constant 3.200000e+01 : f32
    %449 = vector.broadcast %cst_173 : f32 to vector<16x1xf32>
    %450 = arith.divf %448, %449 : vector<16x1xf32>
    %451 = vector.broadcast %443 : vector<16x1xf32> to vector<16x32xf32>
    %452 = arith.subf %439, %451 : vector<16x32xf32>
    %cst_174 = arith.constant 9.99999974E-6 : f32
    %453 = vector.broadcast %cst_174 : f32 to vector<16x1xf32>
    %454 = arith.addf %450, %453 : vector<16x1xf32>
    %455 = math.rsqrt %454 : vector<16x1xf32>
    %456 = vector.broadcast %455 : vector<16x1xf32> to vector<16x32xf32>
    %457 = arith.mulf %452, %456 : vector<16x32xf32>
    %c0_175 = arith.constant 0 : index
    %c0_176 = arith.constant 0 : index
    %458 = vector.load %arg26[%c0_175, %c0_176] : memref<1x32xf32, #tpu.memory_space<vmem>>, vector<1x32xf32>
    %459 = vector.broadcast %458 : vector<1x32xf32> to vector<16x32xf32>
    %460 = arith.mulf %457, %459 : vector<16x32xf32>
    %c0_177 = arith.constant 0 : index
    %c0_178 = arith.constant 0 : index
    %461 = vector.load %arg27[%c0_177, %c0_178] : memref<1x32xf32, #tpu.memory_space<vmem>>, vector<1x32xf32>
    %462 = vector.broadcast %461 : vector<1x32xf32> to vector<16x32xf32>
    %463 = arith.addf %460, %462 : vector<16x32xf32>
    %c0_179 = arith.constant 0 : index
    %c0_180 = arith.constant 0 : index
    %464 = vector.load %arg28[%c0_179, %c0_180] : memref<32x128xbf16, #tpu.memory_space<vmem>>, vector<32x128xbf16>
    %465 = arith.truncf %463 : vector<16x32xf32> to vector<16x32xbf16>
    %cst_181 = arith.constant dense<0.000000e+00> : vector<16x128xf32>
    %466 = tpu.matmul %465, %464, %cst_181 {dimension_numbers = #tpu.dot_dimension_numbers<[1], [0], [0], [1], [0, 0, 1, 1], [], []>} : vector<16x32xbf16>, vector<32x128xbf16>, vector<16x128xf32> -> vector<16x128xf32>
    %c0_182 = arith.constant 0 : index
    %c0_183 = arith.constant 0 : index
    %467 = vector.load %arg29[%c0_182, %c0_183] : memref<1x128xf32, #tpu.memory_space<vmem>>, vector<1x128xf32>
    %468 = vector.broadcast %467 : vector<1x128xf32> to vector<16x128xf32>
    %469 = arith.addf %466, %468 : vector<16x128xf32>
    %470 = arith.negf %469 : vector<16x128xf32>
    %471 = math.exp %470 : vector<16x128xf32>
    %cst_184 = arith.constant 1.000000e+00 : f32
    %472 = vector.broadcast %cst_184 : f32 to vector<16x128xf32>
    %473 = arith.addf %472, %471 : vector<16x128xf32>
    %474 = arith.divf %472, %473 : vector<16x128xf32>
    %475 = arith.mulf %469, %474 : vector<16x128xf32>
    %c0_185 = arith.constant 0 : index
    %c0_186 = arith.constant 0 : index
    %476 = vector.load %arg30[%c0_185, %c0_186] : memref<128x32xbf16, #tpu.memory_space<vmem>>, vector<128x32xbf16>
    %477 = arith.truncf %475 : vector<16x128xf32> to vector<16x128xbf16>
    %cst_187 = arith.constant dense<0.000000e+00> : vector<16x32xf32>
    %478 = tpu.matmul %477, %476, %cst_187 {dimension_numbers = #tpu.dot_dimension_numbers<[1], [0], [0], [1], [0, 0, 1, 1], [], []>} : vector<16x128xbf16>, vector<128x32xbf16>, vector<16x32xf32> -> vector<16x32xf32>
    %c0_188 = arith.constant 0 : index
    %c0_189 = arith.constant 0 : index
    %479 = vector.load %arg31[%c0_188, %c0_189] : memref<1x32xf32, #tpu.memory_space<vmem>>, vector<1x32xf32>
    %480 = vector.broadcast %479 : vector<1x32xf32> to vector<16x32xf32>
    %481 = arith.addf %478, %480 : vector<16x32xf32>
    %cst_190 = arith.constant 5.000000e-01 : f32
    %482 = vector.broadcast %cst_190 : f32 to vector<16x32xf32>
    %483 = arith.mulf %482, %481 : vector<16x32xf32>
    %484 = arith.addf %439, %483 : vector<16x32xf32>
    %cst_191 = arith.constant dense<0.000000e+00> : vector<16xf32>
    %485 = vector.multi_reduction <add>, %484, %cst_191 [1] : vector<16x32xf32> to vector<16xf32>
    %486 = vector.shape_cast %485 : vector<16xf32> to vector<16x1xf32>
    %cst_192 = arith.constant 3.200000e+01 : f32
    %487 = vector.broadcast %cst_192 : f32 to vector<16x1xf32>
    %488 = arith.divf %486, %487 : vector<16x1xf32>
    %489 = vector.broadcast %488 : vector<16x1xf32> to vector<16x32xf32>
    %490 = arith.subf %484, %489 : vector<16x32xf32>
    %491 = arith.mulf %490, %490 : vector<16x32xf32>
    %cst_193 = arith.constant dense<0.000000e+00> : vector<16xf32>
    %492 = vector.multi_reduction <add>, %491, %cst_193 [1] : vector<16x32xf32> to vector<16xf32>
    %493 = vector.shape_cast %492 : vector<16xf32> to vector<16x1xf32>
    %cst_194 = arith.constant 3.200000e+01 : f32
    %494 = vector.broadcast %cst_194 : f32 to vector<16x1xf32>
    %495 = arith.divf %493, %494 : vector<16x1xf32>
    %496 = vector.broadcast %488 : vector<16x1xf32> to vector<16x32xf32>
    %497 = arith.subf %484, %496 : vector<16x32xf32>
    %cst_195 = arith.constant 9.99999974E-6 : f32
    %498 = vector.broadcast %cst_195 : f32 to vector<16x1xf32>
    %499 = arith.addf %495, %498 : vector<16x1xf32>
    %500 = math.rsqrt %499 : vector<16x1xf32>
    %501 = vector.broadcast %500 : vector<16x1xf32> to vector<16x32xf32>
    %502 = arith.mulf %497, %501 : vector<16x32xf32>
    %c0_196 = arith.constant 0 : index
    %c0_197 = arith.constant 0 : index
    %503 = vector.load %arg32[%c0_196, %c0_197] : memref<1x32xf32, #tpu.memory_space<vmem>>, vector<1x32xf32>
    %504 = vector.broadcast %503 : vector<1x32xf32> to vector<16x32xf32>
    %505 = arith.mulf %502, %504 : vector<16x32xf32>
    %c0_198 = arith.constant 0 : index
    %c0_199 = arith.constant 0 : index
    %506 = vector.load %arg33[%c0_198, %c0_199] : memref<1x32xf32, #tpu.memory_space<vmem>>, vector<1x32xf32>
    %507 = vector.broadcast %506 : vector<1x32xf32> to vector<16x32xf32>
    %508 = arith.addf %505, %507 : vector<16x32xf32>
    %c0_200 = arith.constant 0 : index
    %c0_201 = arith.constant 0 : index
    %509 = vector.load %arg34[%c0_200, %c0_201] : memref<16x32xf32, #tpu.memory_space<vmem>>, vector<16x32xf32>
    tpu.vector_store %arg34[%c0_200, %c0_201], %508 {strides = array<i32>} : memref<16x32xf32, #tpu.memory_space<vmem>>, vector<16x32xf32>,
    return
  }
  func.func @transform_0(%arg0: i32) -> (i32, i32) {
    %c0_i32 = arith.constant 0 : i32
    %c0_i32_0 = arith.constant 0 : i32
    return %arg0, %c0_i32 : i32, i32
  }
  func.func @transform_1(%arg0: i32) -> (i32, i32) {
    %c0_i32 = arith.constant 0 : i32
    %c0_i32_0 = arith.constant 0 : i32
    %c0_i32_1 = arith.constant 0 : i32
    return %c0_i32, %c0_i32_0 : i32, i32
  }
  func.func @transform_2(%arg0: i32) -> (i32, i32) {
    %c0_i32 = arith.constant 0 : i32
    %c0_i32_0 = arith.constant 0 : i32
    %c0_i32_1 = arith.constant 0 : i32
    return %c0_i32, %c0_i32_0 : i32, i32
  }
  func.func @transform_3(%arg0: i32) -> (i32, i32) {
    %c0_i32 = arith.constant 0 : i32
    %c0_i32_0 = arith.constant 0 : i32
    %c0_i32_1 = arith.constant 0 : i32
    return %c0_i32, %c0_i32_0 : i32, i32
  }
  func.func @transform_4(%arg0: i32) -> (i32, i32) {
    %c0_i32 = arith.constant 0 : i32
    %c0_i32_0 = arith.constant 0 : i32
    %c0_i32_1 = arith.constant 0 : i32
    return %c0_i32, %c0_i32_0 : i32, i32
  }
  func.func @transform_5(%arg0: i32) -> (i32, i32) {
    %c0_i32 = arith.constant 0 : i32
    %c0_i32_0 = arith.constant 0 : i32
    %c0_i32_1 = arith.constant 0 : i32
    return %c0_i32, %c0_i32_0 : i32, i32
  }
  func.func @transform_6(%arg0: i32) -> (i32, i32) {
    %c0_i32 = arith.constant 0 : i32
    %c0_i32_0 = arith.constant 0 : i32
    %c0_i32_1 = arith.constant 0 : i32
    return %c0_i32, %c0_i32_0 : i32, i32
  }
  func.func @transform_7(%arg0: i32) -> (i32, i32) {
    %c0_i32 = arith.constant 0 : i32
    %c0_i32_0 = arith.constant 0 : i32
    %c0_i32_1 = arith.constant 0 : i32
    return %c0_i32, %c0_i32_0 : i32, i32
  }
  func.func @transform_8(%arg0: i32) -> (i32, i32) {
    %c0_i32 = arith.constant 0 : i32
    %c0_i32_0 = arith.constant 0 : i32
    %c0_i32_1 = arith.constant 0 : i32
    return %c0_i32, %c0_i32_0 : i32, i32
  }
  func.func @transform_9(%arg0: i32) -> (i32, i32, i32) {
    %c0_i32 = arith.constant 0 : i32
    %c0_i32_0 = arith.constant 0 : i32
    %c0_i32_1 = arith.constant 0 : i32
    %c0_i32_2 = arith.constant 0 : i32
    return %c0_i32, %c0_i32_0, %c0_i32_1 : i32, i32, i32
  }
  func.func @transform_10(%arg0: i32) -> (i32, i32, i32) {
    %c0_i32 = arith.constant 0 : i32
    %c0_i32_0 = arith.constant 0 : i32
    %c0_i32_1 = arith.constant 0 : i32
    %c0_i32_2 = arith.constant 0 : i32
    return %c0_i32, %c0_i32_0, %c0_i32_1 : i32, i32, i32
  }
  func.func @transform_11(%arg0: i32) -> (i32, i32, i32) {
    %c0_i32 = arith.constant 0 : i32
    %c0_i32_0 = arith.constant 0 : i32
    %c0_i32_1 = arith.constant 0 : i32
    %c0_i32_2 = arith.constant 0 : i32
    return %c0_i32, %c0_i32_0, %c0_i32_1 : i32, i32, i32
  }
  func.func @transform_12(%arg0: i32) -> (i32, i32) {
    %c0_i32 = arith.constant 0 : i32
    %c0_i32_0 = arith.constant 0 : i32
    %c0_i32_1 = arith.constant 0 : i32
    return %c0_i32, %c0_i32_0 : i32, i32
  }
  func.func @transform_13(%arg0: i32) -> (i32, i32) {
    %c0_i32 = arith.constant 0 : i32
    %c0_i32_0 = arith.constant 0 : i32
    %c0_i32_1 = arith.constant 0 : i32
    return %c0_i32, %c0_i32_0 : i32, i32
  }
  func.func @transform_14(%arg0: i32) -> (i32, i32) {
    %c0_i32 = arith.constant 0 : i32
    %c0_i32_0 = arith.constant 0 : i32
    %c0_i32_1 = arith.constant 0 : i32
    return %c0_i32, %c0_i32_0 : i32, i32
  }
  func.func @transform_15(%arg0: i32) -> (i32, i32) {
    %c0_i32 = arith.constant 0 : i32
    %c0_i32_0 = arith.constant 0 : i32
    %c0_i32_1 = arith.constant 0 : i32
    return %c0_i32, %c0_i32_0 : i32, i32
  }
  func.func @transform_16(%arg0: i32) -> (i32, i32) {
    %c0_i32 = arith.constant 0 : i32
    %c0_i32_0 = arith.constant 0 : i32
    %c0_i32_1 = arith.constant 0 : i32
    return %c0_i32, %c0_i32_0 : i32, i32
  }
  func.func @transform_17(%arg0: i32) -> (i32, i32) {
    %c0_i32 = arith.constant 0 : i32
    %c0_i32_0 = arith.constant 0 : i32
    %c0_i32_1 = arith.constant 0 : i32
    return %c0_i32, %c0_i32_0 : i32, i32
  }
  func.func @transform_18(%arg0: i32) -> (i32, i32) {
    %c0_i32 = arith.constant 0 : i32
    %c0_i32_0 = arith.constant 0 : i32
    %c0_i32_1 = arith.constant 0 : i32
    return %c0_i32, %c0_i32_0 : i32, i32
  }
  func.func @transform_19(%arg0: i32) -> (i32, i32) {
    %c0_i32 = arith.constant 0 : i32
    %c0_i32_0 = arith.constant 0 : i32
    %c0_i32_1 = arith.constant 0 : i32
    return %c0_i32, %c0_i32_0 : i32, i32
  }
  func.func @transform_20(%arg0: i32) -> (i32, i32) {
    %c0_i32 = arith.constant 0 : i32
    %c0_i32_0 = arith.constant 0 : i32
    %c0_i32_1 = arith.constant 0 : i32
    return %c0_i32, %c0_i32_0 : i32, i32
  }
  func.func @transform_21(%arg0: i32) -> (i32, i32) {
    %c0_i32 = arith.constant 0 : i32
    %c0_i32_0 = arith.constant 0 : i32
    %c0_i32_1 = arith.constant 0 : i32
    return %c0_i32, %c0_i32_0 : i32, i32
  }
  func.func @transform_22(%arg0: i32) -> (i32, i32) {
    %c0_i32 = arith.constant 0 : i32
    %c0_i32_0 = arith.constant 0 : i32
    %c0_i32_1 = arith.constant 0 : i32
    return %c0_i32, %c0_i32_0 : i32, i32
  }
  func.func @transform_23(%arg0: i32) -> (i32, i32) {
    %c0_i32 = arith.constant 0 : i32
    %c0_i32_0 = arith.constant 0 : i32
    %c0_i32_1 = arith.constant 0 : i32
    return %c0_i32, %c0_i32_0 : i32, i32
  }
  func.func @transform_24(%arg0: i32) -> (i32, i32) {
    %c0_i32 = arith.constant 0 : i32
    %c0_i32_0 = arith.constant 0 : i32
    %c0_i32_1 = arith.constant 0 : i32
    return %c0_i32, %c0_i32_0 : i32, i32
  }
  func.func @transform_25(%arg0: i32) -> (i32, i32) {
    %c0_i32 = arith.constant 0 : i32
    %c0_i32_0 = arith.constant 0 : i32
    %c0_i32_1 = arith.constant 0 : i32
    return %c0_i32, %c0_i32_0 : i32, i32
  }
  func.func @transform_26(%arg0: i32) -> (i32, i32) {
    %c0_i32 = arith.constant 0 : i32
    %c0_i32_0 = arith.constant 0 : i32
    %c0_i32_1 = arith.constant 0 : i32
    return %c0_i32, %c0_i32_0 : i32, i32
  }
  func.func @transform_27(%arg0: i32) -> (i32, i32) {
    %c0_i32 = arith.constant 0 : i32
    %c0_i32_0 = arith.constant 0 : i32
    %c0_i32_1 = arith.constant 0 : i32
    return %c0_i32, %c0_i32_0 : i32, i32
  }
  func.func @transform_28(%arg0: i32) -> (i32, i32) {
    %c0_i32 = arith.constant 0 : i32
    %c0_i32_0 = arith.constant 0 : i32
    %c0_i32_1 = arith.constant 0 : i32
    return %c0_i32, %c0_i32_0 : i32, i32
  }
  func.func @transform_29(%arg0: i32) -> (i32, i32) {
    %c0_i32 = arith.constant 0 : i32
    %c0_i32_0 = arith.constant 0 : i32
    %c0_i32_1 = arith.constant 0 : i32
    return %c0_i32, %c0_i32_0 : i32, i32
  }
  func.func @transform_30(%arg0: i32) -> (i32, i32) {
    %c0_i32 = arith.constant 0 : i32
    %c0_i32_0 = arith.constant 0 : i32
    %c0_i32_1 = arith.constant 0 : i32
    return %c0_i32, %c0_i32_0 : i32, i32
  }
  func.func @transform_31(%arg0: i32) -> (i32, i32) {
    %c0_i32 = arith.constant 0 : i32
    %c0_i32_0 = arith.constant 0 : i32
    %c0_i32_1 = arith.constant 0 : i32
    return %c0_i32, %c0_i32_0 : i32, i32
  }
  func.func @transform_32(%arg0: i32) -> (i32, i32) {
    %c0_i32 = arith.constant 0 : i32
    %c0_i32_0 = arith.constant 0 : i32
    %c0_i32_1 = arith.constant 0 : i32
    return %c0_i32, %c0_i32_0 : i32, i32
  }
  func.func @transform_33(%arg0: i32) -> (i32, i32) {
    %c0_i32 = arith.constant 0 : i32
    %c0_i32_0 = arith.constant 0 : i32
    return %arg0, %c0_i32 : i32, i32
  }
}

</mosaic_0001>

<bundles_post_ra>
// kernel: tpu_custom_call.1
= control target key start
LH: loop header
LB: loop body
LE: loop exit
PB: predicated region body
PF: predicated region fallthrough
CT: control target
= control target key end

     0   :  { %s4100_s6 = smov 1   ;;  %s4101_s10 = smov 2   ;;  %s4972_s0 = inlined_call_operand.smem [shape: u32[34], index: -1, kind: input, shape index: {}] }
   0x1   :  { %s4150_s5 = sld [smem:[%s4972_s0]]   ;;  %s4102_s14 = smov 3  }
   0x2   :  { %s4155_s9 = sld [smem:[%s4972_s0 + %s4100_s6]]   ;;  %s4103_s18 = smov 4  }
   0x3   :  { %s4160_s13 = sld [smem:[%s4972_s0 + %s4101_s10]]   ;;  %s4104_s22 = smov 5  }
   0x4   :  { %s4165_s17 = sld [smem:[%s4972_s0 + %s4102_s14]]   ;;  %s4105_s26 = smov 6  }
   0x5   :  { %s4170_s21 = sld [smem:[%s4972_s0 + %s4103_s18]]   ;;  %s4106_s30 = smov 7  }
   0x6   :  { %s4175_s25 = sld [smem:[%s4972_s0 + %s4104_s22]]   ;;  %s4107_s4 = smov 8  }
   0x7   :  { %s4180_s29 = sld [smem:[%s4972_s0 + %s4105_s26]]   ;;  %s4108_s10 = smov 9  }
   0x8   :  { %s4185_s3 = sld [smem:[%s4972_s0 + %s4106_s30]]   ;;  %s4109_s15 = smov 10  }
   0x9   :  { %s4190_s8 = sld [smem:[%s4972_s0 + %s4107_s4]]   ;;  %s4110_s20 = smov 11  }
   0xa   :  { %s4195_s14 = sld [smem:[%s4972_s0 + %s4108_s10]]   ;;  %s4111_s26 = smov 12  }
   0xb   :  { %s4200_s19 = sld [smem:[%s4972_s0 + %s4109_s15]]   ;;  %s4112_s1 = smov 13  }
   0xc   :  { %s4205_s24 = sld [smem:[%s4972_s0 + %s4110_s20]]   ;;  %s4113_s7 = smov 14  }
   0xd   :  { %s4210_s30 = sld [smem:[%s4972_s0 + %s4111_s26]]   ;;  %s4114_s15 = smov 15  }
   0xe   :  { %s4215_s6 = sld [smem:[%s4972_s0 + %s4112_s1]]   ;;  %s4115_s22 = smov 16  }
   0xf   :  { %s4220_s12 = sld [smem:[%s4972_s0 + %s4113_s7]]   ;;  %s4116_s28 = smov 17  }
  0x10   :  { %s4225_s20 = sld [smem:[%s4972_s0 + %s4114_s15]]   ;;  %s4117_s7 = smov 18  }
  0x11   :  { %s4230_s27 = sld [smem:[%s4972_s0 + %s4115_s22]]   ;;  %s4118_s15 = smov 19  }
  0x12   :  { %s4235_s4 = sld [smem:[%s4972_s0 + %s4116_s28]]   ;;  %s4119_s22 = smov 20  }
  0x13   :  { %s4120_s28 = smov 21  }
  0x14   :  { %4980 = sst [smem:[#allocation5_spill]] %s4215_s6 }
  0x15   :  { %s4240_s6 = sld [smem:[%s4972_s0 + %s4117_s7]]   ;;  %s4121_s7 = smov 22  }
  0x16   :  { %4981 = sst [smem:[#allocation6_spill]] %s4225_s20 }
  0x17   :  { %4982 = sst [smem:[#allocation7_spill]] %s4230_s27 }
  0x18   :  { %4983 = sst [smem:[#allocation8_spill]] %s4235_s4 }
  0x19   :  { %s4245_s20 = sld [smem:[%s4972_s0 + %s4118_s15]]   ;;  %s4122_s15 = smov 23  }
  0x1a   :  { %s4250_s27 = sld [smem:[%s4972_s0 + %s4119_s22]]   ;;  %s4123_s22 = smov 24  }
  0x1b   :  { %4984 = sst [smem:[#allocation9_spill]] %s4240_s6 }
  0x1c   :  { %s4255_s4 = sld [smem:[%s4972_s0 + %s4120_s28]]   ;;  %s4124_s28 = smov 25  }
  0x1d   :  { %s4260_s6 = sld [smem:[%s4972_s0 + %s4121_s7]]   ;;  %s4125_s7 = smov 26  }
  0x1f   :  { %4985 = sst [smem:[#allocation10_spill]] %s4245_s20 }
  0x20   :  { %4986 = sst [smem:[#allocation11_spill]] %s4250_s27 }
  0x21   :  { %s4265_s20 = sld [smem:[%s4972_s0 + %s4122_s15]]   ;;  %s4126_s15 = smov 27  }
  0x22   :  { %4987 = sst [smem:[#allocation12_spill]] %s4255_s4 }
  0x23   :  { %4988 = sst [smem:[#allocation13_spill]] %s4260_s6 }
  0x24   :  { %s4270_s27 = sld [smem:[%s4972_s0 + %s4123_s22]]   ;;  %s4127_s22 = smov 28  }
  0x25   :  { %s4275_s4 = sld [smem:[%s4972_s0 + %s4124_s28]]   ;;  %s4128_s28 = smov 29  }
  0x26   :  { %s4280_s6 = sld [smem:[%s4972_s0 + %s4125_s7]]   ;;  %s4129_s7 = smov 30  }
  0x27   :  { %4989 = sst [smem:[#allocation14_spill]] %s4265_s20 }
  0x28   :  { %s4285_s20 = sld [smem:[%s4972_s0 + %s4126_s15]]   ;;  %s4130_s15 = smov 31  }
  0x2a   :  { %4990 = sst [smem:[#allocation15_spill]] %s4270_s27 }
  0x2b   :  { %4991 = sst [smem:[#allocation16_spill]] %s4275_s4 }
  0x2c   :  { %4992 = sst [smem:[#allocation17_spill]] %s4280_s6 }
  0x2d   :  { %s4290_s27 = sld [smem:[%s4972_s0 + %s4127_s22]]   ;;  %s4131_s22 = smov 32  }
  0x2e   :  { %4993 = sst [smem:[#allocation18_spill]] %s4285_s20 }
  0x2f   :  { %s4295_s4 = sld [smem:[%s4972_s0 + %s4128_s28]]   ;;  %s4132_s28 = smov 33  }
  0x30   :  { %s4300_s6 = sld [smem:[%s4972_s0 + %s4129_s7]]  }
  0x31   :  { %s4305_s20 = sld [smem:[%s4972_s0 + %s4130_s15]]  }
  0x33   :  { %4994 = sst [smem:[#allocation19_spill]] %s4290_s27 }
  0x34   :  { %s4310_s27 = sld [smem:[%s4972_s0 + %s4131_s22]]  }
  0x35   :  { %4995 = sst [smem:[#allocation20_spill]] %s4295_s4 }
  0x36   :  { %s4315_s4 = sld [smem:[%s4972_s0 + %s4132_s28]]  }
  0x37   :  { %v4318_v0 = vld [vmem:[%s4150_s5] sm:$0xff]  ;;  %vm4979_vm0 = vcmask 261120   ;;  %v4321_v1 = vld [vmem:[%s4150_s5 + $0x8] sm:$0xff] }
  0x38   :  { %v143_v2 = vsel %vm4979_vm0, %v4318_v0, 0.0  ;;  %v146_v3 = vsel %vm4979_vm0, %v4321_v1, 0.0 }
  0x39   :  { %144 = vadd.xlane.f32.xlu0 %v143_v2 }
  0x3d   :  { %147 = vadd.xlane.f32.xlu0 %v146_v3 }
  0x3e   :  { %72 = vsyncpa [#allocation3], 0  ;;  %v3930_v14 = vld [vmem:[%s4165_s17] sm:$0xff]   ;;  %v4133_v15 = vmov 0.0   ;;  %v3931_v16 = vld [vmem:[%s4165_s17 + $0x8] sm:$0xff]   ;;  %vm4978_vm1 = vmmov 0  }
  0x3f   :  { %3509 = vmatprep.subr.bf16.mxu0 %v4133_v15  ;;  %3517 = vmatprep.subr.bf16.mxu1 %v4133_v15  ;;  %v3204_v25 = vld [vmem:[%s4155_s9] ss:$0 sm:$0xff]  ;;  %v3933_v35 = vld [vmem:[%s4175_s25 + $0x8] sm:$0xff]   ;;  %v3934_v36 = vld [vmem:[%s4175_s25 + $0x10] sm:$0xff]   ;;  %vm665_vm2 = vcmask 64512   ;;  %vm798_vm3 = vcmask 1043456  }
  0x40   :  { %3510 = vmatpush3.bf16.msra.mxu0 %v3930_v14  ;;  %3513 = vmatprep.mubr.msk.bf16.mxu0 %vm4978_vm1, %v4133_v15  ;;  %v3205_v29 = vld [vmem:[%s4160_s13] ss:$0 sm:$0xff]  ;;  %v3935_v37 = vld [vmem:[%s4175_s25 + $0x18] sm:$0xff]   ;;  %v3937_v39 = vld [vmem:[%s4175_s25 + $0x28] sm:$0xff]   ;;  %s4135_s0 = smov 256   ;;  %s4136_s5 = smov 121  }
  0x41   :  { %3511 = vmatprep.subr.bf16.mxu0 %v4133_v15  ;;  %3533 = vmatprep.mubr.msk.bf16.mxu1 %vm4978_vm1, %v4133_v15  ;;  %v3932_v34 = vld [vmem:[%s4175_s25] sm:$0xff]   ;;  %v3938_v40 = vld [vmem:[%s4175_s25 + $0x30] sm:$0xff]   ;;  %v3939_v41 = vld [vmem:[%s4175_s25 + $0x38] sm:$0xff]   ;;  %s4137_s9 = smov 8   ;;  %s4138_s13 = smov 16   ;;  %vm2311_vm4 = vcmask 130048  }
  0x42   :  { %3518 = vmatpush3.bf16.msra.mxu1 %v3932_v34  ;;  %v3936_v38 = vld [vmem:[%s4175_s25 + $0x20] sm:$0xff]   ;;  %s4139_s17 = smov 24   ;;  %vm2313_vm5 = vcmask 195584   ;;  %s4997_s25 = sld [smem:[#allocation8_spill]] }
  0x43   :  { %3519 = vmatprep.subr.bf16.mxu1 %v4133_v15  ;;  %v3206_v42 = vld [vmem:[%s4170_s21] ss:$0 sm:$0xff]  ;;  %s4996_s21 = sld [smem:[#allocation5_spill]]  ;;  %s5009_s7 = sld [smem:[#allocation15_spill]] }
  0x44   :  { %3512 = vmatpush3.bf16.msra.mxu0 %v3931_v16  ;;  %v3212_v60 = vld [vmem:[%s4180_s29] ss:$0 sm:$0xff]  ;;  %s4998_s29 = sld [smem:[#allocation6_spill]]  ;;  %s5011_s10 = sld [smem:[#allocation18_spill]] }
  0x45   :  { %3537 = vmatprep.subr.bf16.mxu0 %v4133_v15  ;;  %v3222_v34 = vld [vmem:[%s4190_s8] ss:$0 sm:$0xff]  ;;  %s5000_s8 = sld [smem:[#allocation10_spill]]  ;;  %s5015_s11 = sld [smem:[#allocation16_spill]] }
  0x46   :  { %3520 = vmatpush3.bf16.msra.mxu1 %v3933_v35  ;;  %s5016_s15 = sld [smem:[#allocation17_spill]]  ;;  %s5017_s16 = sld [smem:[#allocation20_spill]] }
  0x47   :  { %3521 = vmatprep.subr.bf16.mxu1 %v4133_v15  ;;  %s5020_s18 = sld [smem:[#allocation19_spill]] }
  0x4a   :  { %3522 = vmatpush3.bf16.msra.mxu1 %v3934_v36 }
  0x4b   :  { %3523 = vmatprep.subr.bf16.mxu1 %v4133_v15 }
  0x4e   :  { %3524 = vmatpush3.bf16.msra.mxu1 %v3935_v37 }
  0x4f   :  { %3525 = vmatprep.subr.bf16.mxu1 %v4133_v15 }
  0x52   :  { %3526 = vmatpush3.bf16.msra.mxu1 %v3936_v38  ;;  %v3942_v38 = vld [vmem:[%s4200_s19] sm:$0xff]  }
  0x53   :  { %3527 = vmatprep.subr.bf16.mxu1 %v4133_v15 }
  0x56   :  { %3528 = vmatpush3.bf16.msra.mxu1 %v3937_v39 }
  0x57   :  { %3529 = vmatprep.subr.bf16.mxu1 %v4133_v15 }
  0x5a   :  { %3530 = vmatpush3.bf16.msra.mxu1 %v3938_v40  ;;  %v3943_v40 = vld [vmem:[%s4200_s19 + $0x8] sm:$0xff]  }
  0x5b   :  { %3531 = vmatprep.subr.bf16.mxu1 %v4133_v15 }
  0x5e   :  { %3532 = vmatpush3.bf16.msra.mxu1 %v3939_v41  ;;  %v3944_v41 = vld [vmem:[%s4205_s24] sm:$0xff]  }
  0x5f   :  { %3587 = vmatprep.subr.bf16.mxu1 %v4133_v15 }
  0xc6   :  { %v145_v4 = vpop.xlane.xlu0 %144 }
  0xc7   :  { %v150_v5 = vmul.f32 0.03125, %v145_v4 }
  0xc9   :  { %v152_v6 = vsub.f32 %v4318_v0, %v150_v5 }
  0xca   :  { %v148_v7 = vpop.xlane.xlu0 %147 }
  0xcb   :  { %v151_v8 = vmul.f32 0.03125, %v148_v7  ;;  %v154_v9 = vmul.f32 %v152_v6, %v152_v6 }
  0xcd   :  { %v153_v10 = vsub.f32 %v4321_v1, %v151_v8  ;;  %v156_v11 = vsel %vm4979_vm0, %v154_v9, 0.0 }
  0xce   :  { %157 = vadd.xlane.f32.xlu1 %v156_v11 }
  0xcf   :  { %v155_v12 = vmul.f32 %v153_v10, %v153_v10 }
  0xd1   :  { %v159_v13 = vsel %vm4979_vm0, %v155_v12, 0.0 }
  0xd2   :  { %160 = vadd.xlane.f32.xlu1 %v159_v13 }
 0x15b   :  { %v158_v17 = vpop.xlane.xlu1 %157 }
 0x15c   :  { %v162_v18 = vmul.f32 0.03125, %v158_v17 }
 0x15e   :  { %v164_v19 = vadd.f32 1e-05, %v162_v18 }
 0x15f   :  { %v161_v20 = vpop.xlane.xlu1 %160 }
 0x160   :  { %3992 = vrsqrt.f32 %v164_v19  ;;  %v163_v21 = vmul.f32 0.03125, %v161_v20  ;;  %v3940_v20 = vld [vmem:[%s4195_s14] sm:$0xff]  }
 0x162   :  { %v165_v22 = vadd.f32 1e-05, %v163_v21  ;;  %v3941_v21 = vld [vmem:[%s4195_s14 + $0x8] sm:$0xff]  }
 0x164   :  { %3994 = vrsqrt.f32 %v165_v22 }
 0x16a   :  { %v3993_v23 = vpop.eup %3992 }
 0x16b   :  { %v168_v24 = vmul.f32 %v3993_v23, %v152_v6 }
 0x16d   :  { %v177_v28 = vmul.f32 %v3204_v25, %v168_v24 }
 0x16e   :  { %v3995_v26 = vpop.eup %3994 }
 0x16f   :  { %v169_v27 = vmul.f32 %v3995_v26, %v153_v10  ;;  %v186_v31 = vadd.f32 %v3205_v29, %v177_v28 }
 0x171   :  { %v178_v30 = vmul.f32 %v3204_v25, %v169_v27 }
 0x173   :  { %v187_v32 = vadd.f32 %v3205_v29, %v178_v30  ;;  %v3221_v29 = vld [vmem:[%s4185_s3] ss:$0 sm:$0xff]  ;;  %s4999_s3 = sld [smem:[#allocation7_spill]] }
 0x175   :  { %v192_v33 = vpack.c.bf16 %v187_v32, %v186_v31 }
 0x177   :  { %3514 = vmatmul.mubr.msk.bf16.vlgmr.msra.gmra.mrb[0].mxu0 %vm4979_vm0, %v192_v33 }
 0x178   :  { %3541 = vmatprep.mubr.msk.bf16.mxu0 %vm4978_vm1, %v4133_v15  ;;  %3538 = vmatpush3.bf16.msra.mxu0 %v3940_v20 }
 0x179   :  { %3539 = vmatprep.subr.bf16.mxu0 %v4133_v15 }
 0x17c   :  { %3540 = vmatpush3.bf16.msra.mxu0 %v3941_v21 }
 0x17d   :  { %3545 = vmatprep.subr.bf16.mxu0 %v4133_v15 }
 0x24a   :  { %v249_v43 = vpop.f32.mrb[0].mxu0 }
 0x24b   :  { %v250_v44 = vadd.f32 %v3206_v42, %v249_v43  ;;  %v3515_v45 = vpop.f32.mrb[1].mxu0  ;;  %v3946_v43 = vld [vmem:[%s4220_s12] sm:$0xff]  }
 0x24c   :  { %v252_v46 = vpop.f32.mrb[2].mxu0  ;;  %v3947_v45 = vld [vmem:[%s4220_s12 + $0x8] sm:$0xff]  }
 0x24d   :  { %v3210_v47 = vmul.f32 -1.442695, %v250_v44  ;;  %v253_v48 = vadd.f32 %v3206_v42, %v252_v46  ;;  %v3516_v49 = vpop.f32.mrb[3].mxu0  ;;  %v3945_v42 = vld [vmem:[%s4205_s24 + $0x8] sm:$0xff]   ;;  %v4416_v46 = vsel %vm665_vm2, %v3947_v45, 0 }
 0x24e   :  { %v3949_v49 = vld [vmem:[%s4220_s12 + $0x18] sm:$0xff]  }
 0x24f   :  { %3996 = vpow2.f32 %v3210_v47  ;;  %v3211_v50 = vmul.f32 -1.442695, %v253_v48  ;;  %v3948_v47 = vld [vmem:[%s4220_s12 + $0x10] sm:$0xff]  }
 0x251   :  { %3998 = vpow2.f32 %v3211_v50  ;;  %v4428_v50 = vsel %vm665_vm2, %v3949_v49, 0 }
 0x259   :  { %v3997_v51 = vpop.eup %3996 }
 0x25a   :  { %v262_v52 = vadd.f32 1.0, %v3997_v51  ;;  %v3950_v51 = vld [vmem:[%s4220_s12 + $0x20] sm:$0xff]  }
 0x25b   :  { %v3999_v53 = vpop.eup %3998 }
 0x25c   :  { %4000 = vrcp.f32 %v262_v52  ;;  %v263_v54 = vadd.f32 1.0, %v3999_v53  ;;  %v4434_v52 = vsel %vm665_vm2, %v3950_v51, 0  ;;  %v3951_v53 = vld [vmem:[%s4220_s12 + $0x28] sm:$0xff]  }
 0x25e   :  { %4002 = vrcp.f32 %v263_v54  ;;  %v4440_v54 = vsel %vm665_vm2, %v3951_v53, 0 }
 0x266   :  { %v4001_v55 = vpop.eup %4000 }
 0x267   :  { %v268_v57 = vmul.f32 %v4001_v55, %v250_v44  ;;  %v4410_v44 = vsel %vm665_vm2, %v3946_v43, 0  ;;  %v3952_v55 = vld [vmem:[%s4220_s12 + $0x30] sm:$0xff]  }
 0x268   :  { %v4003_v56 = vpop.eup %4002 }
 0x269   :  { %v269_v58 = vmul.f32 %v4003_v56, %v253_v48  ;;  %v4422_v48 = vsel %vm665_vm2, %v3948_v47, 0  ;;  %v4446_v56 = vsel %vm665_vm2, %v3952_v55, 0 }
 0x26b   :  { %v286_v59 = vpack.c.bf16 %v269_v58, %v268_v57  ;;  %v3953_v57 = vld [vmem:[%s4220_s12 + $0x38] sm:$0xff]   ;;  %s5008_s12 = sld [smem:[#allocation13_spill]] }
 0x26c   :  { %v4452_v58 = vsel %vm665_vm2, %v3953_v57, 0 }
 0x26d   :  { %3534 = vmatmul.mubr.bf16.vlgmr.msra.gmra.mrb[0].mxu1 %v286_v59 }
 0x26e   :  { %3589 = vmatprep.mubr.msk.bf16.mxu1 %vm4978_vm1, %v4133_v15 }
 0x340   :  { %v376_v61 = vpop.f32.mrb[0].mxu1 }
 0x341   :  { %v377_v62 = vadd.f32 %v3212_v60, %v376_v61  ;;  %v3535_v63 = vpop.f32.mrb[1].mxu1 }
 0x342   :  { %v379_v2 = vpop.f32.mrb[2].mxu1 }
 0x343   :  { %v383_v3 = vmul.f32 0.5, %v377_v62  ;;  %v380_v4 = vadd.f32 %v3212_v60, %v379_v2  ;;  %v3536_v5 = vpop.f32.mrb[3].mxu1 }
 0x345   :  { %v4367_v6 = vadd.f32 %v383_v3, %v4318_v0  ;;  %v384_v7 = vmul.f32 0.5, %v380_v4 }
 0x347   :  { %v4370_v8 = vadd.f32 %v384_v7, %v4321_v1  ;;  %v387_v9 = vsel %vm4979_vm0, %v4367_v6, 0.0 }
 0x348   :  { %388 = vadd.xlane.f32.xlu0 %v387_v9 }
 0x349   :  { %v390_v10 = vsel %vm4979_vm0, %v4370_v8, 0.0 }
 0x34a   :  { %391 = vadd.xlane.f32.xlu1 %v390_v10 }
 0x3d5   :  { %v389_v11 = vpop.xlane.xlu0 %388 }
 0x3d6   :  { %v393_v12 = vmul.f32 0.03125, %v389_v11 }
 0x3d7   :  { %v392_v13 = vpop.xlane.xlu1 %391 }
 0x3d8   :  { %v395_v0 = vsub.f32 %v4367_v6, %v393_v12  ;;  %v394_v14 = vmul.f32 0.03125, %v392_v13 }
 0x3da   :  { %v396_v16 = vsub.f32 %v4370_v8, %v394_v14  ;;  %v397_v1 = vmul.f32 %v395_v0, %v395_v0 }
 0x3dc   :  { %v399_v17 = vsel %vm4979_vm0, %v397_v1, 0.0  ;;  %v398_v18 = vmul.f32 %v396_v16, %v396_v16 }
 0x3dd   :  { %400 = vadd.xlane.f32.xlu0 %v399_v17 }
 0x3de   :  { %v402_v19 = vsel %vm4979_vm0, %v398_v18, 0.0 }
 0x3df   :  { %403 = vadd.xlane.f32.xlu1 %v402_v19 }
 0x46a   :  { %v401_v22 = vpop.xlane.xlu0 %400 }
 0x46b   :  { %v405_v23 = vmul.f32 0.03125, %v401_v22 }
 0x46c   :  { %v404_v24 = vpop.xlane.xlu1 %403 }
 0x46d   :  { %v407_v25 = vadd.f32 1e-05, %v405_v23  ;;  %v406_v26 = vmul.f32 0.03125, %v404_v24 }
 0x46f   :  { %4004 = vrsqrt.f32 %v407_v25  ;;  %v408_v27 = vadd.f32 1e-05, %v406_v26 }
 0x471   :  { %4006 = vrsqrt.f32 %v408_v27 }
 0x479   :  { %v4005_v28 = vpop.eup %4004 }
 0x47a   :  { %v411_v30 = vmul.f32 %v4005_v28, %v395_v0 }
 0x47b   :  { %v4007_v31 = vpop.eup %4006 }
 0x47c   :  { %v420_v32 = vmul.f32 %v3221_v29, %v411_v30  ;;  %v412_v33 = vmul.f32 %v4007_v31, %v396_v16 }
 0x47e   :  { %v421_v35 = vmul.f32 %v3221_v29, %v412_v33  ;;  %v429_v36 = vadd.f32 %v3222_v34, %v420_v32 }
 0x480   :  { %v430_v37 = vadd.f32 %v3222_v34, %v421_v35 }
 0x482   :  { %v4387_v39 = vpack.c.bf16 %v430_v37, %v429_v36 }
 0x484   :  { %3542 = vmatmul.mubr.msk.bf16.vlgmr.msra.gmra.mrb[4].mxu0 %vm4979_vm0, %v4387_v39 }
 0x485   :  { %3546 = vmatpush3.bf16.msra.mxu0 %v3942_v38  ;;  %3549 = vmatprep.mubr.msk.bf16.mxu0 %vm4978_vm1, %v4133_v15 }
 0x486   :  { %3547 = vmatprep.subr.bf16.mxu0 %v4133_v15 }
 0x489   :  { %3548 = vmatpush3.bf16.msra.mxu0 %v3943_v40 }
 0x48a   :  { %3553 = vmatprep.subr.bf16.mxu0 %v4133_v15 }
 0x48c   :  { %3550 = vmatmul.mubr.msk.bf16.vlgmr.msra.gmra.mrb[8].mxu0 %vm4979_vm0, %v4387_v39 }
 0x48d   :  { %3554 = vmatpush3.bf16.msra.mxu0 %v3944_v41  ;;  %3557 = vmatprep.mubr.msk.bf16.mxu0 %vm4978_vm1, %v4133_v15 }
 0x48e   :  { %3555 = vmatprep.subr.bf16.mxu0 %v4133_v15 }
 0x491   :  { %3556 = vmatpush3.bf16.msra.mxu0 %v3945_v42 }
 0x492   :  { %3561 = vmatprep.subr.bf16.mxu0 %v4133_v15 }
 0x494   :  { %3558 = vmatmul.mubr.msk.bf16.vlgmr.msra.gmra.mrb[12].mxu0 %vm4979_vm0, %v4387_v39 }
 0x495   :  { %3577 = vmatprep.mubr.msk.bf16.mxu0 %vm4978_vm1, %v4133_v15 }
 0x49a   :  { %3562 = vmatpush3.bf16.xpose.msra.mxu0 %v4410_v44 }
 0x49b   :  { %3563 = vmatprep.subr.bf16.mxu0 %v4133_v15 }
 0x4a2   :  { %3564 = vmatpush3.bf16.xpose.msra.mxu0 %v4416_v46 }
 0x4a3   :  { %3565 = vmatprep.subr.bf16.mxu0 %v4133_v15 }
 0x4aa   :  { %3566 = vmatpush3.bf16.xpose.msra.mxu0 %v4422_v48 }
 0x4ab   :  { %3567 = vmatprep.subr.bf16.mxu0 %v4133_v15 }
 0x4b2   :  { %3568 = vmatpush3.bf16.xpose.msra.mxu0 %v4428_v50 }
 0x4b3   :  { %3569 = vmatprep.subr.bf16.mxu0 %v4133_v15 }
 0x4ba   :  { %3570 = vmatpush3.bf16.xpose.msra.mxu0 %v4434_v52 }
 0x4bb   :  { %3571 = vmatprep.subr.bf16.mxu0 %v4133_v15 }
 0x4c2   :  { %3572 = vmatpush3.bf16.xpose.msra.mxu0 %v4440_v54 }
 0x4c3   :  { %3573 = vmatprep.subr.bf16.mxu0 %v4133_v15 }
 0x4ca   :  { %3574 = vmatpush3.bf16.xpose.msra.mxu0 %v4446_v56 }
 0x4cb   :  { %3575 = vmatprep.subr.bf16.mxu0 %v4133_v15 }
 0x4d2   :  { %3576 = vmatpush3.bf16.xpose.msra.mxu0 %v4452_v58 }
 0x4d3   :  { %3581 = vmatprep.subr.bf16.mxu0 %v4133_v15 }
 0x557   :  { %v501_v59 = vpop.f32.mrb[4].mxu0 }
 0x558   :  { %v3543_v60 = vpop.f32.mrb[5].mxu0 }
 0x559   :  { %v504_v61 = vpop.f32.mrb[6].mxu0 }
 0x55a   :  { %v622_v62 = vpack.c.bf16 %v504_v61, %v501_v59  ;;  %v3544_v63 = vpop.f32.mrb[7].mxu0 }
 0x55c   :  { %3578 = vmatmul.mubr.msk.bf16.vlgmr.msra.gmra.mrb[16].mxu0 %vm665_vm2, %v622_v62  ;;  %v847_v36 = vrot.slane %v622_v62, 4 }
 0x55d   :  { %3583 = vmatprep.mubr.msk.bf16.mxu0 %vm4978_vm1, %v4133_v15 }
 0x55f   :  { %v558_v2 = vpop.f32.mrb[8].mxu0 }
 0x560   :  { %v3551_v3 = vpop.f32.mrb[9].mxu0 }
 0x561   :  { %v561_v4 = vpop.f32.mrb[10].mxu0  ;;  %v3956_v3 = vld [vmem:[%s4200_s19 + $0x10] sm:$0xff]  }
 0x562   :  { %v623_v5 = vpack.c.bf16 %v561_v4, %v558_v2  ;;  %v3552_v7 = vpop.f32.mrb[11].mxu0  ;;  %v3955_v2 = vld [vmem:[%s4195_s14 + $0x18] sm:$0xff]  }
 0x563   :  { %v3957_v4 = vld [vmem:[%s4200_s19 + $0x18] sm:$0xff]  }
 0x564   :  { %v742_v9 = vsel %vm665_vm2, %v623_v5, 0  ;;  %v849_v31 = vrot.slane %v623_v5, 4  ;;  %v3958_v5 = vld [vmem:[%s4205_s24 + $0x10] sm:$0xff]   ;;  %v3959_v7 = vld [vmem:[%s4205_s24 + $0x18] sm:$0xff]  }
 0x565   :  { %3582 = vmatpush3.bf16.xpose.msra.mxu0 %v742_v9 }
 0x566   :  { %3649 = vmatprep.subr.bf16.mxu0 %v4133_v15  ;;  %v858_v34 = vsel %vm665_vm2, %v849_v31, 0 }
 0x567   :  { %v615_v10 = vpop.f32.mrb[12].mxu0 }
 0x568   :  { %v3559_v11 = vpop.f32.mrb[13].mxu0 }
 0x569   :  { %v618_v12 = vpop.f32.mrb[14].mxu0 }
 0x56a   :  { %v624_v13 = vpack.c.bf16 %v618_v12, %v615_v10  ;;  %v3560_v0 = vpop.f32.mrb[15].mxu0 }
 0x56c   :  { %v800_v14 = vsel %vm798_vm3, %v624_v13, 0  ;;  %3584 = vmatmul.mubr.msk.bf16.vlgmr.msra.gmra.mrb[20].mxu0 %vm665_vm2, %v622_v62  ;;  %v912_v35 = vrot.slane %v624_v13, 4  ;;  %v3954_v62 = vld [vmem:[%s4195_s14 + $0x10] sm:$0xff]  }
 0x56d   :  { %3588 = vmatpush3.bf16.msra.mxu1 %v800_v14  ;;  %3651 = vmatprep.mubr.msk.bf16.mxu0 %vm4978_vm1, %v4133_v15 }
 0x56e   :  { %3593 = vmatprep.subr.bf16.mxu1 %v4133_v15  ;;  %v917_v37 = vsel %vm798_vm3, %v912_v35, 0 }
 0x62f   :  { %v727_v16 = vpop.f32.mrb[16].mxu0 }
 0x630   :  { %735 = vrot.lane.b32.xlu0 %v727_v16, %s4135_s0  ;;  %v3579_v1 = vpop.f32.mrb[17].mxu0 }
 0x631   :  { %v730_v17 = vpop.f32.mrb[18].mxu0 }
 0x632   :  { %v3580_v18 = vpop.f32.mrb[19].mxu0 }
 0x634   :  { %844 = vrot.lane.b32.xlu0 %v730_v17, %s4135_s0 }
 0x63f   :  { %v778_v19 = vpop.f32.mrb[20].mxu0 }
 0x640   :  { %v3585_v20 = vpop.f32.mrb[21].mxu0 }
 0x641   :  { %v781_v21 = vpop.f32.mrb[22].mxu0 }
 0x642   :  { %v3586_v22 = vpop.f32.mrb[23].mxu0 }
 0x6a2   :  { %v736_v23 = vpop.permute.xlu0 %735 }
 0x6a3   :  { %738 = vrot.lane.b32.xlu1 %v736_v23, %s4136_s5 }
 0x6a6   :  { %v845_v24 = vpop.permute.xlu0 %844 }
 0x6a7   :  { %851 = vrot.lane.b32.xlu0 %v845_v24, %s4136_s5 }
 0x715   :  { %v739_v25 = vpop.permute.xlu1 %738 }
 0x716   :  { %v779_v26 = vadd.f32 %v778_v19, %v739_v25 }
 0x718   :  { %v784_v27 = vsel %vm665_vm2, %v779_v26, -inf }
 0x719   :  { %785 = vmax.xlane.f32.xlu1 %v784_v27  ;;  %v852_v43 = vpop.permute.xlu0 %851 }
 0x7a6   :  { %v786_v28 = vpop.xlane.xlu1 %785 }
 0x7a7   :  { %v787_v29 = vsub.f32 %v779_v26, %v786_v28 }
 0x7a9   :  { %v788_v30 = vmul.f32 1.442695, %v787_v29 }
 0x7ab   :  { %4008 = vpow2.f32 %v788_v30 }
 0x7b5   :  { %v4471_v32 = vpop.eup %4008 }
 0x7b6   :  { %v794_v33 = vpack.c.bf16 %v4471_v32, %v4471_v32 }
 0x7b8   :  { %3590 = vmatmul.mubr.msk.bf16.vlgmr.msra.gmra.mrb[4].mxu1 %vm665_vm2, %v794_v33 }
 0x7b9   :  { %3594 = vmatpush3.bf16.xpose.msra.mxu1 %v858_v34  ;;  %3595 = vmatprep.mubr.msk.bf16.mxu1 %vm4978_vm1, %v4133_v15 }
 0x7ba   :  { %3599 = vmatprep.subr.bf16.mxu1 %v4133_v15 }
 0x7c0   :  { %3596 = vmatmul.mubr.msk.bf16.vlgmr.msra.gmra.mrb[8].mxu1 %vm665_vm2, %v847_v36 }
 0x7c1   :  { %3600 = vmatpush3.bf16.msra.mxu1 %v917_v37  ;;  %3601 = vmatprep.mubr.msk.bf16.mxu1 %vm4978_vm1, %v4133_v15 }
 0x7c2   :  { %3605 = vmatprep.subr.bf16.mxu1 %v4133_v15 }
 0x88b   :  { %v4485_v38 = vpop.f32.mrb[4].mxu1 }
 0x88c   :  { %v3591_v40 = vpop.f32.mrb[5].mxu1 }
 0x88d   :  { %v839_v41 = vpop.f32.mrb[6].mxu1 }
 0x88e   :  { %v3592_v42 = vpop.f32.mrb[7].mxu1 }
 0x893   :  { %v894_v45 = vpop.f32.mrb[8].mxu1 }
 0x894   :  { %v895_v47 = vadd.f32 %v894_v45, %v852_v43  ;;  %v3597_v49 = vpop.f32.mrb[9].mxu1 }
 0x895   :  { %v897_v51 = vpop.f32.mrb[10].mxu1 }
 0x896   :  { %v3598_v53 = vpop.f32.mrb[11].mxu1  ;;  %v900_v55 = vsel %vm665_vm2, %v895_v47, -inf }
 0x897   :  { %901 = vmax.xlane.f32.xlu0 %v900_v55 }
 0x924   :  { %v902_v57 = vpop.xlane.xlu0 %901 }
 0x925   :  { %v903_v59 = vsub.f32 %v895_v47, %v902_v57 }
 0x927   :  { %v904_v60 = vmul.f32 1.442695, %v903_v59 }
 0x929   :  { %4010 = vpow2.f32 %v904_v60 }
 0x933   :  { %v4488_v61 = vpop.eup %4010 }
 0x934   :  { %v910_v63 = vpack.c.bf16 %v4488_v61, %v4488_v61 }
 0x936   :  { %3602 = vmatmul.mubr.msk.bf16.vlgmr.msra.gmra.mrb[12].mxu1 %vm665_vm2, %v910_v63 }
 0x937   :  { %3606 = vmatpush3.bf16.msra.mxu1 %v3954_v62  ;;  %3609 = vmatprep.mubr.msk.bf16.mxu1 %vm4978_vm1, %v4133_v15 }
 0x938   :  { %3607 = vmatprep.subr.bf16.mxu1 %v4133_v15 }
 0x93b   :  { %3608 = vmatpush3.bf16.msra.mxu1 %v3955_v2 }
 0x93c   :  { %3613 = vmatprep.subr.bf16.mxu1 %v4133_v15 }
 0x93e   :  { %3610 = vmatmul.mubr.msk.bf16.vlgmr.msra.gmra.mrb[16].mxu1 %vm4979_vm0, %v4387_v39 }
 0x93f   :  { %3614 = vmatpush3.bf16.msra.mxu1 %v3956_v3  ;;  %3617 = vmatprep.mubr.msk.bf16.mxu1 %vm4978_vm1, %v4133_v15 }
 0x940   :  { %3615 = vmatprep.subr.bf16.mxu1 %v4133_v15 }
 0x943   :  { %3616 = vmatpush3.bf16.msra.mxu1 %v3957_v4 }
 0x944   :  { %3621 = vmatprep.subr.bf16.mxu1 %v4133_v15 }
 0x946   :  { %3618 = vmatmul.mubr.msk.bf16.vlgmr.msra.gmra.mrb[20].mxu1 %vm4979_vm0, %v4387_v39 }
 0x947   :  { %3622 = vmatpush3.bf16.msra.mxu1 %v3958_v5  ;;  %3625 = vmatprep.mubr.msk.bf16.mxu1 %vm4978_vm1, %v4133_v15 }
 0x948   :  { %3623 = vmatprep.subr.bf16.mxu1 %v4133_v15 }
 0x94b   :  { %3624 = vmatpush3.bf16.msra.mxu1 %v3959_v7 }
 0x94c   :  { %3629 = vmatprep.subr.bf16.mxu1 %v4133_v15 }
 0x94e   :  { %3626 = vmatmul.mubr.msk.bf16.vlgmr.msra.gmra.mrb[24].mxu1 %vm4979_vm0, %v4387_v39 }
 0x94f   :  { %3645 = vmatprep.mubr.msk.bf16.mxu1 %vm4978_vm1, %v4133_v15 }
 0x954   :  { %3630 = vmatpush3.bf16.xpose.msra.mxu1 %v4410_v44 }
 0x955   :  { %3631 = vmatprep.subr.bf16.mxu1 %v4133_v15 }
 0x95c   :  { %3632 = vmatpush3.bf16.xpose.msra.mxu1 %v4416_v46 }
 0x95d   :  { %3633 = vmatprep.subr.bf16.mxu1 %v4133_v15 }
 0x964   :  { %3634 = vmatpush3.bf16.xpose.msra.mxu1 %v4422_v48 }
 0x965   :  { %3635 = vmatprep.subr.bf16.mxu1 %v4133_v15 }
 0x96c   :  { %3636 = vmatpush3.bf16.xpose.msra.mxu1 %v4428_v50 }
 0x96d   :  { %3637 = vmatprep.subr.bf16.mxu1 %v4133_v15 }
 0x974   :  { %3638 = vmatpush3.bf16.xpose.msra.mxu1 %v4434_v52 }
 0x975   :  { %3639 = vmatprep.subr.bf16.mxu1 %v4133_v15 }
 0x97c   :  { %3640 = vmatpush3.bf16.xpose.msra.mxu1 %v4440_v54 }
 0x97d   :  { %3641 = vmatprep.subr.bf16.mxu1 %v4133_v15 }
 0x984   :  { %3642 = vmatpush3.bf16.xpose.msra.mxu1 %v4446_v56 }
 0x985   :  { %3643 = vmatprep.subr.bf16.mxu1 %v4133_v15 }
 0x98c   :  { %3644 = vmatpush3.bf16.xpose.msra.mxu1 %v4452_v58 }
 0x98d   :  { %3717 = vmatprep.subr.bf16.mxu1 %v4133_v15 }
 0xa09   :  { %v4535_v9 = vpop.f32.mrb[12].mxu1 }
 0xa0a   :  { %v3603_v10 = vpop.f32.mrb[13].mxu1 }
 0xa0b   :  { %v956_v11 = vpop.f32.mrb[14].mxu1 }
 0xa0c   :  { %v3604_v12 = vpop.f32.mrb[15].mxu1 }
 0xa11   :  { %v1011_v13 = vpop.f32.mrb[16].mxu1 }
 0xa12   :  { %v3611_v0 = vpop.f32.mrb[17].mxu1 }
 0xa13   :  { %v1014_v14 = vpop.f32.mrb[18].mxu1 }
 0xa14   :  { %v1134_v16 = vpack.c.bf16 %v1014_v14, %v1011_v13  ;;  %v3612_v1 = vpop.f32.mrb[19].mxu1 }
 0xa16   :  { %3646 = vmatmul.mubr.msk.bf16.vlgmr.msra.gmra.mrb[28].mxu1 %vm665_vm2, %v1134_v16  ;;  %v1293_v62 = vrot.slane %v1134_v16, 4 }
 0xa17   :  { %3719 = vmatprep.mubr.msk.bf16.mxu1 %vm4978_vm1, %v4133_v15 }
 0xa19   :  { %v1069_v17 = vpop.f32.mrb[20].mxu1 }
 0xa1a   :  { %v3619_v18 = vpop.f32.mrb[21].mxu1 }
 0xa1b   :  { %v1072_v19 = vpop.f32.mrb[22].mxu1 }
 0xa1c   :  { %v1135_v20 = vpack.c.bf16 %v1072_v19, %v1069_v17  ;;  %v3620_v21 = vpop.f32.mrb[23].mxu1  ;;  %v3960_v19 = vld [vmem:[%s4195_s14 + $0x20] sm:$0xff]  }
 0xa1d   :  { %v3961_v21 = vld [vmem:[%s4195_s14 + $0x28] sm:$0xff]  }
 0xa1e   :  { %v1189_v22 = vsel %vm665_vm2, %v1135_v20, 0  ;;  %v1295_v53 = vrot.slane %v1135_v20, 4 }
 0xa1f   :  { %3650 = vmatpush3.bf16.xpose.msra.mxu0 %v1189_v22  ;;  %v3962_v22 = vld [vmem:[%s4200_s19 + $0x20] sm:$0xff]  }
 0xa20   :  { %3655 = vmatprep.subr.bf16.mxu0 %v4133_v15  ;;  %v1304_v59 = vsel %vm665_vm2, %v1295_v53, 0 }
 0xa21   :  { %v1127_v23 = vpop.f32.mrb[24].mxu1 }
 0xa22   :  { %v3627_v24 = vpop.f32.mrb[25].mxu1 }
 0xa23   :  { %v1130_v25 = vpop.f32.mrb[26].mxu1  ;;  %v3964_v24 = vld [vmem:[%s4205_s24 + $0x20] sm:$0xff]  }
 0xa24   :  { %v1136_v26 = vpack.c.bf16 %v1130_v25, %v1127_v23  ;;  %v3628_v27 = vpop.f32.mrb[27].mxu1  ;;  %v3963_v23 = vld [vmem:[%s4200_s19 + $0x28] sm:$0xff]  }
 0xa25   :  { %v3965_v25 = vld [vmem:[%s4205_s24 + $0x28] sm:$0xff]  }
 0xa26   :  { %v1246_v28 = vsel %vm798_vm3, %v1136_v26, 0  ;;  %3652 = vmatmul.mubr.msk.bf16.vlgmr.msra.gmra.mrb[24].mxu0 %vm665_vm2, %v1134_v16  ;;  %v1358_v60 = vrot.slane %v1136_v26, 4 }
 0xa27   :  { %3656 = vmatpush3.bf16.msra.mxu0 %v1246_v28  ;;  %3657 = vmatprep.mubr.msk.bf16.mxu0 %vm4978_vm1, %v4133_v15 }
 0xa28   :  { %3661 = vmatprep.subr.bf16.mxu0 %v4133_v15  ;;  %v1363_v63 = vsel %vm798_vm3, %v1358_v60, 0 }
 0xae9   :  { %v1174_v29 = vpop.f32.mrb[28].mxu1 }
 0xaea   :  { %1182 = vrot.lane.b32.xlu1 %v1174_v29, %s4135_s0  ;;  %v3647_v30 = vpop.f32.mrb[29].mxu1 }
 0xaeb   :  { %v1177_v31 = vpop.f32.mrb[30].mxu1 }
 0xaec   :  { %v3648_v33 = vpop.f32.mrb[31].mxu1 }
 0xaf9   :  { %v1225_v34 = vpop.f32.mrb[24].mxu0 }
 0xafa   :  { %v3653_v35 = vpop.f32.mrb[25].mxu0 }
 0xafb   :  { %v1228_v36 = vpop.f32.mrb[26].mxu0 }
 0xafc   :  { %v3654_v37 = vpop.f32.mrb[27].mxu0 }
 0xb5c   :  { %v1183_v40 = vpop.permute.xlu1 %1182 }
 0xb5d   :  { %1185 = vrot.lane.b32.xlu0 %v1183_v40, %s4136_s5 }
 0xb61   :  { %1290 = vrot.lane.b32.xlu0 %v1177_v31, %s4135_s0 }
 0xbcf   :  { %v1186_v41 = vpop.permute.xlu0 %1185 }
 0xbd0   :  { %v1226_v42 = vadd.f32 %v1225_v34, %v1186_v41 }
 0xbd2   :  { %v1231_v43 = vsel %vm665_vm2, %v1226_v42, -inf }
 0xbd3   :  { %v1291_v45 = vpop.permute.xlu0 %1290  ;;  %1232 = vmax.xlane.f32.xlu1 %v1231_v43 }
 0xbd4   :  { %1297 = vrot.lane.b32.xlu0 %v1291_v45, %s4136_s5 }
 0xc46   :  { %v1298_v7 = vpop.permute.xlu0 %1297 }
 0xc60   :  { %v1233_v47 = vpop.xlane.xlu1 %1232 }
 0xc61   :  { %v1234_v49 = vsub.f32 %v1226_v42, %v1233_v47 }
 0xc63   :  { %v1235_v51 = vmul.f32 1.442695, %v1234_v49 }
 0xc65   :  { %4012 = vpow2.f32 %v1235_v51 }
 0xc6f   :  { %v4552_v55 = vpop.eup %4012 }
 0xc70   :  { %v1241_v57 = vpack.c.bf16 %v4552_v55, %v4552_v55 }
 0xc72   :  { %3658 = vmatmul.mubr.msk.bf16.vlgmr.msra.gmra.mrb[28].mxu0 %vm665_vm2, %v1241_v57 }
 0xc73   :  { %3662 = vmatpush3.bf16.xpose.msra.mxu0 %v1304_v59  ;;  %3663 = vmatprep.mubr.msk.bf16.mxu0 %vm4978_vm1, %v4133_v15 }
 0xc74   :  { %3667 = vmatprep.subr.bf16.mxu0 %v4133_v15 }
 0xc7a   :  { %3664 = vmatmul.mubr.msk.bf16.vlgmr.msra.gmra.mrb[32].mxu0 %vm665_vm2, %v1293_v62 }
 0xc7b   :  { %3668 = vmatpush3.bf16.msra.mxu0 %v1363_v63  ;;  %3669 = vmatprep.mubr.msk.bf16.mxu0 %vm4978_vm1, %v4133_v15 }
 0xc7c   :  { %3673 = vmatprep.subr.bf16.mxu0 %v4133_v15 }
 0xd45   :  { %v4566_v2 = vpop.f32.mrb[28].mxu0 }
 0xd46   :  { %v3659_v3 = vpop.f32.mrb[29].mxu0 }
 0xd47   :  { %v1285_v4 = vpop.f32.mrb[30].mxu0 }
 0xd48   :  { %v3660_v5 = vpop.f32.mrb[31].mxu0 }
 0xd4d   :  { %v1340_v10 = vpop.f32.mrb[32].mxu0 }
 0xd4e   :  { %v1341_v11 = vadd.f32 %v1340_v10, %v1298_v7  ;;  %v3665_v12 = vpop.f32.mrb[33].mxu0 }
 0xd4f   :  { %v1343_v13 = vpop.f32.mrb[34].mxu0 }
 0xd50   :  { %v3666_v0 = vpop.f32.mrb[35].mxu0  ;;  %v1346_v14 = vsel %vm665_vm2, %v1341_v11, -inf }
 0xd51   :  { %1347 = vmax.xlane.f32.xlu0 %v1346_v14 }
 0xdde   :  { %v1348_v16 = vpop.xlane.xlu0 %1347 }
 0xddf   :  { %v1349_v1 = vsub.f32 %v1341_v11, %v1348_v16 }
 0xde1   :  { %v1350_v17 = vmul.f32 1.442695, %v1349_v1 }
 0xde3   :  { %4014 = vpow2.f32 %v1350_v17 }
 0xded   :  { %v4569_v18 = vpop.eup %4014 }
 0xdee   :  { %v1356_v20 = vpack.c.bf16 %v4569_v18, %v4569_v18 }
 0xdf0   :  { %3670 = vmatmul.mubr.msk.bf16.vlgmr.msra.gmra.mrb[36].mxu0 %vm665_vm2, %v1356_v20 }
 0xdf1   :  { %3674 = vmatpush3.bf16.msra.mxu0 %v3960_v19  ;;  %3677 = vmatprep.mubr.msk.bf16.mxu0 %vm4978_vm1, %v4133_v15 }
 0xdf2   :  { %3675 = vmatprep.subr.bf16.mxu0 %v4133_v15 }
 0xdf5   :  { %3676 = vmatpush3.bf16.msra.mxu0 %v3961_v21 }
 0xdf6   :  { %3681 = vmatprep.subr.bf16.mxu0 %v4133_v15 }
 0xdf8   :  { %3678 = vmatmul.mubr.msk.bf16.vlgmr.msra.gmra.mrb[40].mxu0 %vm4979_vm0, %v4387_v39 }
 0xdf9   :  { %3682 = vmatpush3.bf16.msra.mxu0 %v3962_v22  ;;  %3685 = vmatprep.mubr.msk.bf16.mxu0 %vm4978_vm1, %v4133_v15 }
 0xdfa   :  { %3683 = vmatprep.subr.bf16.mxu0 %v4133_v15 }
 0xdfd   :  { %3684 = vmatpush3.bf16.msra.mxu0 %v3963_v23 }
 0xdfe   :  { %3689 = vmatprep.subr.bf16.mxu0 %v4133_v15 }
 0xe00   :  { %3686 = vmatmul.mubr.msk.bf16.vlgmr.msra.gmra.mrb[44].mxu0 %vm4979_vm0, %v4387_v39 }
 0xe01   :  { %3690 = vmatpush3.bf16.msra.mxu0 %v3964_v24  ;;  %3693 = vmatprep.mubr.msk.bf16.mxu0 %vm4978_vm1, %v4133_v15 }
 0xe02   :  { %3691 = vmatprep.subr.bf16.mxu0 %v4133_v15 }
 0xe05   :  { %3692 = vmatpush3.bf16.msra.mxu0 %v3965_v25 }
 0xe06   :  { %3697 = vmatprep.subr.bf16.mxu0 %v4133_v15 }
 0xe08   :  { %3694 = vmatmul.mubr.msk.bf16.vlgmr.msra.gmra.mrb[48].mxu0 %vm4979_vm0, %v4387_v39 }
 0xe09   :  { %3713 = vmatprep.mubr.msk.bf16.mxu0 %vm4978_vm1, %v4133_v15 }
 0xe0e   :  { %3698 = vmatpush3.bf16.xpose.msra.mxu0 %v4410_v44 }
 0xe0f   :  { %3699 = vmatprep.subr.bf16.mxu0 %v4133_v15 }
 0xe16   :  { %3700 = vmatpush3.bf16.xpose.msra.mxu0 %v4416_v46 }
 0xe17   :  { %3701 = vmatprep.subr.bf16.mxu0 %v4133_v15 }
 0xe1e   :  { %3702 = vmatpush3.bf16.xpose.msra.mxu0 %v4422_v48 }
 0xe1f   :  { %3703 = vmatprep.subr.bf16.mxu0 %v4133_v15 }
 0xe26   :  { %3704 = vmatpush3.bf16.xpose.msra.mxu0 %v4428_v50 }
 0xe27   :  { %3705 = vmatprep.subr.bf16.mxu0 %v4133_v15 }
 0xe2e   :  { %3706 = vmatpush3.bf16.xpose.msra.mxu0 %v4434_v52 }
 0xe2f   :  { %3707 = vmatprep.subr.bf16.mxu0 %v4133_v15 }
 0xe36   :  { %3708 = vmatpush3.bf16.xpose.msra.mxu0 %v4440_v54 }
 0xe37   :  { %3709 = vmatprep.subr.bf16.mxu0 %v4133_v15 }
 0xe3e   :  { %3710 = vmatpush3.bf16.xpose.msra.mxu0 %v4446_v56 }
 0xe3f   :  { %3711 = vmatprep.subr.bf16.mxu0 %v4133_v15 }
 0xe46   :  { %3712 = vmatpush3.bf16.xpose.msra.mxu0 %v4452_v58 }
 0xe47   :  { %3785 = vmatprep.subr.bf16.mxu0 %v4133_v15 }
 0xec3   :  { %v4616_v26 = vpop.f32.mrb[36].mxu0 }
 0xec4   :  { %v3671_v27 = vpop.f32.mrb[37].mxu0 }
 0xec5   :  { %v1402_v28 = vpop.f32.mrb[38].mxu0 }
 0xec6   :  { %v3672_v29 = vpop.f32.mrb[39].mxu0 }
 0xecb   :  { %v1457_v30 = vpop.f32.mrb[40].mxu0 }
 0xecc   :  { %v3679_v31 = vpop.f32.mrb[41].mxu0 }
 0xecd   :  { %v1460_v33 = vpop.f32.mrb[42].mxu0 }
 0xece   :  { %v1580_v34 = vpack.c.bf16 %v1460_v33, %v1457_v30  ;;  %v3680_v35 = vpop.f32.mrb[43].mxu0 }
 0xed0   :  { %3714 = vmatmul.mubr.msk.bf16.vlgmr.msra.gmra.mrb[52].mxu0 %vm665_vm2, %v1580_v34  ;;  %v1739_v23 = vrot.slane %v1580_v34, 4 }
 0xed1   :  { %3787 = vmatprep.mubr.msk.bf16.mxu0 %vm4978_vm1, %v4133_v15 }
 0xed3   :  { %v1515_v36 = vpop.f32.mrb[44].mxu0 }
 0xed4   :  { %v3687_v37 = vpop.f32.mrb[45].mxu0 }
 0xed5   :  { %v1518_v40 = vpop.f32.mrb[46].mxu0 }
 0xed6   :  { %v1581_v41 = vpack.c.bf16 %v1518_v40, %v1515_v36  ;;  %v3688_v42 = vpop.f32.mrb[47].mxu0 }
 0xed8   :  { %v1635_v43 = vsel %vm665_vm2, %v1581_v41, 0  ;;  %v1741_v17 = vrot.slane %v1581_v41, 4 }
 0xed9   :  { %3718 = vmatpush3.bf16.xpose.msra.mxu1 %v1635_v43 }
 0xeda   :  { %3723 = vmatprep.subr.bf16.mxu1 %v4133_v15  ;;  %v1750_v21 = vsel %vm665_vm2, %v1741_v17, 0 }
 0xedb   :  { %v1573_v45 = vpop.f32.mrb[48].mxu0 }
 0xedc   :  { %v3695_v47 = vpop.f32.mrb[49].mxu0 }
 0xedd   :  { %v1576_v49 = vpop.f32.mrb[50].mxu0 }
 0xede   :  { %v1582_v51 = vpack.c.bf16 %v1576_v49, %v1573_v45  ;;  %v3696_v53 = vpop.f32.mrb[51].mxu0  ;;  %v3966_v45 = vld [vmem:[%s4195_s14 + $0x30] sm:$0xff]   ;;  %v3967_v49 = vld [vmem:[%s4195_s14 + $0x38] sm:$0xff]   ;;  %s5001_s14 = sld [smem:[#allocation14_spill]] }
 0xedf   :  { %v3969_v53 = vld [vmem:[%s4200_s19 + $0x38] sm:$0xff]  }
 0xee0   :  { %v1692_v57 = vsel %vm798_vm3, %v1582_v51, 0  ;;  %3720 = vmatmul.mubr.msk.bf16.vlgmr.msra.gmra.mrb[32].mxu1 %vm665_vm2, %v1580_v34  ;;  %v1804_v22 = vrot.slane %v1582_v51, 4  ;;  %v3968_v51 = vld [vmem:[%s4200_s19 + $0x30] sm:$0xff]   ;;  %s5002_s19 = sld [smem:[#allocation11_spill]] }
 0xee1   :  { %3724 = vmatpush3.bf16.msra.mxu1 %v1692_v57  ;;  %3725 = vmatprep.mubr.msk.bf16.mxu1 %vm4978_vm1, %v4133_v15  ;;  %v3970_v57 = vld [vmem:[%s4205_s24 + $0x30] sm:$0xff]  }
 0xee2   :  { %3729 = vmatprep.subr.bf16.mxu1 %v4133_v15  ;;  %v1809_v24 = vsel %vm798_vm3, %v1804_v22, 0 }
 0xfa3   :  { %v1620_v59 = vpop.f32.mrb[52].mxu0 }
 0xfa4   :  { %1628 = vrot.lane.b32.xlu1 %v1620_v59, %s4135_s0  ;;  %v3715_v60 = vpop.f32.mrb[53].mxu0  ;;  %v3971_v59 = vld [vmem:[%s4205_s24 + $0x38] sm:$0xff]   ;;  %s5003_s24 = sld [smem:[#allocation12_spill]] }
 0xfa5   :  { %v1623_v62 = vpop.f32.mrb[54].mxu0 }
 0xfa6   :  { %v3716_v63 = vpop.f32.mrb[55].mxu0 }
 0xfb3   :  { %v1671_v3 = vpop.f32.mrb[32].mxu1 }
 0xfb4   :  { %v3721_v4 = vpop.f32.mrb[33].mxu1 }
 0xfb5   :  { %v1674_v5 = vpop.f32.mrb[34].mxu1 }
 0xfb6   :  { %v3722_v7 = vpop.f32.mrb[35].mxu1 }
0x1016   :  { %v1629_v10 = vpop.permute.xlu1 %1628 }
0x1017   :  { %1631 = vrot.lane.b32.xlu0 %v1629_v10, %s4136_s5 }
0x101b   :  { %1736 = vrot.lane.b32.xlu0 %v1623_v62, %s4135_s0 }
0x1089   :  { %v1632_v11 = vpop.permute.xlu0 %1631 }
0x108a   :  { %v1672_v12 = vadd.f32 %v1671_v3, %v1632_v11 }
0x108c   :  { %v1677_v13 = vsel %vm665_vm2, %v1672_v12, -inf }
0x108d   :  { %1678 = vmax.xlane.f32.xlu1 %v1677_v13  ;;  %v1737_v0 = vpop.permute.xlu0 %1736 }
0x108e   :  { %1743 = vrot.lane.b32.xlu0 %v1737_v0, %s4136_s5 }
0x1100   :  { %v1744_v30 = vpop.permute.xlu0 %1743 }
0x111a   :  { %v1679_v14 = vpop.xlane.xlu1 %1678 }
0x111b   :  { %v1680_v16 = vsub.f32 %v1672_v12, %v1679_v14 }
0x111d   :  { %v1681_v1 = vmul.f32 1.442695, %v1680_v16 }
0x111f   :  { %4016 = vpow2.f32 %v1681_v1 }
0x1129   :  { %v4633_v19 = vpop.eup %4016 }
0x112a   :  { %v1687_v20 = vpack.c.bf16 %v4633_v19, %v4633_v19 }
0x112c   :  { %3726 = vmatmul.mubr.msk.bf16.vlgmr.msra.gmra.mrb[36].mxu1 %vm665_vm2, %v1687_v20 }
0x112d   :  { %3730 = vmatpush3.bf16.xpose.msra.mxu1 %v1750_v21  ;;  %3731 = vmatprep.mubr.msk.bf16.mxu1 %vm4978_vm1, %v4133_v15 }
0x112e   :  { %3735 = vmatprep.subr.bf16.mxu1 %v4133_v15 }
0x1134   :  { %3732 = vmatmul.mubr.msk.bf16.vlgmr.msra.gmra.mrb[40].mxu1 %vm665_vm2, %v1739_v23 }
0x1135   :  { %3736 = vmatpush3.bf16.msra.mxu1 %v1809_v24  ;;  %3737 = vmatprep.mubr.msk.bf16.mxu1 %vm4978_vm1, %v4133_v15 }
0x1136   :  { %3741 = vmatprep.subr.bf16.mxu1 %v4133_v15 }
0x11ff   :  { %v4647_v25 = vpop.f32.mrb[36].mxu1 }
0x1200   :  { %v3727_v27 = vpop.f32.mrb[37].mxu1 }
0x1201   :  { %v1731_v28 = vpop.f32.mrb[38].mxu1 }
0x1202   :  { %v3728_v29 = vpop.f32.mrb[39].mxu1 }
0x1207   :  { %v1786_v31 = vpop.f32.mrb[40].mxu1 }
0x1208   :  { %v1787_v33 = vadd.f32 %v1786_v31, %v1744_v30  ;;  %v3733_v34 = vpop.f32.mrb[41].mxu1  ;;  %v1237_v31 = vsel %vm665_vm2, %v4552_v55, 0.0 }
0x1209   :  { %v1789_v35 = vpop.f32.mrb[42].mxu1  ;;  %v1683_v34 = vsel %vm665_vm2, %v4633_v19, 0.0 }
0x120a   :  { %v3734_v36 = vpop.f32.mrb[43].mxu1  ;;  %v1792_v37 = vsel %vm665_vm2, %v1787_v33, -inf }
0x120b   :  { %1793 = vmax.xlane.f32.xlu0 %v1792_v37 }
0x1298   :  { %v1794_v40 = vpop.xlane.xlu0 %1793 }
0x1299   :  { %v1795_v41 = vsub.f32 %v1787_v33, %v1794_v40  ;;  %v1352_v33 = vsel %vm665_vm2, %v4569_v18, 0.0 }
0x129b   :  { %v1796_v42 = vmul.f32 1.442695, %v1795_v41 }
0x129d   :  { %4018 = vpow2.f32 %v1796_v42 }
0x12a7   :  { %v4650_v43 = vpop.eup %4018 }
0x12a8   :  { %v1802_v47 = vpack.c.bf16 %v4650_v43, %v4650_v43  ;;  %v1798_v35 = vsel %vm665_vm2, %v4650_v43, 0.0 }
0x12aa   :  { %3738 = vmatmul.mubr.msk.bf16.vlgmr.msra.gmra.mrb[44].mxu1 %vm665_vm2, %v1802_v47 }
0x12ab   :  { %3742 = vmatpush3.bf16.msra.mxu1 %v3966_v45  ;;  %3745 = vmatprep.mubr.msk.bf16.mxu1 %vm4978_vm1, %v4133_v15 }
0x12ac   :  { %3743 = vmatprep.subr.bf16.mxu1 %v4133_v15 }
0x12af   :  { %3744 = vmatpush3.bf16.msra.mxu1 %v3967_v49 }
0x12b0   :  { %3749 = vmatprep.subr.bf16.mxu1 %v4133_v15 }
0x12b2   :  { %3746 = vmatmul.mubr.msk.bf16.vlgmr.msra.gmra.mrb[48].mxu1 %vm4979_vm0, %v4387_v39 }
0x12b3   :  { %3750 = vmatpush3.bf16.msra.mxu1 %v3968_v51  ;;  %3753 = vmatprep.mubr.msk.bf16.mxu1 %vm4978_vm1, %v4133_v15 }
0x12b4   :  { %3751 = vmatprep.subr.bf16.mxu1 %v4133_v15 }
0x12b7   :  { %3752 = vmatpush3.bf16.msra.mxu1 %v3969_v53 }
0x12b8   :  { %3757 = vmatprep.subr.bf16.mxu1 %v4133_v15 }
0x12ba   :  { %3754 = vmatmul.mubr.msk.bf16.vlgmr.msra.gmra.mrb[52].mxu1 %vm4979_vm0, %v4387_v39 }
0x12bb   :  { %3758 = vmatpush3.bf16.msra.mxu1 %v3970_v57  ;;  %3761 = vmatprep.mubr.msk.bf16.mxu1 %vm4978_vm1, %v4133_v15 }
0x12bc   :  { %3759 = vmatprep.subr.bf16.mxu1 %v4133_v15 }
0x12bf   :  { %3760 = vmatpush3.bf16.msra.mxu1 %v3971_v59 }
0x12c0   :  { %3765 = vmatprep.subr.bf16.mxu1 %v4133_v15 }
0x12c2   :  { %3762 = vmatmul.mubr.msk.bf16.vlgmr.msra.gmra.mrb[56].mxu1 %vm4979_vm0, %v4387_v39 }
0x12c3   :  { %3781 = vmatprep.mubr.msk.bf16.mxu1 %vm4978_vm1, %v4133_v15 }
0x12c8   :  { %3766 = vmatpush3.bf16.xpose.msra.mxu1 %v4410_v44 }
0x12c9   :  { %3767 = vmatprep.subr.bf16.mxu1 %v4133_v15 }
0x12d0   :  { %3768 = vmatpush3.bf16.xpose.msra.mxu1 %v4416_v46 }
0x12d1   :  { %3769 = vmatprep.subr.bf16.mxu1 %v4133_v15 }
0x12d8   :  { %3770 = vmatpush3.bf16.xpose.msra.mxu1 %v4422_v48 }
0x12d9   :  { %3771 = vmatprep.subr.bf16.mxu1 %v4133_v15 }
0x12e0   :  { %3772 = vmatpush3.bf16.xpose.msra.mxu1 %v4428_v50 }
0x12e1   :  { %3773 = vmatprep.subr.bf16.mxu1 %v4133_v15 }
0x12e8   :  { %3774 = vmatpush3.bf16.xpose.msra.mxu1 %v4434_v52 }
0x12e9   :  { %3775 = vmatprep.subr.bf16.mxu1 %v4133_v15 }
0x12f0   :  { %3776 = vmatpush3.bf16.xpose.msra.mxu1 %v4440_v54 }
0x12f1   :  { %3777 = vmatprep.subr.bf16.mxu1 %v4133_v15 }
0x12f8   :  { %3778 = vmatpush3.bf16.xpose.msra.mxu1 %v4446_v56 }
0x12f9   :  { %3779 = vmatprep.subr.bf16.mxu1 %v4133_v15 }
0x1300   :  { %3780 = vmatpush3.bf16.xpose.msra.mxu1 %v4452_v58 }
0x1301   :  { %3845 = vmatprep.subr.bf16.mxu1 %v4133_v15 }
0x137d   :  { %v4697_v39 = vpop.f32.mrb[44].mxu1 }
0x137e   :  { %v3739_v44 = vpop.f32.mrb[45].mxu1 }
0x137f   :  { %v1848_v46 = vpop.f32.mrb[46].mxu1 }
0x1380   :  { %v3740_v48 = vpop.f32.mrb[47].mxu1 }
0x1385   :  { %v1903_v50 = vpop.f32.mrb[48].mxu1 }
0x1386   :  { %v3747_v52 = vpop.f32.mrb[49].mxu1 }
0x1387   :  { %v1906_v60 = vpop.f32.mrb[50].mxu1 }
0x1388   :  { %v4699_v62 = vpack.c.bf16 %v1906_v60, %v1903_v50  ;;  %v3748_v54 = vpop.f32.mrb[51].mxu1 }
0x138a   :  { %3782 = vmatmul.mubr.msk.bf16.vlgmr.msra.gmra.mrb[60].mxu1 %vm665_vm2, %v4699_v62  ;;  %v2185_v48 = vrot.slane %v4699_v62, 4 }
0x138b   :  { %3849 = vmatprep.mubr.msk.bf16.mxu1 %vm4978_vm1, %v4133_v15 }
0x138d   :  { %v1961_v56 = vpop.f32.mrb[52].mxu1 }
0x138e   :  { %v3755_v58 = vpop.f32.mrb[53].mxu1 }
0x138f   :  { %v1964_v63 = vpop.f32.mrb[54].mxu1 }
0x1390   :  { %v2027_v3 = vpack.c.bf16 %v1964_v63, %v1961_v56  ;;  %v3756_v4 = vpop.f32.mrb[55].mxu1 }
0x1392   :  { %v2081_v5 = vsel %vm665_vm2, %v2027_v3, 0  ;;  %v2187_v45 = vrot.slane %v2027_v3, 4 }
0x1393   :  { %3786 = vmatpush3.bf16.xpose.msra.mxu0 %v2081_v5 }
0x1394   :  { %3791 = vmatprep.subr.bf16.mxu0 %v4133_v15  ;;  %v2196_v43 = vsel %vm665_vm2, %v2187_v45, 0 }
0x1395   :  { %v2019_v7 = vpop.f32.mrb[56].mxu1 }
0x1396   :  { %v3763_v10 = vpop.f32.mrb[57].mxu1 }
0x1397   :  { %v2022_v11 = vpop.f32.mrb[58].mxu1 }
0x1398   :  { %v4707_v12 = vpack.c.bf16 %v2022_v11, %v2019_v7  ;;  %v3764_v13 = vpop.f32.mrb[59].mxu1 }
0x139a   :  { %v2138_v0 = vsel %vm798_vm3, %v4707_v12, 0  ;;  %3788 = vmatmul.mubr.msk.bf16.vlgmr.msra.gmra.mrb[56].mxu0 %vm665_vm2, %v4699_v62  ;;  %v2250_v44 = vrot.slane %v4707_v12, 4 }
0x139b   :  { %3792 = vmatpush3.bf16.msra.mxu0 %v2138_v0  ;;  %3793 = vmatprep.mubr.msk.bf16.mxu0 %vm4978_vm1, %v4133_v15 }
0x139c   :  { %3797 = vmatprep.subr.bf16.mxu0 %v4133_v15  ;;  %v2255_v52 = vsel %vm798_vm3, %v2250_v44, 0 }
0x145d   :  { %v2066_v14 = vpop.f32.mrb[60].mxu1 }
0x145e   :  { %2074 = vrot.lane.b32.xlu1 %v2066_v14, %s4135_s0  ;;  %v3783_v16 = vpop.f32.mrb[61].mxu1 }
0x145f   :  { %v2069_v1 = vpop.f32.mrb[62].mxu1 }
0x1460   :  { %2182 = vrot.lane.b32.xlu0 %v2069_v1, %s4135_s0  ;;  %v3784_v17 = vpop.f32.mrb[63].mxu1 }
0x1461   :  { %v3972_v17 = vld [vmem:[%s4210_s30] sm:$0xff]  }
0x146d   :  { %v2117_v20 = vpop.f32.mrb[56].mxu0 }
0x146e   :  { %v3789_v21 = vpop.f32.mrb[57].mxu0 }
0x146f   :  { %v2120_v22 = vpop.f32.mrb[58].mxu0 }
0x1470   :  { %v3790_v23 = vpop.f32.mrb[59].mxu0  ;;  %v3973_v22 = vld [vmem:[%s4210_s30 + $0x8] sm:$0xff]   ;;  %s5004_s30 = sld [smem:[#allocation9_spill]] }
0x14d0   :  { %v2075_v24 = vpop.permute.xlu1 %2074 }
0x14d1   :  { %2077 = vrot.lane.b32.xlu1 %v2075_v24, %s4136_s5 }
0x14d2   :  { %v2183_v27 = vpop.permute.xlu0 %2182 }
0x14d3   :  { %2189 = vrot.lane.b32.xlu0 %v2183_v27, %s4136_s5 }
0x1543   :  { %v2078_v28 = vpop.permute.xlu1 %2077 }
0x1544   :  { %v2118_v29 = vadd.f32 %v2117_v20, %v2078_v28 }
0x1545   :  { %v2190_v3 = vpop.permute.xlu0 %2189 }
0x1546   :  { %v2123_v30 = vsel %vm665_vm2, %v2118_v29, -inf }
0x1547   :  { %2124 = vmax.xlane.f32.xlu1 %v2123_v30 }
0x154b   :  { %1238 = vadd.xlane.f32.xlu1 %v1237_v31 }
0x154f   :  { %1353 = vadd.xlane.f32.xlu1 %v1352_v33 }
0x1553   :  { %1684 = vadd.xlane.f32.xlu1 %v1683_v34 }
0x1557   :  { %1799 = vadd.xlane.f32.xlu1 %v1798_v35 }
0x15d4   :  { %v2125_v36 = vpop.xlane.xlu1 %2124 }
0x15d5   :  { %v2126_v37 = vsub.f32 %v2118_v29, %v2125_v36 }
0x15d7   :  { %v2127_v40 = vmul.f32 1.442695, %v2126_v37 }
0x15d8   :  { %v1239_v41 = vpop.xlane.xlu1 %1238 }
0x15d9   :  { %4020 = vpow2.f32 %v2127_v40 }
0x15da   :  { %4022 = vrcp.f32 %v1239_v41 }
0x15dc   :  { %v1354_v55 = vpop.xlane.xlu1 %1353 }
0x15dd   :  { %4024 = vrcp.f32 %v1354_v55 }
0x15e0   :  { %v1685_v42 = vpop.xlane.xlu1 %1684 }
0x15e1   :  { %4026 = vrcp.f32 %v1685_v42 }
0x15e3   :  { %v4021_v18 = vpop.eup %4020 }
0x15e4   :  { %v1800_v47 = vpop.xlane.xlu1 %1799  ;;  %v2129_v19 = vsel %vm665_vm2, %v4021_v18, 0.0  ;;  %v2133_v49 = vpack.c.bf16 %v4021_v18, %v4021_v18  ;;  %v4023_v51 = vpop.eup %4022 }
0x15e5   :  { %4028 = vrcp.f32 %v1800_v47  ;;  %2130 = vadd.xlane.f32.xlu1 %v2129_v19  ;;  %v1288_v57 = vmul.f32 %v4023_v51, %v4566_v2 }
0x15e6   :  { %3794 = vmatmul.mubr.msk.bf16.vlgmr.msra.gmra.mrb[60].mxu0 %vm665_vm2, %v2133_v49 }
0x15e7   :  { %v4025_v53 = vpop.eup %4024  ;;  %3798 = vmatpush3.bf16.xpose.msra.mxu0 %v2196_v43  ;;  %3799 = vmatprep.mubr.msk.bf16.mxu0 %vm4978_vm1, %v4133_v15 }
0x15e8   :  { %3803 = vmatprep.subr.bf16.mxu0 %v4133_v15  ;;  %v1405_v59 = vmul.f32 %v4025_v53, %v4616_v26 }
0x15ea   :  { %v3915_v46 = vpack.i.bf16 %v1405_v59, %v1288_v57 }
0x15eb   :  { %v4027_v50 = vpop.eup %4026 }
0x15ec   :  { %v1734_v54 = vmul.f32 %v4027_v50, %v4647_v25  ;;  %v790_v25 = vsel %vm665_vm2, %v4471_v32, 0.0  ;;  %v906_v32 = vsel %vm665_vm2, %v4488_v61, 0.0  ;;  %v3326_v50 = vld [vmem:[%s4996_s21] ss:$0 sm:$0xff] }
0x15ee   :  { %3800 = vmatmul.mubr.msk.bf16.vlgmr.msra.gmra.mrb[64].mxu0 %vm665_vm2, %v2185_v48 }
0x15ef   :  { %v4029_v60 = vpop.eup %4028  ;;  %3804 = vmatpush3.bf16.msra.mxu0 %v2255_v52  ;;  %3805 = vmatprep.mubr.msk.bf16.mxu0 %vm4978_vm1, %v4133_v15 }
0x15f0   :  { %v1851_v2 = vmul.f32 %v4029_v60, %v4697_v39  ;;  %3809 = vmatprep.subr.bf16.mxu0 %v4133_v15 }
0x15f2   :  { %v3920_v26 = vpack.i.bf16 %v1851_v2, %v1734_v54 }
0x1672   :  { %v2131_v20 = vpop.xlane.xlu1 %2130 }
0x16b9   :  { %v2174_v56 = vpop.f32.mrb[60].mxu0 }
0x16ba   :  { %v3795_v58 = vpop.f32.mrb[61].mxu0 }
0x16bb   :  { %v2177_v62 = vpop.f32.mrb[62].mxu0 }
0x16bc   :  { %v3796_v63 = vpop.f32.mrb[63].mxu0 }
0x16c1   :  { %v2232_v4 = vpop.f32.mrb[64].mxu0 }
0x16c2   :  { %v2233_v5 = vadd.f32 %v2232_v4, %v2190_v3  ;;  %v3801_v7 = vpop.f32.mrb[65].mxu0 }
0x16c3   :  { %v2235_v10 = vpop.f32.mrb[66].mxu0 }
0x16c4   :  { %v3802_v11 = vpop.f32.mrb[67].mxu0  ;;  %v2238_v12 = vsel %vm665_vm2, %v2233_v5, -inf }
0x16c5   :  { %2239 = vmax.xlane.f32.xlu0 %v2238_v12 }
0x16c9   :  { %791 = vadd.xlane.f32.xlu0 %v790_v25 }
0x16df   :  { %3916 = vrot.lane.b32.xlu0 %v3915_v46, %s4137_s9 }
0x1752   :  { %v2240_v39 = vpop.xlane.xlu0 %2239 }
0x1753   :  { %v2241_v13 = vsub.f32 %v2233_v5, %v2240_v39  ;;  %v3974_v39 = vld [vmem:[%s4997_s25] sm:$0xff]  }
0x1755   :  { %v2242_v0 = vmul.f32 1.442695, %v2241_v13  ;;  %v3975_v13 = vld [vmem:[%s4997_s25 + $0x8] sm:$0xff]  }
0x1756   :  { %v792_v35 = vpop.xlane.xlu0 %791 }
0x1757   :  { %4030 = vpow2.f32 %v2242_v0 }
0x1758   :  { %4032 = vrcp.f32 %v2131_v20 }
0x175a   :  { %v3917_v40 = vpop.permute.xlu0 %3916 }
0x175b   :  { %v3919_v45 = vunpack.i.h.bf16 %v3917_v40  ;;  %v3918_v47 = vunpack.i.l.bf16 %v3917_v40  ;;  %v3981_v40 = vld [vmem:[%s5001_s14 + $0x18] sm:$0xff]  }
0x1761   :  { %v4031_v14 = vpop.eup %4030 }
0x1762   :  { %v2244_v16 = vsel %vm665_vm2, %v4031_v14, 0.0  ;;  %v2248_v1 = vpack.c.bf16 %v4031_v14, %v4031_v14  ;;  %v4033_v23 = vpop.eup %4032 }
0x1763   :  { %2245 = vadd.xlane.f32.xlu1 %v2244_v16  ;;  %v2180_v28 = vmul.f32 %v4033_v23, %v2174_v56 }
0x1764   :  { %3806 = vmatmul.mubr.msk.bf16.vlgmr.msra.gmra.mrb[68].mxu0 %vm665_vm2, %v2248_v1 }
0x1765   :  { %3813 = vmatprep.mubr.msk.bf16.mxu0 %vm4978_vm1, %v4133_v15  ;;  %3810 = vmatpush3.bf16.msra.mxu0 %v3972_v17 }
0x1766   :  { %3811 = vmatprep.subr.bf16.mxu0 %v4133_v15 }
0x1767   :  { %907 = vadd.xlane.f32.xlu1 %v906_v32 }
0x1769   :  { %3812 = vmatpush3.bf16.msra.mxu0 %v3973_v22  ;;  %v3327_v22 = vld [vmem:[%s4998_s29] ss:$0 sm:$0xff] }
0x176a   :  { %3817 = vmatprep.subr.bf16.mxu0 %v4133_v15 }
0x1778   :  { %3921 = vrot.lane.b32.xlu1 %v3920_v26, %s4138_s13 }
0x17f0   :  { %v2246_v21 = vpop.xlane.xlu1 %2245 }
0x17f1   :  { %4034 = vrcp.f32 %v2246_v21 }
0x17f4   :  { %v908_v34 = vpop.xlane.xlu1 %907 }
0x17f5   :  { %4036 = vrcp.f32 %v908_v34  ;;  %v3977_v34 = vld [vmem:[%s5000_s8 + $0x8] sm:$0xff]  }
0x17f6   :  { %4038 = vrcp.f32 %v792_v35  ;;  %v3978_v35 = vld [vmem:[%s5001_s14] sm:$0xff]  }
0x17f8   :  { %v3922_v55 = vpop.permute.xlu1 %3921 }
0x17f9   :  { %v3923_v18 = vunpack.i.l.bf16 %v3922_v55  ;;  %v3924_v49 = vunpack.i.h.bf16 %v3922_v55 }
0x17fb   :  { %v4035_v24 = vpop.eup %4034 }
0x17ff   :  { %v4037_v36 = vpop.eup %4036 }
0x1800   :  { %v4039_v37 = vpop.eup %4038  ;;  %v959_v41 = vmul.f32 %v4037_v36, %v4535_v9  ;;  %v3979_v36 = vld [vmem:[%s5001_s14 + $0x8] sm:$0xff]  }
0x1801   :  { %v842_v42 = vmul.f32 %v4039_v37, %v4485_v38  ;;  %v3980_v37 = vld [vmem:[%s5001_s14 + $0x10] sm:$0xff]  }
0x1802   :  { %v2327_v19 = vsel %vm665_vm2, %v959_v41, %v3919_v45 }
0x1803   :  { %v2310_v43 = vsel %vm665_vm2, %v842_v42, %v3918_v47  ;;  %v2328_v44 = vsel %vm2311_vm4, %v2327_v19, %v3924_v49 }
0x1804   :  { %v2312_v59 = vsel %vm2311_vm4, %v2310_v43, %v3923_v18  ;;  %v3333_v18 = vld [vmem:[%s5002_s19] ss:$0 sm:$0xff] }
0x1837   :  { %v2291_v27 = vpop.f32.mrb[68].mxu0 }
0x1838   :  { %v2297_v61 = vmul.f32 %v4035_v24, %v2291_v27  ;;  %v3807_v29 = vpop.f32.mrb[69].mxu0 }
0x1839   :  { %v2294_v30 = vpop.f32.mrb[70].mxu0 }
0x183a   :  { %v3925_v31 = vpack.i.bf16 %v2297_v61, %v2180_v28  ;;  %v3808_v33 = vpop.f32.mrb[71].mxu0  ;;  %v3328_v28 = vld [vmem:[%s4999_s3] ss:$0 sm:$0xff] }
0x183c   :  { %3926 = vrot.lane.b32.xlu1 %v3925_v31, %s4139_s17  ;;  %v3976_v31 = vld [vmem:[%s5000_s8] sm:$0xff]  }
0x18ae   :  { %v3927_v51 = vpop.permute.xlu1 %3926 }
0x18af   :  { %v3929_v53 = vunpack.i.h.bf16 %v3927_v51  ;;  %v3928_v57 = vunpack.i.l.bf16 %v3927_v51 }
0x18b1   :  { %v2329_v9 = vsel %vm2313_vm5, %v2328_v44, %v3929_v53  ;;  %v2314_v46 = vsel %vm2313_vm5, %v2312_v59, %v3928_v57  ;;  %v2593_v44 = vlaneseq }
0x18b2   :  { %v2334_v48 = vpack.c.bf16 %v2329_v9, %v2314_v46 }
0x18b4   :  { %3814 = vmatmul.mubr.msk.bf16.vlgmr.msra.gmra.mrb[72].mxu0 %vm4979_vm0, %v2334_v48  ;;  %v4806_v48 = vshrl.u32 %v2593_v44, 7 }
0x18b5   :  { %3821 = vmatprep.mubr.msk.bf16.mxu0 %vm4978_vm1, %v4133_v15  ;;  %3818 = vmatpush3.bf16.msra.mxu0 %v3974_v39 }
0x18b6   :  { %3819 = vmatprep.subr.bf16.mxu0 %v4133_v15  ;;  %vm2622_vm6 = vcmp.lt.s32.totalorder %v4806_v48, 3  ;;  %vm2643_vm9 = vcmp.lt.s32.totalorder %v4806_v48, 2  ;;  %vm2664_vm10 = vcmp.lt.s32.totalorder %v4806_v48, 1  ;;  %vm2693_vm14 = vcmp.lt.s32.totalorder %v4806_v48, 7 }
0x18b9   :  { %3820 = vmatpush3.bf16.msra.mxu0 %v3975_v13 }
0x18ba   :  { %3825 = vmatprep.subr.bf16.mxu0 %v4133_v15 }
0x1987   :  { %v2384_v38 = vpop.f32.mrb[72].mxu0 }
0x1988   :  { %v2391_v52 = vadd.f32 %v2384_v38, %v4367_v6  ;;  %v3815_v60 = vpop.f32.mrb[73].mxu0 }
0x1989   :  { %v2387_v54 = vpop.f32.mrb[74].mxu0  ;;  %v2685_v60 = vsub.s32 3, %v4806_v48 }
0x198a   :  { %v4769_v2 = vadd.f32 %v3326_v50, %v2391_v52  ;;  %v2392_v26 = vadd.f32 %v2387_v54, %v4370_v8  ;;  %v3816_v56 = vpop.f32.mrb[75].mxu0  ;;  %v2595_v52 = vadd.s32 8, %v4806_v48  ;;  %v4811_v54 = vld [vmem:[%s5003_s24] sm:$0x7f] }
0x198c   :  { %v4772_v58 = vadd.f32 %v3326_v50, %v2392_v26  ;;  %v2402_v62 = vsel %vm4979_vm0, %v4769_v2, 0.0  ;;  %v4814_v26 = vand.u32 7, %v4806_v48  ;;  %v4816_v56 = vand.u32 7, %v2595_v52 }
0x198d   :  { %2403 = vadd.xlane.f32.xlu1 %v2402_v62  ;;  %v3329_v62 = vld [vmem:[%s5004_s30] ss:$0 sm:$0xff] }
0x198e   :  { %v2405_v63 = vsel %vm4979_vm0, %v4772_v58, 0.0  ;;  %vm2625_vm7 = vcmp.ge.s32.totalorder %v4814_v26, 3  ;;  %vm2626_vm8 = vcmp.ge.s32.totalorder %v4816_v56, 3  ;;  %vm2646_vm11 = vcmp.ge.s32.totalorder %v4814_v26, 2 }
0x198f   :  { %2406 = vadd.xlane.f32.xlu0 %v2405_v63  ;;  %v2635_v63 = vsub.s32 0, %v4806_v48  ;;  %vm2647_vm12 = vcmp.ge.s32.totalorder %v4816_v56, 2  ;;  %vm2667_vm13 = vcmp.ge.s32.totalorder %v4814_v26, 1  ;;  %vm2668_vm15 = vcmp.ge.s32.totalorder %v4816_v56, 1 }
0x1990   :  { %vm2696_vm2 = vcmp.lt.s32.totalorder %v4814_v26, 7  ;;  %vm2697_vm3 = vcmp.lt.s32.totalorder %v4816_v56, 7  ;;  %vm2738_vm4 = vcmp.lt.s32.totalorder %v4814_v26, 5  ;;  %vm2739_vm5 = vcmp.lt.s32.totalorder %v4816_v56, 5 }
0x1a1a   :  { %v2404_v6 = vpop.xlane.xlu1 %2403 }
0x1a1b   :  { %v2408_v3 = vmul.f32 0.03125, %v2404_v6  ;;  %v2656_v6 = vsub.s32 1, %v4806_v48 }
0x1a1c   :  { %v2407_v4 = vpop.xlane.xlu0 %2406 }
0x1a1d   :  { %v2410_v5 = vsub.f32 %v4769_v2, %v2408_v3  ;;  %v2409_v7 = vmul.f32 0.03125, %v2407_v4  ;;  %v4823_v3 = vrot.slane %v4811_v54, %v2685_v60  ;;  %v2677_v4 = vsub.s32 2, %v4806_v48 }
0x1a1f   :  { %v2411_v8 = vsub.f32 %v4772_v58, %v2409_v7  ;;  %v2412_v10 = vmul.f32 %v2410_v5, %v2410_v5  ;;  %v2706_v7 = vsub.s32 4, %v4806_v48 }
0x1a21   :  { %v2414_v11 = vsel %vm4979_vm0, %v2412_v10, 0.0  ;;  %v2413_v12 = vmul.f32 %v2411_v8, %v2411_v8 }
0x1a22   :  { %2415 = vadd.xlane.f32.xlu0 %v2414_v11  ;;  %v2636_v11 = vrot.slane %v4811_v54, %v2635_v63 }
0x1a23   :  { %v2417_v25 = vsel %vm4979_vm0, %v2413_v12, 0.0  ;;  %v2657_v12 = vrot.slane %v4811_v54, %v2656_v6 }
0x1a26   :  { %2418 = vadd.xlane.f32.xlu0 %v2417_v25 }
0x1aaf   :  { %v2416_v0 = vpop.xlane.xlu0 %2415 }
0x1ab0   :  { %v2420_v14 = vmul.f32 0.03125, %v2416_v0  ;;  %v2678_v0 = vrot.slane %v4811_v54, %v2677_v4 }
0x1ab2   :  { %v2422_v16 = vadd.f32 1e-05, %v2420_v14 }
0x1ab3   :  { %v2419_v1 = vpop.xlane.xlu0 %2418 }
0x1ab4   :  { %4040 = vrsqrt.f32 %v2422_v16  ;;  %v2421_v32 = vmul.f32 0.03125, %v2419_v1  ;;  %v2707_v16 = vrot.slane %v4811_v54, %v2706_v7 }
0x1ab6   :  { %v2423_v17 = vadd.f32 1e-05, %v2421_v32 }
0x1ab8   :  { %4042 = vrsqrt.f32 %v2423_v17 }
0x1abe   :  { %v4041_v20 = vpop.eup %4040 }
0x1abf   :  { %v2426_v21 = vmul.f32 %v4041_v20, %v2410_v5 }
0x1ac1   :  { %v2435_v24 = vmul.f32 %v3327_v22, %v2426_v21  ;;  %v2748_v21 = vsub.s32 6, %v4806_v48 }
0x1ac2   :  { %v4043_v23 = vpop.eup %4042 }
0x1ac3   :  { %v2427_v27 = vmul.f32 %v4043_v23, %v2411_v8  ;;  %v2444_v29 = vadd.f32 %v3328_v28, %v2435_v24  ;;  %v2727_v8 = vsub.s32 5, %v4806_v48 }
0x1ac5   :  { %v2436_v61 = vmul.f32 %v3327_v22, %v2427_v27  ;;  %v4847_v1 = vrot.slane %v4811_v54, %v2727_v8 }
0x1ac7   :  { %v2445_v30 = vadd.f32 %v3328_v28, %v2436_v61 }
0x1ac9   :  { %v2446_v33 = vpack.c.bf16 %v2445_v30, %v2444_v29 }
0x1acb   :  { %3822 = vmatmul.mubr.msk.bf16.vlgmr.msra.gmra.mrb[76].mxu0 %vm4979_vm0, %v2446_v33 }
0x1acc   :  { %3826 = vmatpush3.bf16.msra.mxu0 %v3976_v31  ;;  %3829 = vmatprep.mubr.msk.bf16.mxu0 %vm4978_vm1, %v4133_v15 }
0x1acd   :  { %3827 = vmatprep.subr.bf16.mxu0 %v4133_v15 }
0x1ad0   :  { %3828 = vmatpush3.bf16.msra.mxu0 %v3977_v34 }
0x1ad1   :  { %3833 = vmatprep.subr.bf16.mxu0 %v4133_v15 }
0x1ad3   :  { %3830 = vmatmul.mubr.msk.bf16.vlgmr.msra.gmra.mrb[80].mxu0 %vm4979_vm0, %v2446_v33  ;;  %vm2735_vm0 = vcmp.lt.s32.totalorder %v4806_v48, 5 }
0x1ad4   :  { %3841 = vmatprep.mubr.msk.bf16.mxu0 %vm4978_vm1, %v4133_v15  ;;  %3834 = vmatpush3.bf16.msra.mxu0 %v3978_v35  ;;  %vm2718_vm1 = vcmp.lt.s32.totalorder %v4816_v56, 6 }
0x1ad5   :  { %3835 = vmatprep.subr.bf16.mxu0 %v4133_v15 }
0x1ad8   :  { %3836 = vmatpush3.bf16.msra.mxu0 %v3979_v36 }
0x1ad9   :  { %3837 = vmatprep.subr.bf16.mxu0 %v4133_v15 }
0x1adc   :  { %3838 = vmatpush3.bf16.msra.mxu0 %v3980_v37 }
0x1add   :  { %3839 = vmatprep.subr.bf16.mxu0 %v4133_v15 }
0x1ae0   :  { %3840 = vmatpush3.bf16.msra.mxu0 %v3981_v40 }
0x1b9e   :  { %v2507_v41 = vpop.f32.mrb[76].mxu0 }
0x1b9f   :  { %v3823_v55 = vpop.f32.mrb[77].mxu0  ;;  %v2508_v5 = vadd.f32 %v3329_v62, %v2507_v41 }
0x1ba0   :  { %v2510_v42 = vpop.f32.mrb[78].mxu0 }
0x1ba1   :  { %v3824_v45 = vpop.f32.mrb[79].mxu0  ;;  %v2511_v25 = vadd.f32 %v3329_v62, %v2510_v42 }
0x1ba6   :  { %v2571_v47 = vpop.f32.mrb[80].mxu0 }
0x1ba7   :  { %v2572_v19 = vadd.f32 %v3333_v18, %v2571_v47  ;;  %v3831_v49 = vpop.f32.mrb[81].mxu0 }
0x1ba8   :  { %v2574_v51 = vpop.f32.mrb[82].mxu0 }
0x1ba9   :  { %v3337_v43 = vmul.f32 -1.442695, %v2572_v19  ;;  %v2575_v53 = vadd.f32 %v3333_v18, %v2574_v51  ;;  %v3832_v57 = vpop.f32.mrb[83].mxu0 }
0x1bab   :  { %4044 = vpow2.f32 %v3337_v43  ;;  %v3338_v59 = vmul.f32 -1.442695, %v2575_v53 }
0x1bad   :  { %4046 = vpow2.f32 %v3338_v59 }
0x1bb5   :  { %v4045_v9 = vpop.eup %4044 }
0x1bb6   :  { %v2584_v46 = vadd.f32 1.0, %v4045_v9 }
0x1bb7   :  { %v4047_v38 = vpop.eup %4046 }
0x1bb8   :  { %4048 = vrcp.f32 %v2584_v46  ;;  %v2585_v50 = vadd.f32 1.0, %v4047_v38  ;;  %v2749_v38 = vrot.slane %v4811_v54, %v2748_v21 }
0x1bba   :  { %4050 = vrcp.f32 %v2585_v50 }
0x1bc2   :  { %v4049_v10 = vpop.eup %4048 }
0x1bc3   :  { %v4836_v39 = vmul.f32 %v4049_v10, %v2508_v5 }
0x1bc4   :  { %v4051_v13 = vpop.eup %4050 }
0x1bc5   :  { %v2591_v14 = vmul.f32 %v4051_v13, %v2511_v25  ;;  %v2620_v32 = vrot.slane %v4836_v39, 5  ;;  %v2641_v17 = vrot.slane %v4836_v39, 6  ;;  %v2662_v20 = vrot.slane %v4836_v39, 7 }
0x1bc6   :  { %v2691_v24 = vrot.slane %v4836_v39, 1  ;;  %v2712_v27 = vrot.slane %v4836_v39, 2  ;;  %v2733_v46 = vrot.slane %v4836_v39, 3  ;;  %v2687_v4 = vmul.f32 %v4823_v3, %v4836_v39 }
0x1bc7   :  { %v2621_v22 = vrot.slane %v2591_v14, 5  ;;  %v2642_v23 = vrot.slane %v2591_v14, 6  ;;  %v2663_v28 = vrot.slane %v2591_v14, 7  ;;  %v2692_v61 = vrot.slane %v2591_v14, 1 }
0x1bc8   :  { %v2713_v29 = vrot.slane %v2591_v14, 2  ;;  %v2734_v30 = vrot.slane %v2591_v14, 3  ;;  %v2688_v5 = vmul.f32 %v4823_v3, %v2591_v14 }
0x1bc9   :  { %v2623_v31 = vsel %vm2622_vm6, %v2620_v32, %v2621_v22  ;;  %v2624_v33 = vsel %vm2622_vm6, %v2621_v22, %v2620_v32  ;;  %v2644_v34 = vsel %vm2643_vm9, %v2641_v17, %v2642_v23  ;;  %v2645_v35 = vsel %vm2643_vm9, %v2642_v23, %v2641_v17  ;;  %v3339_v23 = vld [vmem:[%s5008_s12] ss:$0 sm:$0xff] }
0x1bca   :  { %v2631_v36 = vsel %vm2625_vm7, %v2624_v33, 0.0  ;;  %v2632_v37 = vsel %vm2626_vm8, %v2623_v31, 0.0  ;;  %v2652_v40 = vsel %vm2646_vm11, %v2645_v35, 0.0  ;;  %v2653_v41 = vsel %vm2647_vm12, %v2644_v34, 0.0 }
0x1bcb   :  { %v2637_v55 = vmul.f32 %v2636_v11, %v2631_v36  ;;  %v2638_v42 = vmul.f32 %v2636_v11, %v2632_v37  ;;  %v2658_v45 = vmul.f32 %v2657_v12, %v2652_v40  ;;  %v2659_v18 = vmul.f32 %v2657_v12, %v2653_v41  ;;  %v3347_v40 = vld [vmem:[%s5009_s7] ss:$0 sm:$0xff] }
0x1bcc   :  { %v2665_v47 = vsel %vm2664_vm10, %v2662_v20, %v2663_v28  ;;  %v2666_v19 = vsel %vm2664_vm10, %v2663_v28, %v2662_v20  ;;  %v2694_v49 = vsel %vm2693_vm14, %v2691_v24, %v2692_v61  ;;  %v2695_v51 = vsel %vm2693_vm14, %v2692_v61, %v2691_v24 }
0x1bcd   :  { %v2660_v43 = vadd.f32 %v2658_v45, %v2637_v55  ;;  %v2661_v53 = vadd.f32 %v2659_v18, %v2638_v42  ;;  %v2673_v57 = vsel %vm2667_vm13, %v2666_v19, 0.0  ;;  %v2674_v59 = vsel %vm2668_vm15, %v2665_v47, 0.0 }
0x1bce   :  { %v2679_v44 = vmul.f32 %v2678_v0, %v2673_v57  ;;  %v2680_v9 = vmul.f32 %v2678_v0, %v2674_v59  ;;  %v2702_v50 = vsel %vm2696_vm2, %v2694_v49, 0.0  ;;  %v2703_v52 = vsel %vm2697_vm3, %v2695_v51, 0.0 }
0x1bcf   :  { %vm5005_vm6 = vcmp.lt.s32.totalorder %v4806_v48, 6  ;;  %vm5007_vm8 = vcmp.lt.s32.totalorder %v4814_v26, 6  ;;  %v2736_v8 = vsel %vm2735_vm0, %v2733_v46, %v2734_v30  ;;  %v2737_v10 = vsel %vm2735_vm0, %v2734_v30, %v2733_v46 }
0x1bd0   :  { %v2715_v60 = vsel %vm5005_vm6, %v2712_v27, %v2713_v29  ;;  %vm5006_vm7 = vmmov %vm5005_vm6  ;;  %v2681_v63 = vadd.f32 %v2679_v44, %v2660_v43  ;;  %v2682_v6 = vadd.f32 %v2680_v9, %v2661_v53  ;;  %v2708_v25 = vmul.f32 %v2707_v16, %v2702_v50  ;;  %v3982_v50 = vld [vmem:[%s5011_s10] sm:$0xff]  }
0x1bd1   :  { %v2716_v62 = vsel %vm5006_vm7, %v2713_v29, %v2712_v27  ;;  %v2723_v54 = vsel %vm5007_vm8, %v2715_v60, 0.0  ;;  %v2709_v13 = vmul.f32 %v2707_v16, %v2703_v52  ;;  %v2744_v3 = vsel %vm2738_vm4, %v2736_v8, 0.0  ;;  %3846 = vmatpush3.bf16.msra.mxu1 %v3982_v50  ;;  %v3983_v52 = vld [vmem:[%s5011_s10 + $0x8] sm:$0xff]  }
0x1bd2   :  { %v2724_v7 = vsel %vm2718_vm1, %v2716_v62, 0.0  ;;  %v2689_v11 = vadd.f32 %v2687_v4, %v2681_v63  ;;  %v2690_v12 = vadd.f32 %v2688_v5, %v2682_v6  ;;  %v2745_v39 = vsel %vm2739_vm5, %v2737_v10, 0.0  ;;  %3847 = vmatprep.subr.bf16.mxu1 %v4133_v15 }
0x1bd3   :  { %v2729_v32 = vmul.f32 %v4847_v1, %v2723_v54  ;;  %v2730_v17 = vmul.f32 %v4847_v1, %v2724_v7  ;;  %v2750_v21 = vmul.f32 %v2749_v38, %v2744_v3  ;;  %v2751_v22 = vmul.f32 %v2749_v38, %v2745_v39  ;;  %v3348_v7 = vld [vmem:[%s5015_s11] ss:$0 sm:$0xff] }
0x1bd4   :  { %v2710_v0 = vadd.f32 %v2708_v25, %v2689_v11  ;;  %v2711_v14 = vadd.f32 %v2709_v13, %v2690_v12  ;;  %vm2810_vm0 = vcmask 523264   ;;  %vm5010_vm1 = vcmask 261120   ;;  %v3349_v25 = vld [vmem:[%s5016_s15] ss:$0 sm:$0xff] }
0x1bd5   :  { %vm5012_vm9 = vmmov %vm5010_vm1  ;;  %3848 = vmatpush3.bf16.msra.mxu1 %v3983_v52  ;;  %vm5019_vm13 = vmmov 0  }
0x1bd6   :  { %v2731_v20 = vadd.f32 %v2729_v32, %v2710_v0  ;;  %v2732_v48 = vadd.f32 %v2730_v17, %v2711_v14  ;;  %vm5013_vm10 = vmmov %vm5010_vm1  ;;  %3853 = vmatprep.subr.bf16.mxu1 %v4133_v15  ;;  %v3984_v14 = vld [vmem:[%s5017_s16] sm:$0xff]   ;;  %v3985_v32 = vld [vmem:[%s5017_s16 + $0x8] sm:$0xff]  }
0x1bd7   :  { %vm5014_vm11 = vmmov %vm5010_vm1  ;;  %v3986_v17 = vld [vmem:[%s5017_s16 + $0x10] sm:$0xff]  }
0x1bd8   :  { %v2752_v24 = vadd.f32 %v2750_v21, %v2731_v20  ;;  %v2753_v27 = vadd.f32 %v2751_v22, %v2732_v48  ;;  %vm5018_vm12 = vmmov %vm5010_vm1  ;;  %v3987_v20 = vld [vmem:[%s5017_s16 + $0x18] sm:$0xff]   ;;  %v3988_v48 = vld [vmem:[%s5017_s16 + $0x20] sm:$0xff]  }
0x1bd9   :  { %v3989_v21 = vld [vmem:[%s5017_s16 + $0x28] sm:$0xff]   ;;  %v3990_v22 = vld [vmem:[%s5017_s16 + $0x30] sm:$0xff]   ;;  %vm5021_vm14 = vmmov %vm5010_vm1 }
0x1bda   :  { %v2761_v16 = vadd.f32 %v3339_v23, %v2752_v24  ;;  %v2762_v28 = vadd.f32 %v3339_v23, %v2753_v27  ;;  %v3991_v23 = vld [vmem:[%s5017_s16 + $0x38] sm:$0xff]   ;;  %v3350_v24 = vld [vmem:[%s5020_s18] ss:$0 sm:$0xff]  ;;  %vm5022_vm15 = vmmov %vm5010_vm1 }
0x1bdb   :  { %vm5023_vm2 = vmmov %vm5010_vm1 }
0x1bdc   :  { %v3340_v26 = vmul.f32 -1.442695, %v2761_v16  ;;  %v3341_v61 = vmul.f32 -1.442695, %v2762_v28  ;;  %vm5024_vm3 = vmmov %vm5010_vm1 }
0x1bdd   :  { %vm5025_vm4 = vmmov %vm5010_vm1 }
0x1bde   :  { %4052 = vpow2.f32 %v3340_v26  ;;  %vm5026_vm5 = vmmov %vm5010_vm1 }
0x1bdf   :  { %4054 = vpow2.f32 %v3341_v61 }
0x1be8   :  { %v4053_v56 = vpop.eup %4052 }
0x1be9   :  { %v4055_v29 = vpop.eup %4054  ;;  %v2769_v30 = vadd.f32 1.0, %v4053_v56 }
0x1bea   :  { %v2770_v31 = vadd.f32 1.0, %v4055_v29 }
0x1beb   :  { %4056 = vrcp.f32 %v2769_v30 }
0x1bec   :  { %4058 = vrcp.f32 %v2770_v31 }
0x1bf5   :  { %v4057_v1 = vpop.eup %4056 }
0x1bf6   :  { %v4059_v33 = vpop.eup %4058  ;;  %v2775_v34 = vmul.f32 %v4057_v1, %v2761_v16 }
0x1bf7   :  { %v2776_v35 = vmul.f32 %v4059_v33, %v2762_v28 }
0x1bf9   :  { %v2785_v36 = vpack.c.bf16 %v2776_v35, %v2775_v34 }
0x1bfb   :  { %3842 = vmatmul.mubr.msk.bf16.vlgmr.msra.gmra.mrb[84].mxu0 %vm2810_vm0, %v2785_v36 }
0x1cce   :  { %v2848_v37 = vpop.f32.mrb[84].mxu0 }
0x1ccf   :  { %v2855_v41 = vadd.f32 %v2848_v37, %v4769_v2  ;;  %v3843_v55 = vpop.f32.mrb[85].mxu0 }
0x1cd0   :  { %v2851_v42 = vpop.f32.mrb[86].mxu0 }
0x1cd1   :  { %v4918_v45 = vadd.f32 %v3347_v40, %v2855_v41  ;;  %v2856_v18 = vadd.f32 %v2851_v42, %v4772_v58  ;;  %v3844_v47 = vpop.f32.mrb[87].mxu0  ;;  %v3356_v41 = vld [vmem:[%s4300_s6] ss:$0 sm:$0xff]  ;;  %s4140_s6 = smov [#allocation2]  }
0x1cd2   :  { %s3160_s22 = sshll.u32 %s4140_s6, 4  ;;  %s3161_s22 = int_to_ptr.vmem [resolvable:$true] %s3160_s22 }
0x1cd3   :  { %v4921_v19 = vadd.f32 %v3347_v40, %v2856_v18  ;;  %v2866_v49 = vsel %vm5010_vm1, %v4918_v45, 0.0  ;;  %s4076_s23 = scalar_lea.vmem %s3161_s22, 256  ;;  %p4081_p1 = scmp.lt.s32.totalorder %s3161_s22, %s3161_s22 }
0x1cd4   :  { %2867 = vadd.xlane.f32.xlu1 %v2866_v49  ;;  %p4077_p0 = scmp.ne.s32.totalorder %s3161_s22, %s4076_s23  ;;  %p4082_p2 = scmp.lt.s32.totalorder %s4076_s23, %s4076_s23 }
0x1cd5   :  { %v2869_v51 = vsel %vm5012_vm9, %v4921_v19, 0.0 }
0x1cd6   :  { %2870 = vadd.xlane.f32.xlu0 %v2869_v51  ;;  %p4083_p3 = por %p4082_p2, %p4081_p1 }
0x1cd8   :  { %p4084_p4 = pnand %p4083_p3, %p4077_p0 }
0x1d61   :  { %v2868_v2 = vpop.xlane.xlu1 %2867 }
0x1d62   :  { %v2872_v43 = vmul.f32 0.03125, %v2868_v2 }
0x1d63   :  { %v2871_v53 = vpop.xlane.xlu0 %2870 }
0x1d64   :  { %v2874_v57 = vsub.f32 %v4918_v45, %v2872_v43  ;;  %v2873_v59 = vmul.f32 0.03125, %v2871_v53 }
0x1d66   :  { %v2875_v58 = vsub.f32 %v4921_v19, %v2873_v59  ;;  %v2876_v44 = vmul.f32 %v2874_v57, %v2874_v57 }
0x1d68   :  { %v2878_v9 = vsel %vm5013_vm10, %v2876_v44, 0.0  ;;  %v2877_v46 = vmul.f32 %v2875_v58, %v2875_v58 }
0x1d69   :  { %2879 = vadd.xlane.f32.xlu1 %v2878_v9 }
0x1d6a   :  { %v2881_v38 = vsel %vm5014_vm11, %v2877_v46, 0.0 }
0x1d6b   :  { %2882 = vadd.xlane.f32.xlu0 %v2881_v38 }
0x1df6   :  { %v2880_v60 = vpop.xlane.xlu1 %2879 }
0x1df7   :  { %v2884_v62 = vmul.f32 0.03125, %v2880_v60 }
0x1df8   :  { %v2883_v63 = vpop.xlane.xlu0 %2882 }
0x1df9   :  { %v2886_v6 = vadd.f32 1e-05, %v2884_v62  ;;  %v2885_v4 = vmul.f32 0.03125, %v2883_v63 }
0x1dfb   :  { %4060 = vrsqrt.f32 %v2886_v6  ;;  %v2887_v5 = vadd.f32 1e-05, %v2885_v4 }
0x1dfd   :  { %4062 = vrsqrt.f32 %v2887_v5 }
0x1e05   :  { %v4061_v54 = vpop.eup %4060 }
0x1e06   :  { %v2890_v8 = vmul.f32 %v4061_v54, %v2874_v57 }
0x1e07   :  { %v4063_v10 = vpop.eup %4062 }
0x1e08   :  { %v2899_v11 = vmul.f32 %v3348_v7, %v2890_v8  ;;  %v2891_v12 = vmul.f32 %v4063_v10, %v2875_v58  ;;  %v3365_v10 = vld [vmem:[%s4305_s20] ss:$0 sm:$0xff] }
0x1e0a   :  { %v2900_v13 = vmul.f32 %v3348_v7, %v2891_v12  ;;  %v2908_v3 = vadd.f32 %v3349_v25, %v2899_v11 }
0x1e0c   :  { %v2909_v39 = vadd.f32 %v3349_v25, %v2900_v13  ;;  %v3366_v25 = vld [vmem:[%s4310_s27] ss:$0 sm:$0xff] }
0x1e0e   :  { %v2914_v0 = vpack.c.bf16 %v2909_v39, %v2908_v3 }
0x1e10   :  { %3850 = vmatmul.mubr.msk.bf16.vlgmr.msra.gmra.mrb[64].mxu1 %vm5018_vm12, %v2914_v0 }
0x1e11   :  { %3869 = vmatprep.mubr.msk.bf16.mxu1 %vm5019_vm13, %v4133_v15  ;;  %3854 = vmatpush3.bf16.msra.mxu1 %v3984_v14 }
0x1e12   :  { %3855 = vmatprep.subr.bf16.mxu1 %v4133_v15 }
0x1e15   :  { %3856 = vmatpush3.bf16.msra.mxu1 %v3985_v32 }
0x1e16   :  { %3857 = vmatprep.subr.bf16.mxu1 %v4133_v15 }
0x1e19   :  { %3858 = vmatpush3.bf16.msra.mxu1 %v3986_v17 }
0x1e1a   :  { %3859 = vmatprep.subr.bf16.mxu1 %v4133_v15 }
0x1e1d   :  { %3860 = vmatpush3.bf16.msra.mxu1 %v3987_v20 }
0x1e1e   :  { %3861 = vmatprep.subr.bf16.mxu1 %v4133_v15 }
0x1e21   :  { %3862 = vmatpush3.bf16.msra.mxu1 %v3988_v48 }
0x1e22   :  { %3863 = vmatprep.subr.bf16.mxu1 %v4133_v15 }
0x1e25   :  { %3864 = vmatpush3.bf16.msra.mxu1 %v3989_v21 }
0x1e26   :  { %3865 = vmatprep.subr.bf16.mxu1 %v4133_v15 }
0x1e29   :  { %3866 = vmatpush3.bf16.msra.mxu1 %v3990_v22 }
0x1e2a   :  { %3867 = vmatprep.subr.bf16.mxu1 %v4133_v15 }
0x1e2d   :  { %3868 = vmatpush3.bf16.msra.mxu1 %v3991_v23 }
0x1ee3   :  { %v2971_v27 = vpop.f32.mrb[64].mxu1 }
0x1ee4   :  { %v2972_v16 = vadd.f32 %v3350_v24, %v2971_v27  ;;  %v3851_v28 = vpop.f32.mrb[65].mxu1 }
0x1ee5   :  { %v2974_v26 = vpop.f32.mrb[66].mxu1 }
0x1ee6   :  { %v3354_v61 = vmul.f32 -1.442695, %v2972_v16  ;;  %v2975_v56 = vadd.f32 %v3350_v24, %v2974_v26  ;;  %v3852_v29 = vpop.f32.mrb[67].mxu1 }
0x1ee8   :  { %4064 = vpow2.f32 %v3354_v61  ;;  %v3355_v30 = vmul.f32 -1.442695, %v2975_v56 }
0x1eea   :  { %4066 = vpow2.f32 %v3355_v30 }
0x1ef2   :  { %v4065_v31 = vpop.eup %4064 }
0x1ef3   :  { %v2984_v1 = vadd.f32 1.0, %v4065_v31 }
0x1ef4   :  { %v4067_v33 = vpop.eup %4066 }
0x1ef5   :  { %4068 = vrcp.f32 %v2984_v1  ;;  %v2985_v34 = vadd.f32 1.0, %v4067_v33 }
0x1ef7   :  { %4070 = vrcp.f32 %v2985_v34 }
0x1eff   :  { %v4069_v15 = vpop.eup %4068 }
0x1f00   :  { %v2990_v36 = vmul.f32 %v4069_v15, %v2972_v16 }
0x1f01   :  { %v4071_v35 = vpop.eup %4070 }
0x1f02   :  { %v2991_v37 = vmul.f32 %v4071_v35, %v2975_v56 }
0x1f04   :  { %v3008_v40 = vpack.c.bf16 %v2991_v37, %v2990_v36 }
0x1f06   :  { %3870 = vmatmul.mubr.bf16.vlgmr.msra.gmra.mrb[68].mxu1 %v3008_v40 }
0x1fd9   :  { %v3098_v55 = vpop.f32.mrb[68].mxu1 }
0x1fda   :  { %v3099_v42 = vadd.f32 %v3356_v41, %v3098_v55  ;;  %v3871_v18 = vpop.f32.mrb[69].mxu1 }
0x1fdb   :  { %v3101_v47 = vpop.f32.mrb[70].mxu1 }
0x1fdc   :  { %v3105_v49 = vmul.f32 0.5, %v3099_v42  ;;  %v3102_v51 = vadd.f32 %v3356_v41, %v3101_v47  ;;  %v3872_v2 = vpop.f32.mrb[71].mxu1 }
0x1fde   :  { %v3106_v43 = vmul.f32 0.5, %v3102_v51  ;;  %v3107_v53 = vadd.f32 %v3105_v49, %v4918_v45 }
0x1fe0   :  { %v3109_v57 = vsel %vm5021_vm14, %v3107_v53, 0.0  ;;  %v3108_v59 = vadd.f32 %v3106_v43, %v4921_v19 }
0x1fe1   :  { %3110 = vadd.xlane.f32.xlu1 %v3109_v57 }
0x1fe2   :  { %v3112_v58 = vsel %vm5022_vm15, %v3108_v59, 0.0 }
0x1fe3   :  { %3113 = vadd.xlane.f32.xlu0 %v3112_v58 }
0x206e   :  { %v3111_v44 = vpop.xlane.xlu1 %3110 }
0x206f   :  { %v3115_v9 = vmul.f32 0.03125, %v3111_v44 }
0x2070   :  { %v3114_v46 = vpop.xlane.xlu0 %3113 }
0x2071   :  { %v3117_v38 = vsub.f32 %v3107_v53, %v3115_v9  ;;  %v3116_v50 = vmul.f32 0.03125, %v3114_v46 }
0x2073   :  { %v3118_v52 = vsub.f32 %v3108_v59, %v3116_v50  ;;  %v3119_v60 = vmul.f32 %v3117_v38, %v3117_v38 }
0x2075   :  { %v3121_v62 = vsel %vm5023_vm2, %v3119_v60, 0.0  ;;  %v3120_v63 = vmul.f32 %v3118_v52, %v3118_v52 }
0x2076   :  { %3122 = vadd.xlane.f32.xlu1 %v3121_v62 }
0x2077   :  { %v3124_v45 = vsel %vm5024_vm3, %v3120_v63, 0.0 }
0x2078   :  { %3125 = vadd.xlane.f32.xlu0 %v3124_v45 }
0x2103   :  { %v3123_v19 = vpop.xlane.xlu1 %3122 }
0x2104   :  { %v3127_v6 = vmul.f32 0.03125, %v3123_v19 }
0x2105   :  { %v3126_v4 = vpop.xlane.xlu0 %3125 }
0x2106   :  { %v3129_v5 = vadd.f32 1e-05, %v3127_v6  ;;  %v3128_v54 = vmul.f32 0.03125, %v3126_v4 }
0x2108   :  { %4072 = vrsqrt.f32 %v3129_v5  ;;  %v3130_v7 = vadd.f32 1e-05, %v3128_v54 }
0x210a   :  { %4074 = vrsqrt.f32 %v3130_v7 }
0x2112   :  { %v4073_v8 = vpop.eup %4072 }
0x2113   :  { %v3133_v11 = vmul.f32 %v4073_v8, %v3117_v38 }
0x2114   :  { %v4075_v12 = vpop.eup %4074 }
0x2115   :  { %v3134_v13 = vmul.f32 %v4075_v12, %v3118_v52  ;;  %v3142_v3 = vmul.f32 %v3365_v10, %v3133_v11 }
0x2117   :  { %v3143_v39 = vmul.f32 %v3365_v10, %v3134_v13  ;;  %v3151_v0 = vadd.f32 %v3366_v25, %v3142_v3 }
0x2119   :  { %v3152_v14 = vadd.f32 %v3366_v25, %v3143_v39  ;;  %3153 = vst.msk [vmem:[#allocation2] sm:$0xff] %vm5025_vm4, %v3151_v0 }
0x211b   :  { %3154 = vst.msk [vmem:[#allocation2 + $0x8] sm:$0xff] %vm5026_vm5, %v3152_v14 }
0x211c   :  { %4087 = shalt.err (!%p4084_p4)
}
0x211d   :  { %s4088_s20 = scalar_lea.hbm %s4315_s4, 256 }
0x211e   :  { %p4089_p5 = scmp.ne.s32.totalorder %s4315_s4, %s4088_s20  ;;  %p4092_p6 = scmp.lt.u32.totalorder %s4088_s20, %s4315_s4 }
0x2120   :  { %p4094_p7 = pnand %p4092_p6, %p4089_p5 }
0x2122   :  { %4097 = shalt.err (!%p4094_p7)
}
0x2123   :  { %s4141_s27 = smov 128  }
0x2124   :  { %3166 = dma.vmem_to_hbm [thread:$0]  %s3161_s22, 256, %s4315_s4, [#allocation3], %s4141_s27, %s4141_s27, %s4137_s9  }
0x2125   :  { %4098 = dma.done.wait [#allocation3], 256  }
0x2126   :  { %4099 = vsyncadd [#allocation3], 4294967040 }
0x2127   :  { %3170 = vsyncpa [#allocation3], 1 }

</bundles_post_ra>
